<compile_context>
chip_gen: v7x
topology: tpu7x:2x2x1
jax: 0.10.0
libtpu: 0.0.40
codegen_flags: <defaults>
</compile_context>

<pallas_src>
import functools

import jax
import jax.numpy as jnp
from jax.experimental import pallas as pl
from jax.experimental.pallas import tpu as pltpu

NF = 24            # nf
NUM_LAYERS = 7     # num_layers
RADIUS = 2         # guided filter radius
GF_EPS = 1e-4      # guided filter eps
IN_EPS = 1e-5      # InstanceNorm2d default eps
LRELU_SLOPE = 0.2


# ---------------------------------------------------------------------------
# Kernel 1: fused ContextAggregationNet (per-exposure grid step)
# ---------------------------------------------------------------------------

def can_fused_kernel(x_ref, rowcol_ref, w0_ref, wrest_ref, gam_ref, bet_ref,
                     w01_ref, headw_ref, headb_ref, out_ref, stack_ref,
                     *, h, w, dilations):
    """6 dilated 3x3 convs + AdaptiveNorm(InstanceNorm) + LeakyReLU + 1x1 head.

    x_ref      : (1, 1, P)     low-res plane, flat spatial (P = h*w) on lanes
    rowcol_ref : (2, 1, P)     int32 spatial row / col index of each flat position
    w0_ref     : (NF, 9)       bf16 layer-0 weights, col = tap (kh*3+kw)
    wrest_ref  : (5, NF, 9*NF) bf16 layer 1..5 weights, col = tap*NF + ci
    gam_ref    : (6, NF, 1)    f32 instance-norm gamma per layer
    bet_ref    : (6, NF, 1)    f32 instance-norm beta per layer
    w01_ref    : (6, 2)        f32 SMEM AdaptiveNorm (w0, w1) per layer
    headw_ref  : (1, NF)       f32 1x1 head weight
    headb_ref  : (1,)          f32 SMEM head bias
    out_ref    : (1, 1, P)     predicted low-res weight plane
    stack_ref  : (9*NF, P)     f32 VMEM scratch: the 9 shifted/masked taps of a layer
    """
    p = h * w
    row = rowcol_ref[0]                 # (1, P) int32
    col = rowcol_ref[1]                 # (1, P) int32
    inv_p = 1.0 / p

    # Trace-time tap plans: boundary masks built ONCE per unique dilation.
    def build_plan(d):
        plan = []
        for kh in range(3):
            for kw in range(3):
                dh, dw = (kh - 1) * d, (kw - 1) * d
                if abs(dh) >= h or abs(dw) >= w:
                    plan.append(None)                      # tap entirely out of bounds
                    continue
                shift = (-(dh * w + dw)) % p
                conds = []
                if dh > 0:
                    conds.append(row < h - dh)
                elif dh < 0:
                    conds.append(row >= -dh)
                if dw > 0:
                    conds.append(col < w - dw)
                elif dw < 0:
                    conds.append(col >= -dw)
                m = None
                if conds:
                    m = conds[0]
                    for c in conds[1:]:
                        m = jnp.logical_and(m, c)
                plan.append((shift, m))
        return plan

    plans = {d: build_plan(d) for d in sorted(set(dilations))}

    def stage_taps(feat, d):
        """Write the 9 shifted+masked taps of feat (C, P) into stack_ref rows [0, 9*C)."""
        c = feat.shape[0]
        for t, entry in enumerate(plans[d]):
            if entry is None:
                stack_ref[t * c:(t + 1) * c, :] = jnp.zeros((c, p), jnp.float32)
                continue
            shift, m = entry
            src = pltpu.roll(feat, shift, axis=1) if shift else feat
            if m is not None:
                src = jnp.where(m, src, 0.0)               # single select per tap
            stack_ref[t * c:(t + 1) * c, :] = src

    feat = x_ref[0]                                        # (1, P) f32
    for li, d in enumerate(dilations):
        c_in = feat.shape[0]
        stage_taps(feat, d)
        # ONE MXU matmul per layer: (NF, 9*C) x (9*C, P), bf16 operands, f32 accum.
        stack = stack_ref[0:9 * c_in, :].astype(jnp.bfloat16)
        wmat = w0_ref[...] if li == 0 else wrest_ref[li - 1]
        acc = jnp.dot(wmat, stack, preferred_element_type=jnp.float32)   # (NF, P)

        # AdaptiveNorm: w0*y + w1*InstanceNorm(y); single-pass biased stats (f32).
        mean = jnp.sum(acc, axis=1, keepdims=True) * inv_p
        var = jnp.maximum(
            jnp.sum(acc * acc, axis=1, keepdims=True) * inv_p - mean * mean, 0.0)
        inorm = gam_ref[li] * ((acc - mean) * jax.lax.rsqrt(var + IN_EPS)) + bet_ref[li]
        z = w01_ref[li, 0] * acc + w01_ref[li, 1] * inorm
        feat = jnp.maximum(z, LRELU_SLOPE * z)             # LeakyReLU(0.2), one mul + max

    # fused 1x1 head (NF -> 1) with bias
    out_ref[0] = (jnp.dot(headw_ref[...], feat, preferred_element_type=jnp.float32)
                  + headb_ref[0])


def _can_fused(x_flat, rowcol, w0, wrest, gammas, betas, w01, headw, headb,
               *, h, w, dilations):
    n = x_flat.shape[0]
    p = h * w
    nlay = len(dilations)
    kernel = functools.partial(can_fused_kernel, h=h, w=w, dilations=tuple(dilations))
    return pl.pallas_call(
        kernel,
        out_shape=jax.ShapeDtypeStruct((n, 1, p), jnp.float32),
        grid=(n,),
        in_specs=[
            pl.BlockSpec((1, 1, p), lambda i: (i, 0, 0)),                 # x plane
            pl.BlockSpec((2, 1, p), lambda i: (0, 0, 0)),                 # row/col idx
            pl.BlockSpec((NF, 9), lambda i: (0, 0)),                      # layer-0 W
            pl.BlockSpec((nlay - 1, NF, 9 * NF), lambda i: (0, 0, 0)),    # layers 1..5 W
            pl.BlockSpec((nlay, NF, 1), lambda i: (0, 0, 0)),             # gammas
            pl.BlockSpec((nlay, NF, 1), lambda i: (0, 0, 0)),             # betas
            pl.BlockSpec(memory_space=pltpu.MemorySpace.SMEM),            # w01 (6,2)
            pl.BlockSpec((1, NF), lambda i: (0, 0)),                      # head W
            pl.BlockSpec(memory_space=pltpu.MemorySpace.SMEM),            # head b (1,)
        ],
        out_specs=pl.BlockSpec((1, 1, p), lambda i: (i, 0, 0)),
        scratch_shapes=[pltpu.VMEM((9 * NF, p), jnp.float32)],            # tap stack
        compiler_params=pltpu.CompilerParams(dimension_semantics=("parallel",)),
    )(x_flat, rowcol, w0, wrest, gammas, betas, w01, headw, headb)


# ---------------------------------------------------------------------------
# Kernel 2: guided-filter low-res coefficients (grid over exposures, parallel)
# ---------------------------------------------------------------------------

def gf_lr_kernel(p_ref, i_ref, sh_ref, swt_ref, a_ref, b_ref, *, eps):
    """Boundary-clipped box means via band-matrix MXU matmuls -> A, B coefficients.

    p_ref/i_ref : (1, h, w) f32   network weight plane / guide plane (one exposure)
    sh_ref      : (h, h)    f32   row-box matrix, count-normalized
    swt_ref     : (w, w)    f32   column-box matrix (transposed), count-normalized
    a_ref/b_ref : (1, h, w) bf16  guided-filter coefficients
    """
    sh = sh_ref[...]
    swt = swt_ref[...]
    ip = i_ref[0]
    pp = p_ref[0]

    def box(x):
        v = jnp.dot(sh, x, preferred_element_type=jnp.float32)
        return jnp.dot(v, swt, preferred_element_type=jnp.float32)

    mean_i = box(ip)
    mean_p = box(pp)
    mean_ip = box(ip * pp)
    mean_ii = box(ip * ip)
    cov_ip = mean_ip - mean_i * mean_p
    var_i = mean_ii - mean_i * mean_i
    a = cov_ip / (var_i + eps)
    b = mean_p - a * mean_i
    a_ref[0] = a.astype(a_ref.dtype)
    b_ref[0] = b.astype(b_ref.dtype)


def _gf_lr(p_lr, i_lr, r, eps):
    n, h, w = p_lr.shape

    def norm_band(size):
        idx = jnp.arange(size)
        band = (jnp.abs(idx[:, None] - idx[None, :]) <= r).astype(jnp.float32)
        return band, band.sum(axis=1)

    band_h, cnt_h = norm_band(h)
    band_w, cnt_w = norm_band(w)
    sh = band_h / cnt_h[:, None]                  # (h, h) boundary-clipped row box
    swt = band_w / cnt_w[None, :]                 # (w, w) boundary-clipped col box

    kernel = functools.partial(gf_lr_kernel, eps=eps)
    return pl.pallas_call(
        kernel,
        out_shape=(jax.ShapeDtypeStruct((n, h, w), jnp.bfloat16),
                   jax.ShapeDtypeStruct((n, h, w), jnp.bfloat16)),
        grid=(n,),
        in_specs=[
            pl.BlockSpec((1, h, w), lambda k: (k, 0, 0)),
            pl.BlockSpec((1, h, w), lambda k: (k, 0, 0)),
            pl.BlockSpec((h, h), lambda k: (0, 0)),
            pl.BlockSpec((w, w), lambda k: (0, 0)),
        ],
        out_specs=(pl.BlockSpec((1, h, w), lambda k: (k, 0, 0)),
                   pl.BlockSpec((1, h, w), lambda k: (k, 0, 0))),
        compiler_params=pltpu.CompilerParams(dimension_semantics=("parallel",)),
    )(p_lr, i_lr, sh, swt)


# ---------------------------------------------------------------------------
# Kernel 3: upsample + guide + normalize + fuse (row-tiled over high-res)
# ---------------------------------------------------------------------------

def fuse_kernel(ab_ref, rh_ref, rwt_ref, xhr_ref, o_ref, w_ref, *, n_exp, lw):
    """One row tile of the high-res output.

    ab_ref  : (h, 2N*lw) bf16   [A_0..A_{N-1} | B_0..B_{N-1}] low-res planes
    rh_ref  : (Th, h)    bf16   row-interp rows for this tile
    rwt_ref : (lw, Wh)   bf16   column-interp matrix (transposed)
    xhr_ref : (N, Th, Wh) f32   high-res guides
    o_ref   : (Th, Wh)          fused output tile
    w_ref   : (N, Th, Wh)       normalized weights tile
    """
    # batched row-interpolation over all 2N planes at once (lane-dense matmul)
    tmp = jnp.dot(rh_ref[...], ab_ref[...],
                  preferred_element_type=jnp.float32)          # (Th, 2N*lw) f32
    rwt = rwt_ref[...]

    denom = None
    o_un = None
    for k in range(n_exp):
        a_hr = jnp.dot(tmp[:, k * lw:(k + 1) * lw].astype(jnp.bfloat16), rwt,
                       preferred_element_type=jnp.float32)
        b_hr = jnp.dot(tmp[:, (n_exp + k) * lw:(n_exp + k + 1) * lw].astype(jnp.bfloat16),
                       rwt, preferred_element_type=jnp.float32)
        x_k = xhr_ref[k]
        wn = jnp.abs(a_hr * x_k + b_hr) + 1e-8
        w_ref[k] = wn                                          # unnormalized (pass 1)
        denom = wn if denom is None else denom + wn
        contrib = wn * x_k                                     # accumulate output now
        o_un = contrib if o_un is None else o_un + contrib

    inv_d = pl.reciprocal(denom, approx=True)                  # EUP, otherwise idle
    o_ref[...] = jnp.clip(o_un * inv_d, 0.0, 1.0)

    for k in range(n_exp):                                     # pass 2: rescale only
        w_ref[k] = w_ref[k] * inv_d


def _fuse_tile_h(hh, wh, n_exp):
    """Row-tile height: multiple of 8, VMEM-budgeted (safe on v5e 16 MiB scoped /
    v7x 64 MiB physical), and >= 2 grid steps when possible (v7x second core)."""
    # dominant per-step VMEM: (n guide + n weight + 1 output) f32 row tiles, x2 buffers
    bytes_per_row = (2 * n_exp + 1) * wh * 4 * 2
    t = (12 * 1024 * 1024) // max(bytes_per_row, 1)
    t = min(t, 256, hh)
    if hh >= 16:
        t = min(t, -(-hh // 2))                                # at least 2 grid steps
    t = max(8, (t // 8) * 8)
    return t


def _fuse(ab, rh, rwt, x_hr_planes):
    n_exp, hh, wh = x_hr_planes.shape
    lh = ab.shape[0]
    lw = rwt.shape[0]
    tile_h = _fuse_tile_h(hh, wh, n_exp)
    kernel = functools.partial(fuse_kernel, n_exp=n_exp, lw=lw)
    return pl.pallas_call(
        kernel,
        out_shape=(jax.ShapeDtypeStruct((hh, wh), jnp.float32),
                   jax.ShapeDtypeStruct((n_exp, hh, wh), jnp.float32)),
        grid=(pl.cdiv(hh, tile_h),),
        in_specs=[
            pl.BlockSpec((lh, 2 * n_exp * lw), lambda i: (0, 0)),
            pl.BlockSpec((tile_h, lh), lambda i: (i, 0)),
            pl.BlockSpec((lw, wh), lambda i: (0, 0)),
            pl.BlockSpec((n_exp, tile_h, wh), lambda i: (0, i, 0)),
        ],
        out_specs=(pl.BlockSpec((tile_h, wh), lambda i: (i, 0)),
                   pl.BlockSpec((n_exp, tile_h, wh), lambda i: (0, i, 0))),
        compiler_params=pltpu.CompilerParams(
            dimension_semantics=("parallel",),
            vmem_limit_bytes=32 * 1024 * 1024),
    )(ab, rh, rwt, x_hr_planes)


# ---------------------------------------------------------------------------
# JAX glue + forward
# ---------------------------------------------------------------------------

def _bilinear_matrix(in_size, out_size):
    # F.interpolate(mode='bilinear', align_corners=False) as a matrix
    scale = in_size / out_size
    dst = jnp.arange(out_size, dtype=jnp.float32)
    src = jnp.maximum(scale * (dst + 0.5) - 0.5, 0.0)
    i0 = jnp.clip(jnp.floor(src).astype(jnp.int32), 0, in_size - 1)
    i1 = jnp.minimum(i0 + 1, in_size - 1)
    frac = src - i0.astype(jnp.float32)
    rows = jnp.arange(out_size)
    mat = jnp.zeros((out_size, in_size), jnp.float32)
    mat = mat.at[rows, i0].add(1.0 - frac)
    mat = mat.at[rows, i1].add(frac)
    return mat


def mefnet_forward(params, x_lr, x_hr):
    n, _, h, w = x_lr.shape
    hh, wh = x_hr.shape[2], x_hr.shape[3]
    p = h * w
    dilations = [2 ** i if i < NUM_LAYERS - 2 else 1 for i in range(NUM_LAYERS - 1)]
    nlay = len(dilations)

    # --- parameter repacking (trace-time glue) ---
    w0 = params["conv0_w"].reshape(NF, 9).astype(jnp.bfloat16)              # [co, tap]
    wrest = jnp.stack([params[f"conv{i}_w"] for i in range(1, nlay)])       # (5,NF,NF,3,3)
    wrest = (wrest.reshape(nlay - 1, NF, NF, 9)                             # [l, co, ci, t]
                  .transpose(0, 1, 3, 2)                                    # [l, co, t, ci]
                  .reshape(nlay - 1, NF, 9 * NF)
                  .astype(jnp.bfloat16))
    gammas = jnp.stack([params[f"gamma{i}"] for i in range(nlay)]).reshape(nlay, NF, 1)
    betas = jnp.stack([params[f"beta{i}"] for i in range(nlay)]).reshape(nlay, NF, 1)
    w01 = jnp.stack([params[f"w01_{i}"] for i in range(nlay)])              # (6, 2)
    headw = params["head_w"]                                                # (1, NF) f32
    headb = params["head_b"]                                                # (1,)

    rows = jnp.broadcast_to(jnp.arange(h, dtype=jnp.int32)[:, None], (h, w))
    cols = jnp.broadcast_to(jnp.arange(w, dtype=jnp.int32)[None, :], (h, w))
    rowcol = jnp.stack([rows.reshape(1, p), cols.reshape(1, p)])            # (2,1,P)

    # --- ContextAggregationNet (single fused kernel) ---
    x_flat = x_lr.reshape(n, 1, p)
    w_lr = _can_fused(x_flat, rowcol, w0, wrest, gammas, betas, w01, headw, headb,
                      h=h, w=w, dilations=dilations)                        # (n,1,P)
    w_lr = w_lr.reshape(n, h, w)

    # --- FastGuidedFilter (low-res coefficients, bf16 out) ---
    a_lr, b_lr = _gf_lr(w_lr, x_lr[:, 0], RADIUS, GF_EPS)

    # --- bilinear upsample + guide + exposure fusion ---
    rh = _bilinear_matrix(h, hh).astype(jnp.bfloat16)                       # (Hh, h)
    rwt = _bilinear_matrix(w, wh).T.astype(jnp.bfloat16)                    # (w, Wh)
    ab = (jnp.concatenate([a_lr, b_lr], axis=0)                             # (2n,h,w) bf16
             .transpose(1, 0, 2)
             .reshape(h, 2 * n * w))                                        # (h, 2n*w) bf16
    o_hr, w_hr = _fuse(ab, rh, rwt, x_hr[:, 0])
    return o_hr.reshape(1, 1, hh, wh), w_hr.reshape(n, 1, hh, wh)


if __name__ == "__main__":
    key = jax.random.PRNGKey(0)
    n_exp, h, w = 3, 16, 16
    hh, wh = 32, 32

    # Deterministic synthetic parameters (shapes follow the PyTorch __init__;
    # random values instead of the literal w0=1/w1=0 so every path is exercised).
    params = {}
    in_ch = 1
    for i in range(NUM_LAYERS - 1):
        key, k1, k2, k3 = jax.random.split(key, 4)
        params[f"conv{i}_w"] = 0.1 * jax.random.normal(k1, (NF, in_ch, 3, 3), jnp.float32)
        params[f"gamma{i}"] = 1.0 + 0.1 * jax.random.normal(k2, (NF,), jnp.float32)
        params[f"beta{i}"] = 0.05 * jax.random.normal(k3, (NF,), jnp.float32)
        params[f"w01_{i}"] = jnp.array([1.0, 0.1 * (i + 1)], jnp.float32)  # AdaptiveNorm (w0, w1)
        in_ch = NF
    key, k1 = jax.random.split(key)
    params["head_w"] = 0.1 * jax.random.normal(k1, (1, NF), jnp.float32)   # Conv2d(24,1,1) weight
    params["head_b"] = jnp.array([0.05], jnp.float32)                      # its bias

    key, kx = jax.random.split(key)
    x_hr = jax.random.uniform(kx, (n_exp, 1, hh, wh), jnp.float32)
    # low-res inputs = 2x2 average-pooled high-res stack (as in a MEF pipeline)
    x_lr = x_hr.reshape(n_exp, 1, h, 2, w, 2).mean(axis=(3, 5))

    o_hr, w_hr = jax.jit(mefnet_forward)(params, x_lr, x_hr)
    jax.block_until_ready((o_hr, w_hr))
    assert o_hr.shape == (1, 1, hh, wh) and w_hr.shape == (n_exp, 1, hh, wh)
    assert bool(jnp.all(jnp.isfinite(o_hr))) and bool(jnp.all(jnp.isfinite(w_hr)))
    # fusion weights must be a (near-)partition of unity over exposures
    wsum = jnp.sum(w_hr, axis=0)
    assert float(jnp.max(jnp.abs(wsum - 1.0))) < 5e-2
    print("KERNEL_OK")
</pallas_src>

<mosaic_0001>
module attributes {stable_mosaic.version = 11 : i64} {
  func.func private @main(%arg0: i32) attributes {dimension_semantics = [#tpu.dimension_semantics<core_parallel>], iteration_bounds = array<i64: 2>, tpu.core_type = #tpu.core_type<sc_scalar_subcore>, window_params = []} {
    return
  }
}

module attributes {stable_mosaic.version = 11 : i64} {
  func.func private @main(%arg0: i32) attributes {dimension_semantics = [#tpu.dimension_semantics<core_parallel>], iteration_bounds = array<i64: 2>, tpu.core_type = #tpu.core_type<sc_scalar_subcore>, window_params = []} {
    return
  }
}

module attributes {stable_mosaic.version = 11 : i64} {
  func.func @gf_lr_kernel(%arg0: i32, %arg1: memref<1x16x16xf32, #tpu.memory_space<vmem>>, %arg2: memref<1x16x16xf32, #tpu.memory_space<vmem>>, %arg3: memref<16x16xf32, #tpu.memory_space<vmem>>, %arg4: memref<16x16xf32, #tpu.memory_space<vmem>>, %arg5: memref<1x16x16xbf16, #tpu.memory_space<vmem>>, %arg6: memref<1x16x16xbf16, #tpu.memory_space<vmem>>) attributes {dimension_semantics = [#tpu.dimension_semantics<parallel>], iteration_bounds = array<i64: 3>, scalar_prefetch = 0 : i64, scratch_operands = 0 : i64, tpu.core_type = #tpu.core_type<tc>, window_params = [{transform_indices = @transform_0, window_bounds = array<i64: 1, 16, 16>}, {transform_indices = @transform_1, window_bounds = array<i64: 1, 16, 16>}, {pipeline_mode = #tpu.pipeline_mode<synchronous>, transform_indices = @transform_2, window_bounds = array<i64: 16, 16>}, {pipeline_mode = #tpu.pipeline_mode<synchronous>, transform_indices = @transform_3, window_bounds = array<i64: 16, 16>}, {transform_indices = @transform_4, window_bounds = array<i64: 1, 16, 16>}, {transform_indices = @transform_5, window_bounds = array<i64: 1, 16, 16>}]} {
    %c0 = arith.constant 0 : index
    %c0_0 = arith.constant 0 : index
    %0 = vector.load %arg3[%c0, %c0_0] : memref<16x16xf32, #tpu.memory_space<vmem>>, vector<16x16xf32>
    %c0_1 = arith.constant 0 : index
    %c0_2 = arith.constant 0 : index
    %1 = vector.load %arg4[%c0_1, %c0_2] : memref<16x16xf32, #tpu.memory_space<vmem>>, vector<16x16xf32>
    %c0_3 = arith.constant 0 : index
    %c0_4 = arith.constant 0 : index
    %c0_5 = arith.constant 0 : index
    %2 = vector.load %arg2[%c0_3, %c0_4, %c0_5] : memref<1x16x16xf32, #tpu.memory_space<vmem>>, vector<1x16x16xf32>
    %3 = vector.shape_cast %2 : vector<1x16x16xf32> to vector<16x16xf32>
    %c0_6 = arith.constant 0 : index
    %c0_7 = arith.constant 0 : index
    %c0_8 = arith.constant 0 : index
    %4 = vector.load %arg1[%c0_6, %c0_7, %c0_8] : memref<1x16x16xf32, #tpu.memory_space<vmem>>, vector<1x16x16xf32>
    %5 = vector.shape_cast %4 : vector<1x16x16xf32> to vector<16x16xf32>
    %cst = arith.constant dense<0.000000e+00> : vector<16x16xf32>
    %6 = tpu.matmul %0, %3, %cst {dimension_numbers = #tpu.dot_dimension_numbers<[1], [0], [0], [1], [0, 0, 1, 1], [], []>} : vector<16x16xf32>, vector<16x16xf32>, vector<16x16xf32> -> vector<16x16xf32>
    %cst_9 = arith.constant dense<0.000000e+00> : vector<16x16xf32>
    %7 = tpu.matmul %6, %1, %cst_9 {dimension_numbers = #tpu.dot_dimension_numbers<[1], [0], [0], [1], [0, 0, 1, 1], [], []>} : vector<16x16xf32>, vector<16x16xf32>, vector<16x16xf32> -> vector<16x16xf32>
    %cst_10 = arith.constant dense<0.000000e+00> : vector<16x16xf32>
    %8 = tpu.matmul %0, %5, %cst_10 {dimension_numbers = #tpu.dot_dimension_numbers<[1], [0], [0], [1], [0, 0, 1, 1], [], []>} : vector<16x16xf32>, vector<16x16xf32>, vector<16x16xf32> -> vector<16x16xf32>
    %cst_11 = arith.constant dense<0.000000e+00> : vector<16x16xf32>
    %9 = tpu.matmul %8, %1, %cst_11 {dimension_numbers = #tpu.dot_dimension_numbers<[1], [0], [0], [1], [0, 0, 1, 1], [], []>} : vector<16x16xf32>, vector<16x16xf32>, vector<16x16xf32> -> vector<16x16xf32>
    %10 = arith.mulf %3, %5 : vector<16x16xf32>
    %cst_12 = arith.constant dense<0.000000e+00> : vector<16x16xf32>
    %11 = tpu.matmul %0, %10, %cst_12 {dimension_numbers = #tpu.dot_dimension_numbers<[1], [0], [0], [1], [0, 0, 1, 1], [], []>} : vector<16x16xf32>, vector<16x16xf32>, vector<16x16xf32> -> vector<16x16xf32>
    %cst_13 = arith.constant dense<0.000000e+00> : vector<16x16xf32>
    %12 = tpu.matmul %11, %1, %cst_13 {dimension_numbers = #tpu.dot_dimension_numbers<[1], [0], [0], [1], [0, 0, 1, 1], [], []>} : vector<16x16xf32>, vector<16x16xf32>, vector<16x16xf32> -> vector<16x16xf32>
    %13 = arith.mulf %3, %3 : vector<16x16xf32>
    %cst_14 = arith.constant dense<0.000000e+00> : vector<16x16xf32>
    %14 = tpu.matmul %0, %13, %cst_14 {dimension_numbers = #tpu.dot_dimension_numbers<[1], [0], [0], [1], [0, 0, 1, 1], [], []>} : vector<16x16xf32>, vector<16x16xf32>, vector<16x16xf32> -> vector<16x16xf32>
    %cst_15 = arith.constant dense<0.000000e+00> : vector<16x16xf32>
    %15 = tpu.matmul %14, %1, %cst_15 {dimension_numbers = #tpu.dot_dimension_numbers<[1], [0], [0], [1], [0, 0, 1, 1], [], []>} : vector<16x16xf32>, vector<16x16xf32>, vector<16x16xf32> -> vector<16x16xf32>
    %16 = arith.mulf %7, %9 : vector<16x16xf32>
    %17 = arith.subf %12, %16 : vector<16x16xf32>
    %18 = arith.mulf %7, %7 : vector<16x16xf32>
    %19 = arith.subf %15, %18 : vector<16x16xf32>
    %cst_16 = arith.constant 9.99999974E-5 : f32
    %20 = vector.broadcast %cst_16 : f32 to vector<16x16xf32>
    %21 = arith.addf %19, %20 : vector<16x16xf32>
    %22 = arith.divf %17, %21 : vector<16x16xf32>
    %23 = arith.mulf %22, %7 : vector<16x16xf32>
    %24 = arith.subf %9, %23 : vector<16x16xf32>
    %25 = arith.truncf %22 : vector<16x16xf32> to vector<16x16xbf16>
    %c0_17 = arith.constant 0 : index
    %c0_18 = arith.constant 0 : index
    %c0_19 = arith.constant 0 : index
    %26 = vector.load %arg5[%c0_17, %c0_18, %c0_19] : memref<1x16x16xbf16, #tpu.memory_space<vmem>>, vector<1x16x16xbf16>
    %27 = vector.shape_cast %26 : vector<1x16x16xbf16> to vector<16x16xbf16>
    %28 = vector.shape_cast %25 : vector<16x16xbf16> to vector<1x16x16xbf16>
    tpu.vector_store %arg5[%c0_17, %c0_18, %c0_19], %28 {strides = array<i32>} : memref<1x16x16xbf16, #tpu.memory_space<vmem>>, vector<1x16x16xbf16>,
    %29 = arith.truncf %24 : vector<16x16xf32> to vector<16x16xbf16>
    %c0_20 = arith.constant 0 : index
    %c0_21 = arith.constant 0 : index
    %c0_22 = arith.constant 0 : index
    %30 = vector.load %arg6[%c0_20, %c0_21, %c0_22] : memref<1x16x16xbf16, #tpu.memory_space<vmem>>, vector<1x16x16xbf16>
    %31 = vector.shape_cast %30 : vector<1x16x16xbf16> to vector<16x16xbf16>
    %32 = vector.shape_cast %29 : vector<16x16xbf16> to vector<1x16x16xbf16>
    tpu.vector_store %arg6[%c0_20, %c0_21, %c0_22], %32 {strides = array<i32>} : memref<1x16x16xbf16, #tpu.memory_space<vmem>>, vector<1x16x16xbf16>,
    return
  }
  func.func @transform_0(%arg0: i32) -> (i32, i32, i32) {
    %c0_i32 = arith.constant 0 : i32
    %c0_i32_0 = arith.constant 0 : i32
    %c0_i32_1 = arith.constant 0 : i32
    return %arg0, %c0_i32, %c0_i32_0 : i32, i32, i32
  }
  func.func @transform_1(%arg0: i32) -> (i32, i32, i32) {
    %c0_i32 = arith.constant 0 : i32
    %c0_i32_0 = arith.constant 0 : i32
    %c0_i32_1 = arith.constant 0 : i32
    return %arg0, %c0_i32, %c0_i32_0 : i32, i32, i32
  }
  func.func @transform_2(%arg0: i32) -> (i32, i32) {
    %c0_i32 = arith.constant 0 : i32
    %c0_i32_0 = arith.constant 0 : i32
    %c0_i32_1 = arith.constant 0 : i32
    return %c0_i32, %c0_i32_0 : i32, i32
  }
  func.func @transform_3(%arg0: i32) -> (i32, i32) {
    %c0_i32 = arith.constant 0 : i32
    %c0_i32_0 = arith.constant 0 : i32
    %c0_i32_1 = arith.constant 0 : i32
    return %c0_i32, %c0_i32_0 : i32, i32
  }
  func.func @transform_4(%arg0: i32) -> (i32, i32, i32) {
    %c0_i32 = arith.constant 0 : i32
    %c0_i32_0 = arith.constant 0 : i32
    %c0_i32_1 = arith.constant 0 : i32
    return %arg0, %c0_i32, %c0_i32_0 : i32, i32, i32
  }
  func.func @transform_5(%arg0: i32) -> (i32, i32, i32) {
    %c0_i32 = arith.constant 0 : i32
    %c0_i32_0 = arith.constant 0 : i32
    %c0_i32_1 = arith.constant 0 : i32
    return %arg0, %c0_i32, %c0_i32_0 : i32, i32, i32
  }
}

module attributes {stable_mosaic.version = 11 : i64} {
  func.func @can_fused_kernel(%arg0: i32, %arg1: memref<1x1x256xf32, #tpu.memory_space<vmem>>, %arg2: memref<2x1x256xi32, #tpu.memory_space<vmem>>, %arg3: memref<24x9xbf16, #tpu.memory_space<vmem>>, %arg4: memref<5x24x216xbf16, #tpu.memory_space<vmem>>, %arg5: memref<6x24x1xf32, #tpu.memory_space<vmem>>, %arg6: memref<6x24x1xf32, #tpu.memory_space<vmem>>, %arg7: memref<6x2xf32, #tpu.memory_space<smem>>, %arg8: memref<1x24xf32, #tpu.memory_space<vmem>>, %arg9: memref<1xf32, #tpu.memory_space<smem>>, %arg10: memref<1x1x256xf32, #tpu.memory_space<vmem>>, %arg11: memref<216x256xf32, #tpu.memory_space<vmem>>) attributes {dimension_semantics = [#tpu.dimension_semantics<parallel>], iteration_bounds = array<i64: 3>, scalar_prefetch = 0 : i64, scratch_operands = 1 : i64, tpu.core_type = #tpu.core_type<tc>, window_params = [{transform_indices = @transform_0, window_bounds = array<i64: 1, 1, 256>}, {pipeline_mode = #tpu.pipeline_mode<synchronous>, transform_indices = @transform_1, window_bounds = array<i64: 2, 1, 256>}, {pipeline_mode = #tpu.pipeline_mode<synchronous>, transform_indices = @transform_2, window_bounds = array<i64: 24, 9>}, {pipeline_mode = #tpu.pipeline_mode<synchronous>, transform_indices = @transform_3, window_bounds = array<i64: 5, 24, 216>}, {pipeline_mode = #tpu.pipeline_mode<synchronous>, transform_indices = @transform_4, window_bounds = array<i64: 6, 24, 1>}, {pipeline_mode = #tpu.pipeline_mode<synchronous>, transform_indices = @transform_5, window_bounds = array<i64: 6, 24, 1>}, {transform_indices = @transform_6, window_bounds = array<i64: 6, 2>}, {pipeline_mode = #tpu.pipeline_mode<synchronous>, transform_indices = @transform_7, window_bounds = array<i64: 1, 24>}, {transform_indices = @transform_8, window_bounds = array<i64: 1>}, {transform_indices = @transform_9, window_bounds = array<i64: 1, 1, 256>}]} {
    %c0 = arith.constant 0 : index
    %c0_0 = arith.constant 0 : index
    %c0_1 = arith.constant 0 : index
    %0 = vector.load %arg2[%c0, %c0_0, %c0_1] : memref<2x1x256xi32, #tpu.memory_space<vmem>>, vector<1x1x256xi32>
    %1 = vector.shape_cast %0 : vector<1x1x256xi32> to vector<1x256xi32>
    %c1 = arith.constant 1 : index
    %c0_2 = arith.constant 0 : index
    %c0_3 = arith.constant 0 : index
    %2 = vector.load %arg2[%c1, %c0_2, %c0_3] : memref<2x1x256xi32, #tpu.memory_space<vmem>>, vector<1x1x256xi32>
    %3 = vector.shape_cast %2 : vector<1x1x256xi32> to vector<1x256xi32>
    %c1_i32 = arith.constant 1 : i32
    %4 = vector.broadcast %c1_i32 : i32 to vector<1x256xi32>
    %5 = arith.cmpi sge, %1, %4 : vector<1x256xi32>
    %c1_i32_4 = arith.constant 1 : i32
    %6 = vector.broadcast %c1_i32_4 : i32 to vector<1x256xi32>
    %7 = arith.cmpi sge, %3, %6 : vector<1x256xi32>
    %8 = arith.andi %5, %7 : vector<1x256xi1>
    %c1_i32_5 = arith.constant 1 : i32
    %9 = vector.broadcast %c1_i32_5 : i32 to vector<1x256xi32>
    %10 = arith.cmpi sge, %1, %9 : vector<1x256xi32>
    %c1_i32_6 = arith.constant 1 : i32
    %11 = vector.broadcast %c1_i32_6 : i32 to vector<1x256xi32>
    %12 = arith.cmpi sge, %1, %11 : vector<1x256xi32>
    %c15_i32 = arith.constant 15 : i32
    %13 = vector.broadcast %c15_i32 : i32 to vector<1x256xi32>
    %14 = arith.cmpi slt, %3, %13 : vector<1x256xi32>
    %15 = arith.andi %12, %14 : vector<1x256xi1>
    %c1_i32_7 = arith.constant 1 : i32
    %16 = vector.broadcast %c1_i32_7 : i32 to vector<1x256xi32>
    %17 = arith.cmpi sge, %3, %16 : vector<1x256xi32>
    %c15_i32_8 = arith.constant 15 : i32
    %18 = vector.broadcast %c15_i32_8 : i32 to vector<1x256xi32>
    %19 = arith.cmpi slt, %3, %18 : vector<1x256xi32>
    %c15_i32_9 = arith.constant 15 : i32
    %20 = vector.broadcast %c15_i32_9 : i32 to vector<1x256xi32>
    %21 = arith.cmpi slt, %1, %20 : vector<1x256xi32>
    %c1_i32_10 = arith.constant 1 : i32
    %22 = vector.broadcast %c1_i32_10 : i32 to vector<1x256xi32>
    %23 = arith.cmpi sge, %3, %22 : vector<1x256xi32>
    %24 = arith.andi %21, %23 : vector<1x256xi1>
    %c15_i32_11 = arith.constant 15 : i32
    %25 = vector.broadcast %c15_i32_11 : i32 to vector<1x256xi32>
    %26 = arith.cmpi slt, %1, %25 : vector<1x256xi32>
    %c15_i32_12 = arith.constant 15 : i32
    %27 = vector.broadcast %c15_i32_12 : i32 to vector<1x256xi32>
    %28 = arith.cmpi slt, %1, %27 : vector<1x256xi32>
    %c15_i32_13 = arith.constant 15 : i32
    %29 = vector.broadcast %c15_i32_13 : i32 to vector<1x256xi32>
    %30 = arith.cmpi slt, %3, %29 : vector<1x256xi32>
    %31 = arith.andi %28, %30 : vector<1x256xi1>
    %c2_i32 = arith.constant 2 : i32
    %32 = vector.broadcast %c2_i32 : i32 to vector<1x256xi32>
    %33 = arith.cmpi sge, %1, %32 : vector<1x256xi32>
    %c2_i32_14 = arith.constant 2 : i32
    %34 = vector.broadcast %c2_i32_14 : i32 to vector<1x256xi32>
    %35 = arith.cmpi sge, %3, %34 : vector<1x256xi32>
    %36 = arith.andi %33, %35 : vector<1x256xi1>
    %c2_i32_15 = arith.constant 2 : i32
    %37 = vector.broadcast %c2_i32_15 : i32 to vector<1x256xi32>
    %38 = arith.cmpi sge, %1, %37 : vector<1x256xi32>
    %c2_i32_16 = arith.constant 2 : i32
    %39 = vector.broadcast %c2_i32_16 : i32 to vector<1x256xi32>
    %40 = arith.cmpi sge, %1, %39 : vector<1x256xi32>
    %c14_i32 = arith.constant 14 : i32
    %41 = vector.broadcast %c14_i32 : i32 to vector<1x256xi32>
    %42 = arith.cmpi slt, %3, %41 : vector<1x256xi32>
    %43 = arith.andi %40, %42 : vector<1x256xi1>
    %c2_i32_17 = arith.constant 2 : i32
    %44 = vector.broadcast %c2_i32_17 : i32 to vector<1x256xi32>
    %45 = arith.cmpi sge, %3, %44 : vector<1x256xi32>
    %c14_i32_18 = arith.constant 14 : i32
    %46 = vector.broadcast %c14_i32_18 : i32 to vector<1x256xi32>
    %47 = arith.cmpi slt, %3, %46 : vector<1x256xi32>
    %c14_i32_19 = arith.constant 14 : i32
    %48 = vector.broadcast %c14_i32_19 : i32 to vector<1x256xi32>
    %49 = arith.cmpi slt, %1, %48 : vector<1x256xi32>
    %c2_i32_20 = arith.constant 2 : i32
    %50 = vector.broadcast %c2_i32_20 : i32 to vector<1x256xi32>
    %51 = arith.cmpi sge, %3, %50 : vector<1x256xi32>
    %52 = arith.andi %49, %51 : vector<1x256xi1>
    %c14_i32_21 = arith.constant 14 : i32
    %53 = vector.broadcast %c14_i32_21 : i32 to vector<1x256xi32>
    %54 = arith.cmpi slt, %1, %53 : vector<1x256xi32>
    %c14_i32_22 = arith.constant 14 : i32
    %55 = vector.broadcast %c14_i32_22 : i32 to vector<1x256xi32>
    %56 = arith.cmpi slt, %1, %55 : vector<1x256xi32>
    %c14_i32_23 = arith.constant 14 : i32
    %57 = vector.broadcast %c14_i32_23 : i32 to vector<1x256xi32>
    %58 = arith.cmpi slt, %3, %57 : vector<1x256xi32>
    %59 = arith.andi %56, %58 : vector<1x256xi1>
    %c4_i32 = arith.constant 4 : i32
    %60 = vector.broadcast %c4_i32 : i32 to vector<1x256xi32>
    %61 = arith.cmpi sge, %1, %60 : vector<1x256xi32>
    %c4_i32_24 = arith.constant 4 : i32
    %62 = vector.broadcast %c4_i32_24 : i32 to vector<1x256xi32>
    %63 = arith.cmpi sge, %3, %62 : vector<1x256xi32>
    %64 = arith.andi %61, %63 : vector<1x256xi1>
    %c4_i32_25 = arith.constant 4 : i32
    %65 = vector.broadcast %c4_i32_25 : i32 to vector<1x256xi32>
    %66 = arith.cmpi sge, %1, %65 : vector<1x256xi32>
    %c4_i32_26 = arith.constant 4 : i32
    %67 = vector.broadcast %c4_i32_26 : i32 to vector<1x256xi32>
    %68 = arith.cmpi sge, %1, %67 : vector<1x256xi32>
    %c12_i32 = arith.constant 12 : i32
    %69 = vector.broadcast %c12_i32 : i32 to vector<1x256xi32>
    %70 = arith.cmpi slt, %3, %69 : vector<1x256xi32>
    %71 = arith.andi %68, %70 : vector<1x256xi1>
    %c4_i32_27 = arith.constant 4 : i32
    %72 = vector.broadcast %c4_i32_27 : i32 to vector<1x256xi32>
    %73 = arith.cmpi sge, %3, %72 : vector<1x256xi32>
    %c12_i32_28 = arith.constant 12 : i32
    %74 = vector.broadcast %c12_i32_28 : i32 to vector<1x256xi32>
    %75 = arith.cmpi slt, %3, %74 : vector<1x256xi32>
    %c12_i32_29 = arith.constant 12 : i32
    %76 = vector.broadcast %c12_i32_29 : i32 to vector<1x256xi32>
    %77 = arith.cmpi slt, %1, %76 : vector<1x256xi32>
    %c4_i32_30 = arith.constant 4 : i32
    %78 = vector.broadcast %c4_i32_30 : i32 to vector<1x256xi32>
    %79 = arith.cmpi sge, %3, %78 : vector<1x256xi32>
    %80 = arith.andi %77, %79 : vector<1x256xi1>
    %c12_i32_31 = arith.constant 12 : i32
    %81 = vector.broadcast %c12_i32_31 : i32 to vector<1x256xi32>
    %82 = arith.cmpi slt, %1, %81 : vector<1x256xi32>
    %c12_i32_32 = arith.constant 12 : i32
    %83 = vector.broadcast %c12_i32_32 : i32 to vector<1x256xi32>
    %84 = arith.cmpi slt, %1, %83 : vector<1x256xi32>
    %c12_i32_33 = arith.constant 12 : i32
    %85 = vector.broadcast %c12_i32_33 : i32 to vector<1x256xi32>
    %86 = arith.cmpi slt, %3, %85 : vector<1x256xi32>
    %87 = arith.andi %84, %86 : vector<1x256xi1>
    %c8_i32 = arith.constant 8 : i32
    %88 = vector.broadcast %c8_i32 : i32 to vector<1x256xi32>
    %89 = arith.cmpi sge, %1, %88 : vector<1x256xi32>
    %c8_i32_34 = arith.constant 8 : i32
    %90 = vector.broadcast %c8_i32_34 : i32 to vector<1x256xi32>
    %91 = arith.cmpi sge, %3, %90 : vector<1x256xi32>
    %92 = arith.andi %89, %91 : vector<1x256xi1>
    %c8_i32_35 = arith.constant 8 : i32
    %93 = vector.broadcast %c8_i32_35 : i32 to vector<1x256xi32>
    %94 = arith.cmpi sge, %1, %93 : vector<1x256xi32>
    %c8_i32_36 = arith.constant 8 : i32
    %95 = vector.broadcast %c8_i32_36 : i32 to vector<1x256xi32>
    %96 = arith.cmpi sge, %1, %95 : vector<1x256xi32>
    %c8_i32_37 = arith.constant 8 : i32
    %97 = vector.broadcast %c8_i32_37 : i32 to vector<1x256xi32>
    %98 = arith.cmpi slt, %3, %97 : vector<1x256xi32>
    %99 = arith.andi %96, %98 : vector<1x256xi1>
    %c8_i32_38 = arith.constant 8 : i32
    %100 = vector.broadcast %c8_i32_38 : i32 to vector<1x256xi32>
    %101 = arith.cmpi sge, %3, %100 : vector<1x256xi32>
    %c8_i32_39 = arith.constant 8 : i32
    %102 = vector.broadcast %c8_i32_39 : i32 to vector<1x256xi32>
    %103 = arith.cmpi slt, %3, %102 : vector<1x256xi32>
    %c8_i32_40 = arith.constant 8 : i32
    %104 = vector.broadcast %c8_i32_40 : i32 to vector<1x256xi32>
    %105 = arith.cmpi slt, %1, %104 : vector<1x256xi32>
    %c8_i32_41 = arith.constant 8 : i32
    %106 = vector.broadcast %c8_i32_41 : i32 to vector<1x256xi32>
    %107 = arith.cmpi sge, %3, %106 : vector<1x256xi32>
    %108 = arith.andi %105, %107 : vector<1x256xi1>
    %c8_i32_42 = arith.constant 8 : i32
    %109 = vector.broadcast %c8_i32_42 : i32 to vector<1x256xi32>
    %110 = arith.cmpi slt, %1, %109 : vector<1x256xi32>
    %c8_i32_43 = arith.constant 8 : i32
    %111 = vector.broadcast %c8_i32_43 : i32 to vector<1x256xi32>
    %112 = arith.cmpi slt, %1, %111 : vector<1x256xi32>
    %c8_i32_44 = arith.constant 8 : i32
    %113 = vector.broadcast %c8_i32_44 : i32 to vector<1x256xi32>
    %114 = arith.cmpi slt, %3, %113 : vector<1x256xi32>
    %115 = arith.andi %112, %114 : vector<1x256xi1>
    %c0_45 = arith.constant 0 : index
    %c0_46 = arith.constant 0 : index
    %c0_47 = arith.constant 0 : index
    %116 = vector.load %arg1[%c0_45, %c0_46, %c0_47] : memref<1x1x256xf32, #tpu.memory_space<vmem>>, vector<1x1x256xf32>
    %117 = vector.shape_cast %116 : vector<1x1x256xf32> to vector<1x256xf32>
    %c17_i32 = arith.constant 17 : i32
    %118 = tpu.dynamic_rotate %117 by %c17_i32 dim 1 : vector<1x256xf32>, i32 -> vector<1x256xf32>
    %cst = arith.constant 0.000000e+00 : f32
    %119 = vector.broadcast %cst : f32 to vector<1x256xf32>
    %120 = arith.select %8, %118, %119 : vector<1x256xi1>, vector<1x256xf32>
    %c0_48 = arith.constant 0 : index
    %c0_49 = arith.constant 0 : index
    %121 = vector.load %arg11[%c0_48, %c0_49] : memref<216x256xf32, #tpu.memory_space<vmem>>, vector<1x256xf32>
    tpu.vector_store %arg11[%c0_48, %c0_49], %120 {strides = array<i32>} : memref<216x256xf32, #tpu.memory_space<vmem>>, vector<1x256xf32>,
    %c16_i32 = arith.constant 16 : i32
    %122 = tpu.dynamic_rotate %117 by %c16_i32 dim 1 : vector<1x256xf32>, i32 -> vector<1x256xf32>
    %cst_50 = arith.constant 0.000000e+00 : f32
    %123 = vector.broadcast %cst_50 : f32 to vector<1x256xf32>
    %124 = arith.select %10, %122, %123 : vector<1x256xi1>, vector<1x256xf32>
    %c1_51 = arith.constant 1 : index
    %c0_52 = arith.constant 0 : index
    %125 = vector.load %arg11[%c1_51, %c0_52] : memref<216x256xf32, #tpu.memory_space<vmem>>, vector<1x256xf32>
    tpu.vector_store %arg11[%c1_51, %c0_52], %124 {strides = array<i32>} : memref<216x256xf32, #tpu.memory_space<vmem>>, vector<1x256xf32>,
    %c15_i32_53 = arith.constant 15 : i32
    %126 = tpu.dynamic_rotate %117 by %c15_i32_53 dim 1 : vector<1x256xf32>, i32 -> vector<1x256xf32>
    %cst_54 = arith.constant 0.000000e+00 : f32
    %127 = vector.broadcast %cst_54 : f32 to vector<1x256xf32>
    %128 = arith.select %15, %126, %127 : vector<1x256xi1>, vector<1x256xf32>
    %c2 = arith.constant 2 : index
    %c0_55 = arith.constant 0 : index
    %129 = vector.load %arg11[%c2, %c0_55] : memref<216x256xf32, #tpu.memory_space<vmem>>, vector<1x256xf32>
    tpu.vector_store %arg11[%c2, %c0_55], %128 {strides = array<i32>} : memref<216x256xf32, #tpu.memory_space<vmem>>, vector<1x256xf32>,
    %c1_i32_56 = arith.constant 1 : i32
    %130 = tpu.dynamic_rotate %117 by %c1_i32_56 dim 1 : vector<1x256xf32>, i32 -> vector<1x256xf32>
    %cst_57 = arith.constant 0.000000e+00 : f32
    %131 = vector.broadcast %cst_57 : f32 to vector<1x256xf32>
    %132 = arith.select %17, %130, %131 : vector<1x256xi1>, vector<1x256xf32>
    %c3 = arith.constant 3 : index
    %c0_58 = arith.constant 0 : index
    %133 = vector.load %arg11[%c3, %c0_58] : memref<216x256xf32, #tpu.memory_space<vmem>>, vector<1x256xf32>
    tpu.vector_store %arg11[%c3, %c0_58], %132 {strides = array<i32>} : memref<216x256xf32, #tpu.memory_space<vmem>>, vector<1x256xf32>,
    %c4 = arith.constant 4 : index
    %c0_59 = arith.constant 0 : index
    %134 = vector.load %arg11[%c4, %c0_59] : memref<216x256xf32, #tpu.memory_space<vmem>>, vector<1x256xf32>
    tpu.vector_store %arg11[%c4, %c0_59], %117 {strides = array<i32>} : memref<216x256xf32, #tpu.memory_space<vmem>>, vector<1x256xf32>,
    %c255_i32 = arith.constant 255 : i32
    %135 = tpu.dynamic_rotate %117 by %c255_i32 dim 1 : vector<1x256xf32>, i32 -> vector<1x256xf32>
    %cst_60 = arith.constant 0.000000e+00 : f32
    %136 = vector.broadcast %cst_60 : f32 to vector<1x256xf32>
    %137 = arith.select %19, %135, %136 : vector<1x256xi1>, vector<1x256xf32>
    %c5 = arith.constant 5 : index
    %c0_61 = arith.constant 0 : index
    %138 = vector.load %arg11[%c5, %c0_61] : memref<216x256xf32, #tpu.memory_space<vmem>>, vector<1x256xf32>
    tpu.vector_store %arg11[%c5, %c0_61], %137 {strides = array<i32>} : memref<216x256xf32, #tpu.memory_space<vmem>>, vector<1x256xf32>,
    %c241_i32 = arith.constant 241 : i32
    %139 = tpu.dynamic_rotate %117 by %c241_i32 dim 1 : vector<1x256xf32>, i32 -> vector<1x256xf32>
    %cst_62 = arith.constant 0.000000e+00 : f32
    %140 = vector.broadcast %cst_62 : f32 to vector<1x256xf32>
    %141 = arith.select %24, %139, %140 : vector<1x256xi1>, vector<1x256xf32>
    %c6 = arith.constant 6 : index
    %c0_63 = arith.constant 0 : index
    %142 = vector.load %arg11[%c6, %c0_63] : memref<216x256xf32, #tpu.memory_space<vmem>>, vector<1x256xf32>
    tpu.vector_store %arg11[%c6, %c0_63], %141 {strides = array<i32>} : memref<216x256xf32, #tpu.memory_space<vmem>>, vector<1x256xf32>,
    %c240_i32 = arith.constant 240 : i32
    %143 = tpu.dynamic_rotate %117 by %c240_i32 dim 1 : vector<1x256xf32>, i32 -> vector<1x256xf32>
    %cst_64 = arith.constant 0.000000e+00 : f32
    %144 = vector.broadcast %cst_64 : f32 to vector<1x256xf32>
    %145 = arith.select %26, %143, %144 : vector<1x256xi1>, vector<1x256xf32>
    %c7 = arith.constant 7 : index
    %c0_65 = arith.constant 0 : index
    %146 = vector.load %arg11[%c7, %c0_65] : memref<216x256xf32, #tpu.memory_space<vmem>>, vector<1x256xf32>
    tpu.vector_store %arg11[%c7, %c0_65], %145 {strides = array<i32>} : memref<216x256xf32, #tpu.memory_space<vmem>>, vector<1x256xf32>,
    %c239_i32 = arith.constant 239 : i32
    %147 = tpu.dynamic_rotate %117 by %c239_i32 dim 1 : vector<1x256xf32>, i32 -> vector<1x256xf32>
    %cst_66 = arith.constant 0.000000e+00 : f32
    %148 = vector.broadcast %cst_66 : f32 to vector<1x256xf32>
    %149 = arith.select %31, %147, %148 : vector<1x256xi1>, vector<1x256xf32>
    %c8 = arith.constant 8 : index
    %c0_67 = arith.constant 0 : index
    %150 = vector.load %arg11[%c8, %c0_67] : memref<216x256xf32, #tpu.memory_space<vmem>>, vector<1x256xf32>
    tpu.vector_store %arg11[%c8, %c0_67], %149 {strides = array<i32>} : memref<216x256xf32, #tpu.memory_space<vmem>>, vector<1x256xf32>,
    %c0_68 = arith.constant 0 : index
    %c0_69 = arith.constant 0 : index
    %151 = vector.load %arg11[%c0_68, %c0_69] : memref<216x256xf32, #tpu.memory_space<vmem>>, vector<9x256xf32>
    %152 = arith.truncf %151 : vector<9x256xf32> to vector<9x256xbf16>
    %c0_70 = arith.constant 0 : index
    %c0_71 = arith.constant 0 : index
    %153 = vector.load %arg3[%c0_70, %c0_71] : memref<24x9xbf16, #tpu.memory_space<vmem>>, vector<24x9xbf16>
    %cst_72 = arith.constant dense<0.000000e+00> : vector<24x256xf32>
    %154 = tpu.matmul %153, %152, %cst_72 {dimension_numbers = #tpu.dot_dimension_numbers<[1], [0], [0], [1], [0, 0, 1, 1], [], []>} : vector<24x9xbf16>, vector<9x256xbf16>, vector<24x256xf32> -> vector<24x256xf32>
    %cst_73 = arith.constant dense<0.000000e+00> : vector<24xf32>
    %155 = vector.multi_reduction <add>, %154, %cst_73 [1] : vector<24x256xf32> to vector<24xf32>
    %156 = vector.shape_cast %155 : vector<24xf32> to vector<24x1xf32>
    %cst_74 = arith.constant 3.906250e-03 : f32
    %157 = vector.broadcast %cst_74 : f32 to vector<24x1xf32>
    %158 = arith.mulf %156, %157 : vector<24x1xf32>
    %159 = arith.mulf %154, %154 : vector<24x256xf32>
    %cst_75 = arith.constant dense<0.000000e+00> : vector<24xf32>
    %160 = vector.multi_reduction <add>, %159, %cst_75 [1] : vector<24x256xf32> to vector<24xf32>
    %161 = vector.shape_cast %160 : vector<24xf32> to vector<24x1xf32>
    %cst_76 = arith.constant 3.906250e-03 : f32
    %162 = vector.broadcast %cst_76 : f32 to vector<24x1xf32>
    %163 = arith.mulf %161, %162 : vector<24x1xf32>
    %164 = arith.mulf %158, %158 : vector<24x1xf32>
    %165 = arith.subf %163, %164 : vector<24x1xf32>
    %cst_77 = arith.constant 0.000000e+00 : f32
    %166 = vector.broadcast %cst_77 : f32 to vector<24x1xf32>
    %167 = arith.maximumf %165, %166 : vector<24x1xf32>
    %c0_78 = arith.constant 0 : index
    %c0_79 = arith.constant 0 : index
    %c0_80 = arith.constant 0 : index
    %168 = vector.load %arg5[%c0_78, %c0_79, %c0_80] : memref<6x24x1xf32, #tpu.memory_space<vmem>>, vector<1x24x1xf32>
    %169 = vector.shape_cast %168 : vector<1x24x1xf32> to vector<24x1xf32>
    %170 = vector.broadcast %158 : vector<24x1xf32> to vector<24x256xf32>
    %171 = arith.subf %154, %170 : vector<24x256xf32>
    %cst_81 = arith.constant 9.99999974E-6 : f32
    %172 = vector.broadcast %cst_81 : f32 to vector<24x1xf32>
    %173 = arith.addf %167, %172 : vector<24x1xf32>
    %174 = math.rsqrt %173 : vector<24x1xf32>
    %175 = vector.broadcast %174 : vector<24x1xf32> to vector<24x256xf32>
    %176 = arith.mulf %171, %175 : vector<24x256xf32>
    %177 = vector.broadcast %169 : vector<24x1xf32> to vector<24x256xf32>
    %178 = arith.mulf %177, %176 : vector<24x256xf32>
    %c0_82 = arith.constant 0 : index
    %c0_83 = arith.constant 0 : index
    %c0_84 = arith.constant 0 : index
    %179 = vector.load %arg6[%c0_82, %c0_83, %c0_84] : memref<6x24x1xf32, #tpu.memory_space<vmem>>, vector<1x24x1xf32>
    %180 = vector.shape_cast %179 : vector<1x24x1xf32> to vector<24x1xf32>
    %181 = vector.broadcast %180 : vector<24x1xf32> to vector<24x256xf32>
    %182 = arith.addf %178, %181 : vector<24x256xf32>
    %c0_85 = arith.constant 0 : index
    %c0_86 = arith.constant 0 : index
    %183 = memref.load %arg7[%c0_85, %c0_86] : memref<6x2xf32, #tpu.memory_space<smem>>
    %184 = vector.broadcast %183 : f32 to vector<24x256xf32>
    %185 = arith.mulf %184, %154 : vector<24x256xf32>
    %c0_87 = arith.constant 0 : index
    %c1_88 = arith.constant 1 : index
    %186 = memref.load %arg7[%c0_87, %c1_88] : memref<6x2xf32, #tpu.memory_space<smem>>
    %187 = vector.broadcast %186 : f32 to vector<24x256xf32>
    %188 = arith.mulf %187, %182 : vector<24x256xf32>
    %189 = arith.addf %185, %188 : vector<24x256xf32>
    %cst_89 = arith.constant 2.000000e-01 : f32
    %190 = vector.broadcast %cst_89 : f32 to vector<24x256xf32>
    %191 = arith.mulf %190, %189 : vector<24x256xf32>
    %192 = arith.maximumf %189, %191 : vector<24x256xf32>
    %c34_i32 = arith.constant 34 : i32
    %193 = tpu.dynamic_rotate %192 by %c34_i32 dim 1 : vector<24x256xf32>, i32 -> vector<24x256xf32>
    %cst_90 = arith.constant 0.000000e+00 : f32
    %194 = vector.shape_cast %36 : vector<1x256xi1> to vector<1x256xi1>
    %195 = vector.broadcast %194 : vector<1x256xi1> to vector<24x256xi1>
    %196 = vector.broadcast %cst_90 : f32 to vector<24x256xf32>
    %197 = arith.select %195, %193, %196 : vector<24x256xi1>, vector<24x256xf32>
    %c0_91 = arith.constant 0 : index
    %c0_92 = arith.constant 0 : index
    %198 = vector.load %arg11[%c0_91, %c0_92] : memref<216x256xf32, #tpu.memory_space<vmem>>, vector<24x256xf32>
    tpu.vector_store %arg11[%c0_91, %c0_92], %197 {strides = array<i32>} : memref<216x256xf32, #tpu.memory_space<vmem>>, vector<24x256xf32>,
    %c32_i32 = arith.constant 32 : i32
    %199 = tpu.dynamic_rotate %192 by %c32_i32 dim 1 : vector<24x256xf32>, i32 -> vector<24x256xf32>
    %cst_93 = arith.constant 0.000000e+00 : f32
    %200 = vector.shape_cast %38 : vector<1x256xi1> to vector<1x256xi1>
    %201 = vector.broadcast %200 : vector<1x256xi1> to vector<24x256xi1>
    %202 = vector.broadcast %cst_93 : f32 to vector<24x256xf32>
    %203 = arith.select %201, %199, %202 : vector<24x256xi1>, vector<24x256xf32>
    %c24 = arith.constant 24 : index
    %c0_94 = arith.constant 0 : index
    %204 = vector.load %arg11[%c24, %c0_94] : memref<216x256xf32, #tpu.memory_space<vmem>>, vector<24x256xf32>
    tpu.vector_store %arg11[%c24, %c0_94], %203 {strides = array<i32>} : memref<216x256xf32, #tpu.memory_space<vmem>>, vector<24x256xf32>,
    %c30_i32 = arith.constant 30 : i32
    %205 = tpu.dynamic_rotate %192 by %c30_i32 dim 1 : vector<24x256xf32>, i32 -> vector<24x256xf32>
    %cst_95 = arith.constant 0.000000e+00 : f32
    %206 = vector.shape_cast %43 : vector<1x256xi1> to vector<1x256xi1>
    %207 = vector.broadcast %206 : vector<1x256xi1> to vector<24x256xi1>
    %208 = vector.broadcast %cst_95 : f32 to vector<24x256xf32>
    %209 = arith.select %207, %205, %208 : vector<24x256xi1>, vector<24x256xf32>
    %c48 = arith.constant 48 : index
    %c0_96 = arith.constant 0 : index
    %210 = vector.load %arg11[%c48, %c0_96] : memref<216x256xf32, #tpu.memory_space<vmem>>, vector<24x256xf32>
    tpu.vector_store %arg11[%c48, %c0_96], %209 {strides = array<i32>} : memref<216x256xf32, #tpu.memory_space<vmem>>, vector<24x256xf32>,
    %c2_i32_97 = arith.constant 2 : i32
    %211 = tpu.dynamic_rotate %192 by %c2_i32_97 dim 1 : vector<24x256xf32>, i32 -> vector<24x256xf32>
    %cst_98 = arith.constant 0.000000e+00 : f32
    %212 = vector.shape_cast %45 : vector<1x256xi1> to vector<1x256xi1>
    %213 = vector.broadcast %212 : vector<1x256xi1> to vector<24x256xi1>
    %214 = vector.broadcast %cst_98 : f32 to vector<24x256xf32>
    %215 = arith.select %213, %211, %214 : vector<24x256xi1>, vector<24x256xf32>
    %c72 = arith.constant 72 : index
    %c0_99 = arith.constant 0 : index
    %216 = vector.load %arg11[%c72, %c0_99] : memref<216x256xf32, #tpu.memory_space<vmem>>, vector<24x256xf32>
    tpu.vector_store %arg11[%c72, %c0_99], %215 {strides = array<i32>} : memref<216x256xf32, #tpu.memory_space<vmem>>, vector<24x256xf32>,
    %c96 = arith.constant 96 : index
    %c0_100 = arith.constant 0 : index
    %217 = vector.load %arg11[%c96, %c0_100] : memref<216x256xf32, #tpu.memory_space<vmem>>, vector<24x256xf32>
    tpu.vector_store %arg11[%c96, %c0_100], %192 {strides = array<i32>} : memref<216x256xf32, #tpu.memory_space<vmem>>, vector<24x256xf32>,
    %c254_i32 = arith.constant 254 : i32
    %218 = tpu.dynamic_rotate %192 by %c254_i32 dim 1 : vector<24x256xf32>, i32 -> vector<24x256xf32>
    %cst_101 = arith.constant 0.000000e+00 : f32
    %219 = vector.shape_cast %47 : vector<1x256xi1> to vector<1x256xi1>
    %220 = vector.broadcast %219 : vector<1x256xi1> to vector<24x256xi1>
    %221 = vector.broadcast %cst_101 : f32 to vector<24x256xf32>
    %222 = arith.select %220, %218, %221 : vector<24x256xi1>, vector<24x256xf32>
    %c120 = arith.constant 120 : index
    %c0_102 = arith.constant 0 : index
    %223 = vector.load %arg11[%c120, %c0_102] : memref<216x256xf32, #tpu.memory_space<vmem>>, vector<24x256xf32>
    tpu.vector_store %arg11[%c120, %c0_102], %222 {strides = array<i32>} : memref<216x256xf32, #tpu.memory_space<vmem>>, vector<24x256xf32>,
    %c226_i32 = arith.constant 226 : i32
    %224 = tpu.dynamic_rotate %192 by %c226_i32 dim 1 : vector<24x256xf32>, i32 -> vector<24x256xf32>
    %cst_103 = arith.constant 0.000000e+00 : f32
    %225 = vector.shape_cast %52 : vector<1x256xi1> to vector<1x256xi1>
    %226 = vector.broadcast %225 : vector<1x256xi1> to vector<24x256xi1>
    %227 = vector.broadcast %cst_103 : f32 to vector<24x256xf32>
    %228 = arith.select %226, %224, %227 : vector<24x256xi1>, vector<24x256xf32>
    %c144 = arith.constant 144 : index
    %c0_104 = arith.constant 0 : index
    %229 = vector.load %arg11[%c144, %c0_104] : memref<216x256xf32, #tpu.memory_space<vmem>>, vector<24x256xf32>
    tpu.vector_store %arg11[%c144, %c0_104], %228 {strides = array<i32>} : memref<216x256xf32, #tpu.memory_space<vmem>>, vector<24x256xf32>,
    %c224_i32 = arith.constant 224 : i32
    %230 = tpu.dynamic_rotate %192 by %c224_i32 dim 1 : vector<24x256xf32>, i32 -> vector<24x256xf32>
    %cst_105 = arith.constant 0.000000e+00 : f32
    %231 = vector.shape_cast %54 : vector<1x256xi1> to vector<1x256xi1>
    %232 = vector.broadcast %231 : vector<1x256xi1> to vector<24x256xi1>
    %233 = vector.broadcast %cst_105 : f32 to vector<24x256xf32>
    %234 = arith.select %232, %230, %233 : vector<24x256xi1>, vector<24x256xf32>
    %c168 = arith.constant 168 : index
    %c0_106 = arith.constant 0 : index
    %235 = vector.load %arg11[%c168, %c0_106] : memref<216x256xf32, #tpu.memory_space<vmem>>, vector<24x256xf32>
    tpu.vector_store %arg11[%c168, %c0_106], %234 {strides = array<i32>} : memref<216x256xf32, #tpu.memory_space<vmem>>, vector<24x256xf32>,
    %c222_i32 = arith.constant 222 : i32
    %236 = tpu.dynamic_rotate %192 by %c222_i32 dim 1 : vector<24x256xf32>, i32 -> vector<24x256xf32>
    %cst_107 = arith.constant 0.000000e+00 : f32
    %237 = vector.shape_cast %59 : vector<1x256xi1> to vector<1x256xi1>
    %238 = vector.broadcast %237 : vector<1x256xi1> to vector<24x256xi1>
    %239 = vector.broadcast %cst_107 : f32 to vector<24x256xf32>
    %240 = arith.select %238, %236, %239 : vector<24x256xi1>, vector<24x256xf32>
    %c192 = arith.constant 192 : index
    %c0_108 = arith.constant 0 : index
    %241 = vector.load %arg11[%c192, %c0_108] : memref<216x256xf32, #tpu.memory_space<vmem>>, vector<24x256xf32>
    tpu.vector_store %arg11[%c192, %c0_108], %240 {strides = array<i32>} : memref<216x256xf32, #tpu.memory_space<vmem>>, vector<24x256xf32>,
    %c0_109 = arith.constant 0 : index
    %c0_110 = arith.constant 0 : index
    %242 = vector.load %arg11[%c0_109, %c0_110] : memref<216x256xf32, #tpu.memory_space<vmem>>, vector<216x256xf32>
    %243 = arith.truncf %242 : vector<216x256xf32> to vector<216x256xbf16>
    %c0_111 = arith.constant 0 : index
    %c0_112 = arith.constant 0 : index
    %c0_113 = arith.constant 0 : index
    %244 = vector.load %arg4[%c0_111, %c0_112, %c0_113] : memref<5x24x216xbf16, #tpu.memory_space<vmem>>, vector<1x24x216xbf16>
    %245 = vector.shape_cast %244 : vector<1x24x216xbf16> to vector<24x216xbf16>
    %cst_114 = arith.constant dense<0.000000e+00> : vector<24x256xf32>
    %246 = tpu.matmul %245, %243, %cst_114 {dimension_numbers = #tpu.dot_dimension_numbers<[1], [0], [0], [1], [0, 0, 1, 1], [], []>} : vector<24x216xbf16>, vector<216x256xbf16>, vector<24x256xf32> -> vector<24x256xf32>
    %cst_115 = arith.constant dense<0.000000e+00> : vector<24xf32>
    %247 = vector.multi_reduction <add>, %246, %cst_115 [1] : vector<24x256xf32> to vector<24xf32>
    %248 = vector.shape_cast %247 : vector<24xf32> to vector<24x1xf32>
    %cst_116 = arith.constant 3.906250e-03 : f32
    %249 = vector.broadcast %cst_116 : f32 to vector<24x1xf32>
    %250 = arith.mulf %248, %249 : vector<24x1xf32>
    %251 = arith.mulf %246, %246 : vector<24x256xf32>
    %cst_117 = arith.constant dense<0.000000e+00> : vector<24xf32>
    %252 = vector.multi_reduction <add>, %251, %cst_117 [1] : vector<24x256xf32> to vector<24xf32>
    %253 = vector.shape_cast %252 : vector<24xf32> to vector<24x1xf32>
    %cst_118 = arith.constant 3.906250e-03 : f32
    %254 = vector.broadcast %cst_118 : f32 to vector<24x1xf32>
    %255 = arith.mulf %253, %254 : vector<24x1xf32>
    %256 = arith.mulf %250, %250 : vector<24x1xf32>
    %257 = arith.subf %255, %256 : vector<24x1xf32>
    %cst_119 = arith.constant 0.000000e+00 : f32
    %258 = vector.broadcast %cst_119 : f32 to vector<24x1xf32>
    %259 = arith.maximumf %257, %258 : vector<24x1xf32>
    %c1_120 = arith.constant 1 : index
    %c0_121 = arith.constant 0 : index
    %c0_122 = arith.constant 0 : index
    %260 = vector.load %arg5[%c1_120, %c0_121, %c0_122] : memref<6x24x1xf32, #tpu.memory_space<vmem>>, vector<1x24x1xf32>
    %261 = vector.shape_cast %260 : vector<1x24x1xf32> to vector<24x1xf32>
    %262 = vector.broadcast %250 : vector<24x1xf32> to vector<24x256xf32>
    %263 = arith.subf %246, %262 : vector<24x256xf32>
    %cst_123 = arith.constant 9.99999974E-6 : f32
    %264 = vector.broadcast %cst_123 : f32 to vector<24x1xf32>
    %265 = arith.addf %259, %264 : vector<24x1xf32>
    %266 = math.rsqrt %265 : vector<24x1xf32>
    %267 = vector.broadcast %266 : vector<24x1xf32> to vector<24x256xf32>
    %268 = arith.mulf %263, %267 : vector<24x256xf32>
    %269 = vector.broadcast %261 : vector<24x1xf32> to vector<24x256xf32>
    %270 = arith.mulf %269, %268 : vector<24x256xf32>
    %c1_124 = arith.constant 1 : index
    %c0_125 = arith.constant 0 : index
    %c0_126 = arith.constant 0 : index
    %271 = vector.load %arg6[%c1_124, %c0_125, %c0_126] : memref<6x24x1xf32, #tpu.memory_space<vmem>>, vector<1x24x1xf32>
    %272 = vector.shape_cast %271 : vector<1x24x1xf32> to vector<24x1xf32>
    %273 = vector.broadcast %272 : vector<24x1xf32> to vector<24x256xf32>
    %274 = arith.addf %270, %273 : vector<24x256xf32>
    %c1_127 = arith.constant 1 : index
    %c0_128 = arith.constant 0 : index
    %275 = memref.load %arg7[%c1_127, %c0_128] : memref<6x2xf32, #tpu.memory_space<smem>>
    %276 = vector.broadcast %275 : f32 to vector<24x256xf32>
    %277 = arith.mulf %276, %246 : vector<24x256xf32>
    %c1_129 = arith.constant 1 : index
    %c1_130 = arith.constant 1 : index
    %278 = memref.load %arg7[%c1_129, %c1_130] : memref<6x2xf32, #tpu.memory_space<smem>>
    %279 = vector.broadcast %278 : f32 to vector<24x256xf32>
    %280 = arith.mulf %279, %274 : vector<24x256xf32>
    %281 = arith.addf %277, %280 : vector<24x256xf32>
    %cst_131 = arith.constant 2.000000e-01 : f32
    %282 = vector.broadcast %cst_131 : f32 to vector<24x256xf32>
    %283 = arith.mulf %282, %281 : vector<24x256xf32>
    %284 = arith.maximumf %281, %283 : vector<24x256xf32>
    %c68_i32 = arith.constant 68 : i32
    %285 = tpu.dynamic_rotate %284 by %c68_i32 dim 1 : vector<24x256xf32>, i32 -> vector<24x256xf32>
    %cst_132 = arith.constant 0.000000e+00 : f32
    %286 = vector.shape_cast %64 : vector<1x256xi1> to vector<1x256xi1>
    %287 = vector.broadcast %286 : vector<1x256xi1> to vector<24x256xi1>
    %288 = vector.broadcast %cst_132 : f32 to vector<24x256xf32>
    %289 = arith.select %287, %285, %288 : vector<24x256xi1>, vector<24x256xf32>
    %c0_133 = arith.constant 0 : index
    %c0_134 = arith.constant 0 : index
    %290 = vector.load %arg11[%c0_133, %c0_134] : memref<216x256xf32, #tpu.memory_space<vmem>>, vector<24x256xf32>
    tpu.vector_store %arg11[%c0_133, %c0_134], %289 {strides = array<i32>} : memref<216x256xf32, #tpu.memory_space<vmem>>, vector<24x256xf32>,
    %c64_i32 = arith.constant 64 : i32
    %291 = tpu.dynamic_rotate %284 by %c64_i32 dim 1 : vector<24x256xf32>, i32 -> vector<24x256xf32>
    %cst_135 = arith.constant 0.000000e+00 : f32
    %292 = vector.shape_cast %66 : vector<1x256xi1> to vector<1x256xi1>
    %293 = vector.broadcast %292 : vector<1x256xi1> to vector<24x256xi1>
    %294 = vector.broadcast %cst_135 : f32 to vector<24x256xf32>
    %295 = arith.select %293, %291, %294 : vector<24x256xi1>, vector<24x256xf32>
    %c24_136 = arith.constant 24 : index
    %c0_137 = arith.constant 0 : index
    %296 = vector.load %arg11[%c24_136, %c0_137] : memref<216x256xf32, #tpu.memory_space<vmem>>, vector<24x256xf32>
    tpu.vector_store %arg11[%c24_136, %c0_137], %295 {strides = array<i32>} : memref<216x256xf32, #tpu.memory_space<vmem>>, vector<24x256xf32>,
    %c60_i32 = arith.constant 60 : i32
    %297 = tpu.dynamic_rotate %284 by %c60_i32 dim 1 : vector<24x256xf32>, i32 -> vector<24x256xf32>
    %cst_138 = arith.constant 0.000000e+00 : f32
    %298 = vector.shape_cast %71 : vector<1x256xi1> to vector<1x256xi1>
    %299 = vector.broadcast %298 : vector<1x256xi1> to vector<24x256xi1>
    %300 = vector.broadcast %cst_138 : f32 to vector<24x256xf32>
    %301 = arith.select %299, %297, %300 : vector<24x256xi1>, vector<24x256xf32>
    %c48_139 = arith.constant 48 : index
    %c0_140 = arith.constant 0 : index
    %302 = vector.load %arg11[%c48_139, %c0_140] : memref<216x256xf32, #tpu.memory_space<vmem>>, vector<24x256xf32>
    tpu.vector_store %arg11[%c48_139, %c0_140], %301 {strides = array<i32>} : memref<216x256xf32, #tpu.memory_space<vmem>>, vector<24x256xf32>,
    %c4_i32_141 = arith.constant 4 : i32
    %303 = tpu.dynamic_rotate %284 by %c4_i32_141 dim 1 : vector<24x256xf32>, i32 -> vector<24x256xf32>
    %cst_142 = arith.constant 0.000000e+00 : f32
    %304 = vector.shape_cast %73 : vector<1x256xi1> to vector<1x256xi1>
    %305 = vector.broadcast %304 : vector<1x256xi1> to vector<24x256xi1>
    %306 = vector.broadcast %cst_142 : f32 to vector<24x256xf32>
    %307 = arith.select %305, %303, %306 : vector<24x256xi1>, vector<24x256xf32>
    %c72_143 = arith.constant 72 : index
    %c0_144 = arith.constant 0 : index
    %308 = vector.load %arg11[%c72_143, %c0_144] : memref<216x256xf32, #tpu.memory_space<vmem>>, vector<24x256xf32>
    tpu.vector_store %arg11[%c72_143, %c0_144], %307 {strides = array<i32>} : memref<216x256xf32, #tpu.memory_space<vmem>>, vector<24x256xf32>,
    %c96_145 = arith.constant 96 : index
    %c0_146 = arith.constant 0 : index
    %309 = vector.load %arg11[%c96_145, %c0_146] : memref<216x256xf32, #tpu.memory_space<vmem>>, vector<24x256xf32>
    tpu.vector_store %arg11[%c96_145, %c0_146], %284 {strides = array<i32>} : memref<216x256xf32, #tpu.memory_space<vmem>>, vector<24x256xf32>,
    %c252_i32 = arith.constant 252 : i32
    %310 = tpu.dynamic_rotate %284 by %c252_i32 dim 1 : vector<24x256xf32>, i32 -> vector<24x256xf32>
    %cst_147 = arith.constant 0.000000e+00 : f32
    %311 = vector.shape_cast %75 : vector<1x256xi1> to vector<1x256xi1>
    %312 = vector.broadcast %311 : vector<1x256xi1> to vector<24x256xi1>
    %313 = vector.broadcast %cst_147 : f32 to vector<24x256xf32>
    %314 = arith.select %312, %310, %313 : vector<24x256xi1>, vector<24x256xf32>
    %c120_148 = arith.constant 120 : index
    %c0_149 = arith.constant 0 : index
    %315 = vector.load %arg11[%c120_148, %c0_149] : memref<216x256xf32, #tpu.memory_space<vmem>>, vector<24x256xf32>
    tpu.vector_store %arg11[%c120_148, %c0_149], %314 {strides = array<i32>} : memref<216x256xf32, #tpu.memory_space<vmem>>, vector<24x256xf32>,
    %c196_i32 = arith.constant 196 : i32
    %316 = tpu.dynamic_rotate %284 by %c196_i32 dim 1 : vector<24x256xf32>, i32 -> vector<24x256xf32>
    %cst_150 = arith.constant 0.000000e+00 : f32
    %317 = vector.shape_cast %80 : vector<1x256xi1> to vector<1x256xi1>
    %318 = vector.broadcast %317 : vector<1x256xi1> to vector<24x256xi1>
    %319 = vector.broadcast %cst_150 : f32 to vector<24x256xf32>
    %320 = arith.select %318, %316, %319 : vector<24x256xi1>, vector<24x256xf32>
    %c144_151 = arith.constant 144 : index
    %c0_152 = arith.constant 0 : index
    %321 = vector.load %arg11[%c144_151, %c0_152] : memref<216x256xf32, #tpu.memory_space<vmem>>, vector<24x256xf32>
    tpu.vector_store %arg11[%c144_151, %c0_152], %320 {strides = array<i32>} : memref<216x256xf32, #tpu.memory_space<vmem>>, vector<24x256xf32>,
    %c192_i32 = arith.constant 192 : i32
    %322 = tpu.dynamic_rotate %284 by %c192_i32 dim 1 : vector<24x256xf32>, i32 -> vector<24x256xf32>
    %cst_153 = arith.constant 0.000000e+00 : f32
    %323 = vector.shape_cast %82 : vector<1x256xi1> to vector<1x256xi1>
    %324 = vector.broadcast %323 : vector<1x256xi1> to vector<24x256xi1>
    %325 = vector.broadcast %cst_153 : f32 to vector<24x256xf32>
    %326 = arith.select %324, %322, %325 : vector<24x256xi1>, vector<24x256xf32>
    %c168_154 = arith.constant 168 : index
    %c0_155 = arith.constant 0 : index
    %327 = vector.load %arg11[%c168_154, %c0_155] : memref<216x256xf32, #tpu.memory_space<vmem>>, vector<24x256xf32>
    tpu.vector_store %arg11[%c168_154, %c0_155], %326 {strides = array<i32>} : memref<216x256xf32, #tpu.memory_space<vmem>>, vector<24x256xf32>,
    %c188_i32 = arith.constant 188 : i32
    %328 = tpu.dynamic_rotate %284 by %c188_i32 dim 1 : vector<24x256xf32>, i32 -> vector<24x256xf32>
    %cst_156 = arith.constant 0.000000e+00 : f32
    %329 = vector.shape_cast %87 : vector<1x256xi1> to vector<1x256xi1>
    %330 = vector.broadcast %329 : vector<1x256xi1> to vector<24x256xi1>
    %331 = vector.broadcast %cst_156 : f32 to vector<24x256xf32>
    %332 = arith.select %330, %328, %331 : vector<24x256xi1>, vector<24x256xf32>
    %c192_157 = arith.constant 192 : index
    %c0_158 = arith.constant 0 : index
    %333 = vector.load %arg11[%c192_157, %c0_158] : memref<216x256xf32, #tpu.memory_space<vmem>>, vector<24x256xf32>
    tpu.vector_store %arg11[%c192_157, %c0_158], %332 {strides = array<i32>} : memref<216x256xf32, #tpu.memory_space<vmem>>, vector<24x256xf32>,
    %c0_159 = arith.constant 0 : index
    %c0_160 = arith.constant 0 : index
    %334 = vector.load %arg11[%c0_159, %c0_160] : memref<216x256xf32, #tpu.memory_space<vmem>>, vector<216x256xf32>
    %335 = arith.truncf %334 : vector<216x256xf32> to vector<216x256xbf16>
    %c1_161 = arith.constant 1 : index
    %c0_162 = arith.constant 0 : index
    %c0_163 = arith.constant 0 : index
    %336 = vector.load %arg4[%c1_161, %c0_162, %c0_163] : memref<5x24x216xbf16, #tpu.memory_space<vmem>>, vector<1x24x216xbf16>
    %337 = vector.shape_cast %336 : vector<1x24x216xbf16> to vector<24x216xbf16>
    %cst_164 = arith.constant dense<0.000000e+00> : vector<24x256xf32>
    %338 = tpu.matmul %337, %335, %cst_164 {dimension_numbers = #tpu.dot_dimension_numbers<[1], [0], [0], [1], [0, 0, 1, 1], [], []>} : vector<24x216xbf16>, vector<216x256xbf16>, vector<24x256xf32> -> vector<24x256xf32>
    %cst_165 = arith.constant dense<0.000000e+00> : vector<24xf32>
    %339 = vector.multi_reduction <add>, %338, %cst_165 [1] : vector<24x256xf32> to vector<24xf32>
    %340 = vector.shape_cast %339 : vector<24xf32> to vector<24x1xf32>
    %cst_166 = arith.constant 3.906250e-03 : f32
    %341 = vector.broadcast %cst_166 : f32 to vector<24x1xf32>
    %342 = arith.mulf %340, %341 : vector<24x1xf32>
    %343 = arith.mulf %338, %338 : vector<24x256xf32>
    %cst_167 = arith.constant dense<0.000000e+00> : vector<24xf32>
    %344 = vector.multi_reduction <add>, %343, %cst_167 [1] : vector<24x256xf32> to vector<24xf32>
    %345 = vector.shape_cast %344 : vector<24xf32> to vector<24x1xf32>
    %cst_168 = arith.constant 3.906250e-03 : f32
    %346 = vector.broadcast %cst_168 : f32 to vector<24x1xf32>
    %347 = arith.mulf %345, %346 : vector<24x1xf32>
    %348 = arith.mulf %342, %342 : vector<24x1xf32>
    %349 = arith.subf %347, %348 : vector<24x1xf32>
    %cst_169 = arith.constant 0.000000e+00 : f32
    %350 = vector.broadcast %cst_169 : f32 to vector<24x1xf32>
    %351 = arith.maximumf %349, %350 : vector<24x1xf32>
    %c2_170 = arith.constant 2 : index
    %c0_171 = arith.constant 0 : index
    %c0_172 = arith.constant 0 : index
    %352 = vector.load %arg5[%c2_170, %c0_171, %c0_172] : memref<6x24x1xf32, #tpu.memory_space<vmem>>, vector<1x24x1xf32>
    %353 = vector.shape_cast %352 : vector<1x24x1xf32> to vector<24x1xf32>
    %354 = vector.broadcast %342 : vector<24x1xf32> to vector<24x256xf32>
    %355 = arith.subf %338, %354 : vector<24x256xf32>
    %cst_173 = arith.constant 9.99999974E-6 : f32
    %356 = vector.broadcast %cst_173 : f32 to vector<24x1xf32>
    %357 = arith.addf %351, %356 : vector<24x1xf32>
    %358 = math.rsqrt %357 : vector<24x1xf32>
    %359 = vector.broadcast %358 : vector<24x1xf32> to vector<24x256xf32>
    %360 = arith.mulf %355, %359 : vector<24x256xf32>
    %361 = vector.broadcast %353 : vector<24x1xf32> to vector<24x256xf32>
    %362 = arith.mulf %361, %360 : vector<24x256xf32>
    %c2_174 = arith.constant 2 : index
    %c0_175 = arith.constant 0 : index
    %c0_176 = arith.constant 0 : index
    %363 = vector.load %arg6[%c2_174, %c0_175, %c0_176] : memref<6x24x1xf32, #tpu.memory_space<vmem>>, vector<1x24x1xf32>
    %364 = vector.shape_cast %363 : vector<1x24x1xf32> to vector<24x1xf32>
    %365 = vector.broadcast %364 : vector<24x1xf32> to vector<24x256xf32>
    %366 = arith.addf %362, %365 : vector<24x256xf32>
    %c2_177 = arith.constant 2 : index
    %c0_178 = arith.constant 0 : index
    %367 = memref.load %arg7[%c2_177, %c0_178] : memref<6x2xf32, #tpu.memory_space<smem>>
    %368 = vector.broadcast %367 : f32 to vector<24x256xf32>
    %369 = arith.mulf %368, %338 : vector<24x256xf32>
    %c2_179 = arith.constant 2 : index
    %c1_180 = arith.constant 1 : index
    %370 = memref.load %arg7[%c2_179, %c1_180] : memref<6x2xf32, #tpu.memory_space<smem>>
    %371 = vector.broadcast %370 : f32 to vector<24x256xf32>
    %372 = arith.mulf %371, %366 : vector<24x256xf32>
    %373 = arith.addf %369, %372 : vector<24x256xf32>
    %cst_181 = arith.constant 2.000000e-01 : f32
    %374 = vector.broadcast %cst_181 : f32 to vector<24x256xf32>
    %375 = arith.mulf %374, %373 : vector<24x256xf32>
    %376 = arith.maximumf %373, %375 : vector<24x256xf32>
    %c136_i32 = arith.constant 136 : i32
    %377 = tpu.dynamic_rotate %376 by %c136_i32 dim 1 : vector<24x256xf32>, i32 -> vector<24x256xf32>
    %cst_182 = arith.constant 0.000000e+00 : f32
    %378 = vector.shape_cast %92 : vector<1x256xi1> to vector<1x256xi1>
    %379 = vector.broadcast %378 : vector<1x256xi1> to vector<24x256xi1>
    %380 = vector.broadcast %cst_182 : f32 to vector<24x256xf32>
    %381 = arith.select %379, %377, %380 : vector<24x256xi1>, vector<24x256xf32>
    %c0_183 = arith.constant 0 : index
    %c0_184 = arith.constant 0 : index
    %382 = vector.load %arg11[%c0_183, %c0_184] : memref<216x256xf32, #tpu.memory_space<vmem>>, vector<24x256xf32>
    tpu.vector_store %arg11[%c0_183, %c0_184], %381 {strides = array<i32>} : memref<216x256xf32, #tpu.memory_space<vmem>>, vector<24x256xf32>,
    %c128_i32 = arith.constant 128 : i32
    %383 = tpu.dynamic_rotate %376 by %c128_i32 dim 1 : vector<24x256xf32>, i32 -> vector<24x256xf32>
    %cst_185 = arith.constant 0.000000e+00 : f32
    %384 = vector.shape_cast %94 : vector<1x256xi1> to vector<1x256xi1>
    %385 = vector.broadcast %384 : vector<1x256xi1> to vector<24x256xi1>
    %386 = vector.broadcast %cst_185 : f32 to vector<24x256xf32>
    %387 = arith.select %385, %383, %386 : vector<24x256xi1>, vector<24x256xf32>
    %c24_186 = arith.constant 24 : index
    %c0_187 = arith.constant 0 : index
    %388 = vector.load %arg11[%c24_186, %c0_187] : memref<216x256xf32, #tpu.memory_space<vmem>>, vector<24x256xf32>
    tpu.vector_store %arg11[%c24_186, %c0_187], %387 {strides = array<i32>} : memref<216x256xf32, #tpu.memory_space<vmem>>, vector<24x256xf32>,
    %c120_i32 = arith.constant 120 : i32
    %389 = tpu.dynamic_rotate %376 by %c120_i32 dim 1 : vector<24x256xf32>, i32 -> vector<24x256xf32>
    %cst_188 = arith.constant 0.000000e+00 : f32
    %390 = vector.shape_cast %99 : vector<1x256xi1> to vector<1x256xi1>
    %391 = vector.broadcast %390 : vector<1x256xi1> to vector<24x256xi1>
    %392 = vector.broadcast %cst_188 : f32 to vector<24x256xf32>
    %393 = arith.select %391, %389, %392 : vector<24x256xi1>, vector<24x256xf32>
    %c48_189 = arith.constant 48 : index
    %c0_190 = arith.constant 0 : index
    %394 = vector.load %arg11[%c48_189, %c0_190] : memref<216x256xf32, #tpu.memory_space<vmem>>, vector<24x256xf32>
    tpu.vector_store %arg11[%c48_189, %c0_190], %393 {strides = array<i32>} : memref<216x256xf32, #tpu.memory_space<vmem>>, vector<24x256xf32>,
    %c8_i32_191 = arith.constant 8 : i32
    %395 = tpu.dynamic_rotate %376 by %c8_i32_191 dim 1 : vector<24x256xf32>, i32 -> vector<24x256xf32>
    %cst_192 = arith.constant 0.000000e+00 : f32
    %396 = vector.shape_cast %101 : vector<1x256xi1> to vector<1x256xi1>
    %397 = vector.broadcast %396 : vector<1x256xi1> to vector<24x256xi1>
    %398 = vector.broadcast %cst_192 : f32 to vector<24x256xf32>
    %399 = arith.select %397, %395, %398 : vector<24x256xi1>, vector<24x256xf32>
    %c72_193 = arith.constant 72 : index
    %c0_194 = arith.constant 0 : index
    %400 = vector.load %arg11[%c72_193, %c0_194] : memref<216x256xf32, #tpu.memory_space<vmem>>, vector<24x256xf32>
    tpu.vector_store %arg11[%c72_193, %c0_194], %399 {strides = array<i32>} : memref<216x256xf32, #tpu.memory_space<vmem>>, vector<24x256xf32>,
    %c96_195 = arith.constant 96 : index
    %c0_196 = arith.constant 0 : index
    %401 = vector.load %arg11[%c96_195, %c0_196] : memref<216x256xf32, #tpu.memory_space<vmem>>, vector<24x256xf32>
    tpu.vector_store %arg11[%c96_195, %c0_196], %376 {strides = array<i32>} : memref<216x256xf32, #tpu.memory_space<vmem>>, vector<24x256xf32>,
    %c248_i32 = arith.constant 248 : i32
    %402 = tpu.dynamic_rotate %376 by %c248_i32 dim 1 : vector<24x256xf32>, i32 -> vector<24x256xf32>
    %cst_197 = arith.constant 0.000000e+00 : f32
    %403 = vector.shape_cast %103 : vector<1x256xi1> to vector<1x256xi1>
    %404 = vector.broadcast %403 : vector<1x256xi1> to vector<24x256xi1>
    %405 = vector.broadcast %cst_197 : f32 to vector<24x256xf32>
    %406 = arith.select %404, %402, %405 : vector<24x256xi1>, vector<24x256xf32>
    %c120_198 = arith.constant 120 : index
    %c0_199 = arith.constant 0 : index
    %407 = vector.load %arg11[%c120_198, %c0_199] : memref<216x256xf32, #tpu.memory_space<vmem>>, vector<24x256xf32>
    tpu.vector_store %arg11[%c120_198, %c0_199], %406 {strides = array<i32>} : memref<216x256xf32, #tpu.memory_space<vmem>>, vector<24x256xf32>,
    %c136_i32_200 = arith.constant 136 : i32
    %408 = tpu.dynamic_rotate %376 by %c136_i32_200 dim 1 : vector<24x256xf32>, i32 -> vector<24x256xf32>
    %cst_201 = arith.constant 0.000000e+00 : f32
    %409 = vector.shape_cast %108 : vector<1x256xi1> to vector<1x256xi1>
    %410 = vector.broadcast %409 : vector<1x256xi1> to vector<24x256xi1>
    %411 = vector.broadcast %cst_201 : f32 to vector<24x256xf32>
    %412 = arith.select %410, %408, %411 : vector<24x256xi1>, vector<24x256xf32>
    %c144_202 = arith.constant 144 : index
    %c0_203 = arith.constant 0 : index
    %413 = vector.load %arg11[%c144_202, %c0_203] : memref<216x256xf32, #tpu.memory_space<vmem>>, vector<24x256xf32>
    tpu.vector_store %arg11[%c144_202, %c0_203], %412 {strides = array<i32>} : memref<216x256xf32, #tpu.memory_space<vmem>>, vector<24x256xf32>,
    %c128_i32_204 = arith.constant 128 : i32
    %414 = tpu.dynamic_rotate %376 by %c128_i32_204 dim 1 : vector<24x256xf32>, i32 -> vector<24x256xf32>
    %cst_205 = arith.constant 0.000000e+00 : f32
    %415 = vector.shape_cast %110 : vector<1x256xi1> to vector<1x256xi1>
    %416 = vector.broadcast %415 : vector<1x256xi1> to vector<24x256xi1>
    %417 = vector.broadcast %cst_205 : f32 to vector<24x256xf32>
    %418 = arith.select %416, %414, %417 : vector<24x256xi1>, vector<24x256xf32>
    %c168_206 = arith.constant 168 : index
    %c0_207 = arith.constant 0 : index
    %419 = vector.load %arg11[%c168_206, %c0_207] : memref<216x256xf32, #tpu.memory_space<vmem>>, vector<24x256xf32>
    tpu.vector_store %arg11[%c168_206, %c0_207], %418 {strides = array<i32>} : memref<216x256xf32, #tpu.memory_space<vmem>>, vector<24x256xf32>,
    %c120_i32_208 = arith.constant 120 : i32
    %420 = tpu.dynamic_rotate %376 by %c120_i32_208 dim 1 : vector<24x256xf32>, i32 -> vector<24x256xf32>
    %cst_209 = arith.constant 0.000000e+00 : f32
    %421 = vector.shape_cast %115 : vector<1x256xi1> to vector<1x256xi1>
    %422 = vector.broadcast %421 : vector<1x256xi1> to vector<24x256xi1>
    %423 = vector.broadcast %cst_209 : f32 to vector<24x256xf32>
    %424 = arith.select %422, %420, %423 : vector<24x256xi1>, vector<24x256xf32>
    %c192_210 = arith.constant 192 : index
    %c0_211 = arith.constant 0 : index
    %425 = vector.load %arg11[%c192_210, %c0_211] : memref<216x256xf32, #tpu.memory_space<vmem>>, vector<24x256xf32>
    tpu.vector_store %arg11[%c192_210, %c0_211], %424 {strides = array<i32>} : memref<216x256xf32, #tpu.memory_space<vmem>>, vector<24x256xf32>,
    %c0_212 = arith.constant 0 : index
    %c0_213 = arith.constant 0 : index
    %426 = vector.load %arg11[%c0_212, %c0_213] : memref<216x256xf32, #tpu.memory_space<vmem>>, vector<216x256xf32>
    %427 = arith.truncf %426 : vector<216x256xf32> to vector<216x256xbf16>
    %c2_214 = arith.constant 2 : index
    %c0_215 = arith.constant 0 : index
    %c0_216 = arith.constant 0 : index
    %428 = vector.load %arg4[%c2_214, %c0_215, %c0_216] : memref<5x24x216xbf16, #tpu.memory_space<vmem>>, vector<1x24x216xbf16>
    %429 = vector.shape_cast %428 : vector<1x24x216xbf16> to vector<24x216xbf16>
    %cst_217 = arith.constant dense<0.000000e+00> : vector<24x256xf32>
    %430 = tpu.matmul %429, %427, %cst_217 {dimension_numbers = #tpu.dot_dimension_numbers<[1], [0], [0], [1], [0, 0, 1, 1], [], []>} : vector<24x216xbf16>, vector<216x256xbf16>, vector<24x256xf32> -> vector<24x256xf32>
    %cst_218 = arith.constant dense<0.000000e+00> : vector<24xf32>
    %431 = vector.multi_reduction <add>, %430, %cst_218 [1] : vector<24x256xf32> to vector<24xf32>
    %432 = vector.shape_cast %431 : vector<24xf32> to vector<24x1xf32>
    %cst_219 = arith.constant 3.906250e-03 : f32
    %433 = vector.broadcast %cst_219 : f32 to vector<24x1xf32>
    %434 = arith.mulf %432, %433 : vector<24x1xf32>
    %435 = arith.mulf %430, %430 : vector<24x256xf32>
    %cst_220 = arith.constant dense<0.000000e+00> : vector<24xf32>
    %436 = vector.multi_reduction <add>, %435, %cst_220 [1] : vector<24x256xf32> to vector<24xf32>
    %437 = vector.shape_cast %436 : vector<24xf32> to vector<24x1xf32>
    %cst_221 = arith.constant 3.906250e-03 : f32
    %438 = vector.broadcast %cst_221 : f32 to vector<24x1xf32>
    %439 = arith.mulf %437, %438 : vector<24x1xf32>
    %440 = arith.mulf %434, %434 : vector<24x1xf32>
    %441 = arith.subf %439, %440 : vector<24x1xf32>
    %cst_222 = arith.constant 0.000000e+00 : f32
    %442 = vector.broadcast %cst_222 : f32 to vector<24x1xf32>
    %443 = arith.maximumf %441, %442 : vector<24x1xf32>
    %c3_223 = arith.constant 3 : index
    %c0_224 = arith.constant 0 : index
    %c0_225 = arith.constant 0 : index
    %444 = vector.load %arg5[%c3_223, %c0_224, %c0_225] : memref<6x24x1xf32, #tpu.memory_space<vmem>>, vector<1x24x1xf32>
    %445 = vector.shape_cast %444 : vector<1x24x1xf32> to vector<24x1xf32>
    %446 = vector.broadcast %434 : vector<24x1xf32> to vector<24x256xf32>
    %447 = arith.subf %430, %446 : vector<24x256xf32>
    %cst_226 = arith.constant 9.99999974E-6 : f32
    %448 = vector.broadcast %cst_226 : f32 to vector<24x1xf32>
    %449 = arith.addf %443, %448 : vector<24x1xf32>
    %450 = math.rsqrt %449 : vector<24x1xf32>
    %451 = vector.broadcast %450 : vector<24x1xf32> to vector<24x256xf32>
    %452 = arith.mulf %447, %451 : vector<24x256xf32>
    %453 = vector.broadcast %445 : vector<24x1xf32> to vector<24x256xf32>
    %454 = arith.mulf %453, %452 : vector<24x256xf32>
    %c3_227 = arith.constant 3 : index
    %c0_228 = arith.constant 0 : index
    %c0_229 = arith.constant 0 : index
    %455 = vector.load %arg6[%c3_227, %c0_228, %c0_229] : memref<6x24x1xf32, #tpu.memory_space<vmem>>, vector<1x24x1xf32>
    %456 = vector.shape_cast %455 : vector<1x24x1xf32> to vector<24x1xf32>
    %457 = vector.broadcast %456 : vector<24x1xf32> to vector<24x256xf32>
    %458 = arith.addf %454, %457 : vector<24x256xf32>
    %c3_230 = arith.constant 3 : index
    %c0_231 = arith.constant 0 : index
    %459 = memref.load %arg7[%c3_230, %c0_231] : memref<6x2xf32, #tpu.memory_space<smem>>
    %460 = vector.broadcast %459 : f32 to vector<24x256xf32>
    %461 = arith.mulf %460, %430 : vector<24x256xf32>
    %c3_232 = arith.constant 3 : index
    %c1_233 = arith.constant 1 : index
    %462 = memref.load %arg7[%c3_232, %c1_233] : memref<6x2xf32, #tpu.memory_space<smem>>
    %463 = vector.broadcast %462 : f32 to vector<24x256xf32>
    %464 = arith.mulf %463, %458 : vector<24x256xf32>
    %465 = arith.addf %461, %464 : vector<24x256xf32>
    %cst_234 = arith.constant 2.000000e-01 : f32
    %466 = vector.broadcast %cst_234 : f32 to vector<24x256xf32>
    %467 = arith.mulf %466, %465 : vector<24x256xf32>
    %468 = arith.maximumf %465, %467 : vector<24x256xf32>
    %cst_235 = arith.constant 0.000000e+00 : f32
    %469 = vector.broadcast %cst_235 : f32 to vector<24x256xf32>
    %c0_236 = arith.constant 0 : index
    %c0_237 = arith.constant 0 : index
    %470 = vector.load %arg11[%c0_236, %c0_237] : memref<216x256xf32, #tpu.memory_space<vmem>>, vector<24x256xf32>
    tpu.vector_store %arg11[%c0_236, %c0_237], %469 {strides = array<i32>} : memref<216x256xf32, #tpu.memory_space<vmem>>, vector<24x256xf32>,
    %cst_238 = arith.constant 0.000000e+00 : f32
    %471 = vector.broadcast %cst_238 : f32 to vector<24x256xf32>
    %c24_239 = arith.constant 24 : index
    %c0_240 = arith.constant 0 : index
    %472 = vector.load %arg11[%c24_239, %c0_240] : memref<216x256xf32, #tpu.memory_space<vmem>>, vector<24x256xf32>
    tpu.vector_store %arg11[%c24_239, %c0_240], %471 {strides = array<i32>} : memref<216x256xf32, #tpu.memory_space<vmem>>, vector<24x256xf32>,
    %cst_241 = arith.constant 0.000000e+00 : f32
    %473 = vector.broadcast %cst_241 : f32 to vector<24x256xf32>
    %c48_242 = arith.constant 48 : index
    %c0_243 = arith.constant 0 : index
    %474 = vector.load %arg11[%c48_242, %c0_243] : memref<216x256xf32, #tpu.memory_space<vmem>>, vector<24x256xf32>
    tpu.vector_store %arg11[%c48_242, %c0_243], %473 {strides = array<i32>} : memref<216x256xf32, #tpu.memory_space<vmem>>, vector<24x256xf32>,
    %cst_244 = arith.constant 0.000000e+00 : f32
    %475 = vector.broadcast %cst_244 : f32 to vector<24x256xf32>
    %c72_245 = arith.constant 72 : index
    %c0_246 = arith.constant 0 : index
    %476 = vector.load %arg11[%c72_245, %c0_246] : memref<216x256xf32, #tpu.memory_space<vmem>>, vector<24x256xf32>
    tpu.vector_store %arg11[%c72_245, %c0_246], %475 {strides = array<i32>} : memref<216x256xf32, #tpu.memory_space<vmem>>, vector<24x256xf32>,
    %c96_247 = arith.constant 96 : index
    %c0_248 = arith.constant 0 : index
    %477 = vector.load %arg11[%c96_247, %c0_248] : memref<216x256xf32, #tpu.memory_space<vmem>>, vector<24x256xf32>
    tpu.vector_store %arg11[%c96_247, %c0_248], %468 {strides = array<i32>} : memref<216x256xf32, #tpu.memory_space<vmem>>, vector<24x256xf32>,
    %cst_249 = arith.constant 0.000000e+00 : f32
    %478 = vector.broadcast %cst_249 : f32 to vector<24x256xf32>
    %c120_250 = arith.constant 120 : index
    %c0_251 = arith.constant 0 : index
    %479 = vector.load %arg11[%c120_250, %c0_251] : memref<216x256xf32, #tpu.memory_space<vmem>>, vector<24x256xf32>
    tpu.vector_store %arg11[%c120_250, %c0_251], %478 {strides = array<i32>} : memref<216x256xf32, #tpu.memory_space<vmem>>, vector<24x256xf32>,
    %cst_252 = arith.constant 0.000000e+00 : f32
    %480 = vector.broadcast %cst_252 : f32 to vector<24x256xf32>
    %c144_253 = arith.constant 144 : index
    %c0_254 = arith.constant 0 : index
    %481 = vector.load %arg11[%c144_253, %c0_254] : memref<216x256xf32, #tpu.memory_space<vmem>>, vector<24x256xf32>
    tpu.vector_store %arg11[%c144_253, %c0_254], %480 {strides = array<i32>} : memref<216x256xf32, #tpu.memory_space<vmem>>, vector<24x256xf32>,
    %cst_255 = arith.constant 0.000000e+00 : f32
    %482 = vector.broadcast %cst_255 : f32 to vector<24x256xf32>
    %c168_256 = arith.constant 168 : index
    %c0_257 = arith.constant 0 : index
    %483 = vector.load %arg11[%c168_256, %c0_257] : memref<216x256xf32, #tpu.memory_space<vmem>>, vector<24x256xf32>
    tpu.vector_store %arg11[%c168_256, %c0_257], %482 {strides = array<i32>} : memref<216x256xf32, #tpu.memory_space<vmem>>, vector<24x256xf32>,
    %cst_258 = arith.constant 0.000000e+00 : f32
    %484 = vector.broadcast %cst_258 : f32 to vector<24x256xf32>
    %c192_259 = arith.constant 192 : index
    %c0_260 = arith.constant 0 : index
    %485 = vector.load %arg11[%c192_259, %c0_260] : memref<216x256xf32, #tpu.memory_space<vmem>>, vector<24x256xf32>
    tpu.vector_store %arg11[%c192_259, %c0_260], %484 {strides = array<i32>} : memref<216x256xf32, #tpu.memory_space<vmem>>, vector<24x256xf32>,
    %c0_261 = arith.constant 0 : index
    %c0_262 = arith.constant 0 : index
    %486 = vector.load %arg11[%c0_261, %c0_262] : memref<216x256xf32, #tpu.memory_space<vmem>>, vector<216x256xf32>
    %487 = arith.truncf %486 : vector<216x256xf32> to vector<216x256xbf16>
    %c3_263 = arith.constant 3 : index
    %c0_264 = arith.constant 0 : index
    %c0_265 = arith.constant 0 : index
    %488 = vector.load %arg4[%c3_263, %c0_264, %c0_265] : memref<5x24x216xbf16, #tpu.memory_space<vmem>>, vector<1x24x216xbf16>
    %489 = vector.shape_cast %488 : vector<1x24x216xbf16> to vector<24x216xbf16>
    %cst_266 = arith.constant dense<0.000000e+00> : vector<24x256xf32>
    %490 = tpu.matmul %489, %487, %cst_266 {dimension_numbers = #tpu.dot_dimension_numbers<[1], [0], [0], [1], [0, 0, 1, 1], [], []>} : vector<24x216xbf16>, vector<216x256xbf16>, vector<24x256xf32> -> vector<24x256xf32>
    %cst_267 = arith.constant dense<0.000000e+00> : vector<24xf32>
    %491 = vector.multi_reduction <add>, %490, %cst_267 [1] : vector<24x256xf32> to vector<24xf32>
    %492 = vector.shape_cast %491 : vector<24xf32> to vector<24x1xf32>
    %cst_268 = arith.constant 3.906250e-03 : f32
    %493 = vector.broadcast %cst_268 : f32 to vector<24x1xf32>
    %494 = arith.mulf %492, %493 : vector<24x1xf32>
    %495 = arith.mulf %490, %490 : vector<24x256xf32>
    %cst_269 = arith.constant dense<0.000000e+00> : vector<24xf32>
    %496 = vector.multi_reduction <add>, %495, %cst_269 [1] : vector<24x256xf32> to vector<24xf32>
    %497 = vector.shape_cast %496 : vector<24xf32> to vector<24x1xf32>
    %cst_270 = arith.constant 3.906250e-03 : f32
    %498 = vector.broadcast %cst_270 : f32 to vector<24x1xf32>
    %499 = arith.mulf %497, %498 : vector<24x1xf32>
    %500 = arith.mulf %494, %494 : vector<24x1xf32>
    %501 = arith.subf %499, %500 : vector<24x1xf32>
    %cst_271 = arith.constant 0.000000e+00 : f32
    %502 = vector.broadcast %cst_271 : f32 to vector<24x1xf32>
    %503 = arith.maximumf %501, %502 : vector<24x1xf32>
    %c4_272 = arith.constant 4 : index
    %c0_273 = arith.constant 0 : index
    %c0_274 = arith.constant 0 : index
    %504 = vector.load %arg5[%c4_272, %c0_273, %c0_274] : memref<6x24x1xf32, #tpu.memory_space<vmem>>, vector<1x24x1xf32>
    %505 = vector.shape_cast %504 : vector<1x24x1xf32> to vector<24x1xf32>
    %506 = vector.broadcast %494 : vector<24x1xf32> to vector<24x256xf32>
    %507 = arith.subf %490, %506 : vector<24x256xf32>
    %cst_275 = arith.constant 9.99999974E-6 : f32
    %508 = vector.broadcast %cst_275 : f32 to vector<24x1xf32>
    %509 = arith.addf %503, %508 : vector<24x1xf32>
    %510 = math.rsqrt %509 : vector<24x1xf32>
    %511 = vector.broadcast %510 : vector<24x1xf32> to vector<24x256xf32>
    %512 = arith.mulf %507, %511 : vector<24x256xf32>
    %513 = vector.broadcast %505 : vector<24x1xf32> to vector<24x256xf32>
    %514 = arith.mulf %513, %512 : vector<24x256xf32>
    %c4_276 = arith.constant 4 : index
    %c0_277 = arith.constant 0 : index
    %c0_278 = arith.constant 0 : index
    %515 = vector.load %arg6[%c4_276, %c0_277, %c0_278] : memref<6x24x1xf32, #tpu.memory_space<vmem>>, vector<1x24x1xf32>
    %516 = vector.shape_cast %515 : vector<1x24x1xf32> to vector<24x1xf32>
    %517 = vector.broadcast %516 : vector<24x1xf32> to vector<24x256xf32>
    %518 = arith.addf %514, %517 : vector<24x256xf32>
    %c4_279 = arith.constant 4 : index
    %c0_280 = arith.constant 0 : index
    %519 = memref.load %arg7[%c4_279, %c0_280] : memref<6x2xf32, #tpu.memory_space<smem>>
    %520 = vector.broadcast %519 : f32 to vector<24x256xf32>
    %521 = arith.mulf %520, %490 : vector<24x256xf32>
    %c4_281 = arith.constant 4 : index
    %c1_282 = arith.constant 1 : index
    %522 = memref.load %arg7[%c4_281, %c1_282] : memref<6x2xf32, #tpu.memory_space<smem>>
    %523 = vector.broadcast %522 : f32 to vector<24x256xf32>
    %524 = arith.mulf %523, %518 : vector<24x256xf32>
    %525 = arith.addf %521, %524 : vector<24x256xf32>
    %cst_283 = arith.constant 2.000000e-01 : f32
    %526 = vector.broadcast %cst_283 : f32 to vector<24x256xf32>
    %527 = arith.mulf %526, %525 : vector<24x256xf32>
    %528 = arith.maximumf %525, %527 : vector<24x256xf32>
    %c17_i32_284 = arith.constant 17 : i32
    %529 = tpu.dynamic_rotate %528 by %c17_i32_284 dim 1 : vector<24x256xf32>, i32 -> vector<24x256xf32>
    %cst_285 = arith.constant 0.000000e+00 : f32
    %530 = vector.shape_cast %8 : vector<1x256xi1> to vector<1x256xi1>
    %531 = vector.broadcast %530 : vector<1x256xi1> to vector<24x256xi1>
    %532 = vector.broadcast %cst_285 : f32 to vector<24x256xf32>
    %533 = arith.select %531, %529, %532 : vector<24x256xi1>, vector<24x256xf32>
    %c0_286 = arith.constant 0 : index
    %c0_287 = arith.constant 0 : index
    %534 = vector.load %arg11[%c0_286, %c0_287] : memref<216x256xf32, #tpu.memory_space<vmem>>, vector<24x256xf32>
    tpu.vector_store %arg11[%c0_286, %c0_287], %533 {strides = array<i32>} : memref<216x256xf32, #tpu.memory_space<vmem>>, vector<24x256xf32>,
    %c16_i32_288 = arith.constant 16 : i32
    %535 = tpu.dynamic_rotate %528 by %c16_i32_288 dim 1 : vector<24x256xf32>, i32 -> vector<24x256xf32>
    %cst_289 = arith.constant 0.000000e+00 : f32
    %536 = vector.shape_cast %10 : vector<1x256xi1> to vector<1x256xi1>
    %537 = vector.broadcast %536 : vector<1x256xi1> to vector<24x256xi1>
    %538 = vector.broadcast %cst_289 : f32 to vector<24x256xf32>
    %539 = arith.select %537, %535, %538 : vector<24x256xi1>, vector<24x256xf32>
    %c24_290 = arith.constant 24 : index
    %c0_291 = arith.constant 0 : index
    %540 = vector.load %arg11[%c24_290, %c0_291] : memref<216x256xf32, #tpu.memory_space<vmem>>, vector<24x256xf32>
    tpu.vector_store %arg11[%c24_290, %c0_291], %539 {strides = array<i32>} : memref<216x256xf32, #tpu.memory_space<vmem>>, vector<24x256xf32>,
    %c15_i32_292 = arith.constant 15 : i32
    %541 = tpu.dynamic_rotate %528 by %c15_i32_292 dim 1 : vector<24x256xf32>, i32 -> vector<24x256xf32>
    %cst_293 = arith.constant 0.000000e+00 : f32
    %542 = vector.shape_cast %15 : vector<1x256xi1> to vector<1x256xi1>
    %543 = vector.broadcast %542 : vector<1x256xi1> to vector<24x256xi1>
    %544 = vector.broadcast %cst_293 : f32 to vector<24x256xf32>
    %545 = arith.select %543, %541, %544 : vector<24x256xi1>, vector<24x256xf32>
    %c48_294 = arith.constant 48 : index
    %c0_295 = arith.constant 0 : index
    %546 = vector.load %arg11[%c48_294, %c0_295] : memref<216x256xf32, #tpu.memory_space<vmem>>, vector<24x256xf32>
    tpu.vector_store %arg11[%c48_294, %c0_295], %545 {strides = array<i32>} : memref<216x256xf32, #tpu.memory_space<vmem>>, vector<24x256xf32>,
    %c1_i32_296 = arith.constant 1 : i32
    %547 = tpu.dynamic_rotate %528 by %c1_i32_296 dim 1 : vector<24x256xf32>, i32 -> vector<24x256xf32>
    %cst_297 = arith.constant 0.000000e+00 : f32
    %548 = vector.shape_cast %17 : vector<1x256xi1> to vector<1x256xi1>
    %549 = vector.broadcast %548 : vector<1x256xi1> to vector<24x256xi1>
    %550 = vector.broadcast %cst_297 : f32 to vector<24x256xf32>
    %551 = arith.select %549, %547, %550 : vector<24x256xi1>, vector<24x256xf32>
    %c72_298 = arith.constant 72 : index
    %c0_299 = arith.constant 0 : index
    %552 = vector.load %arg11[%c72_298, %c0_299] : memref<216x256xf32, #tpu.memory_space<vmem>>, vector<24x256xf32>
    tpu.vector_store %arg11[%c72_298, %c0_299], %551 {strides = array<i32>} : memref<216x256xf32, #tpu.memory_space<vmem>>, vector<24x256xf32>,
    %c96_300 = arith.constant 96 : index
    %c0_301 = arith.constant 0 : index
    %553 = vector.load %arg11[%c96_300, %c0_301] : memref<216x256xf32, #tpu.memory_space<vmem>>, vector<24x256xf32>
    tpu.vector_store %arg11[%c96_300, %c0_301], %528 {strides = array<i32>} : memref<216x256xf32, #tpu.memory_space<vmem>>, vector<24x256xf32>,
    %c255_i32_302 = arith.constant 255 : i32
    %554 = tpu.dynamic_rotate %528 by %c255_i32_302 dim 1 : vector<24x256xf32>, i32 -> vector<24x256xf32>
    %cst_303 = arith.constant 0.000000e+00 : f32
    %555 = vector.shape_cast %19 : vector<1x256xi1> to vector<1x256xi1>
    %556 = vector.broadcast %555 : vector<1x256xi1> to vector<24x256xi1>
    %557 = vector.broadcast %cst_303 : f32 to vector<24x256xf32>
    %558 = arith.select %556, %554, %557 : vector<24x256xi1>, vector<24x256xf32>
    %c120_304 = arith.constant 120 : index
    %c0_305 = arith.constant 0 : index
    %559 = vector.load %arg11[%c120_304, %c0_305] : memref<216x256xf32, #tpu.memory_space<vmem>>, vector<24x256xf32>
    tpu.vector_store %arg11[%c120_304, %c0_305], %558 {strides = array<i32>} : memref<216x256xf32, #tpu.memory_space<vmem>>, vector<24x256xf32>,
    %c241_i32_306 = arith.constant 241 : i32
    %560 = tpu.dynamic_rotate %528 by %c241_i32_306 dim 1 : vector<24x256xf32>, i32 -> vector<24x256xf32>
    %cst_307 = arith.constant 0.000000e+00 : f32
    %561 = vector.shape_cast %24 : vector<1x256xi1> to vector<1x256xi1>
    %562 = vector.broadcast %561 : vector<1x256xi1> to vector<24x256xi1>
    %563 = vector.broadcast %cst_307 : f32 to vector<24x256xf32>
    %564 = arith.select %562, %560, %563 : vector<24x256xi1>, vector<24x256xf32>
    %c144_308 = arith.constant 144 : index
    %c0_309 = arith.constant 0 : index
    %565 = vector.load %arg11[%c144_308, %c0_309] : memref<216x256xf32, #tpu.memory_space<vmem>>, vector<24x256xf32>
    tpu.vector_store %arg11[%c144_308, %c0_309], %564 {strides = array<i32>} : memref<216x256xf32, #tpu.memory_space<vmem>>, vector<24x256xf32>,
    %c240_i32_310 = arith.constant 240 : i32
    %566 = tpu.dynamic_rotate %528 by %c240_i32_310 dim 1 : vector<24x256xf32>, i32 -> vector<24x256xf32>
    %cst_311 = arith.constant 0.000000e+00 : f32
    %567 = vector.shape_cast %26 : vector<1x256xi1> to vector<1x256xi1>
    %568 = vector.broadcast %567 : vector<1x256xi1> to vector<24x256xi1>
    %569 = vector.broadcast %cst_311 : f32 to vector<24x256xf32>
    %570 = arith.select %568, %566, %569 : vector<24x256xi1>, vector<24x256xf32>
    %c168_312 = arith.constant 168 : index
    %c0_313 = arith.constant 0 : index
    %571 = vector.load %arg11[%c168_312, %c0_313] : memref<216x256xf32, #tpu.memory_space<vmem>>, vector<24x256xf32>
    tpu.vector_store %arg11[%c168_312, %c0_313], %570 {strides = array<i32>} : memref<216x256xf32, #tpu.memory_space<vmem>>, vector<24x256xf32>,
    %c239_i32_314 = arith.constant 239 : i32
    %572 = tpu.dynamic_rotate %528 by %c239_i32_314 dim 1 : vector<24x256xf32>, i32 -> vector<24x256xf32>
    %cst_315 = arith.constant 0.000000e+00 : f32
    %573 = vector.shape_cast %31 : vector<1x256xi1> to vector<1x256xi1>
    %574 = vector.broadcast %573 : vector<1x256xi1> to vector<24x256xi1>
    %575 = vector.broadcast %cst_315 : f32 to vector<24x256xf32>
    %576 = arith.select %574, %572, %575 : vector<24x256xi1>, vector<24x256xf32>
    %c192_316 = arith.constant 192 : index
    %c0_317 = arith.constant 0 : index
    %577 = vector.load %arg11[%c192_316, %c0_317] : memref<216x256xf32, #tpu.memory_space<vmem>>, vector<24x256xf32>
    tpu.vector_store %arg11[%c192_316, %c0_317], %576 {strides = array<i32>} : memref<216x256xf32, #tpu.memory_space<vmem>>, vector<24x256xf32>,
    %c0_318 = arith.constant 0 : index
    %c0_319 = arith.constant 0 : index
    %578 = vector.load %arg11[%c0_318, %c0_319] : memref<216x256xf32, #tpu.memory_space<vmem>>, vector<216x256xf32>
    %579 = arith.truncf %578 : vector<216x256xf32> to vector<216x256xbf16>
    %c4_320 = arith.constant 4 : index
    %c0_321 = arith.constant 0 : index
    %c0_322 = arith.constant 0 : index
    %580 = vector.load %arg4[%c4_320, %c0_321, %c0_322] : memref<5x24x216xbf16, #tpu.memory_space<vmem>>, vector<1x24x216xbf16>
    %581 = vector.shape_cast %580 : vector<1x24x216xbf16> to vector<24x216xbf16>
    %cst_323 = arith.constant dense<0.000000e+00> : vector<24x256xf32>
    %582 = tpu.matmul %581, %579, %cst_323 {dimension_numbers = #tpu.dot_dimension_numbers<[1], [0], [0], [1], [0, 0, 1, 1], [], []>} : vector<24x216xbf16>, vector<216x256xbf16>, vector<24x256xf32> -> vector<24x256xf32>
    %cst_324 = arith.constant dense<0.000000e+00> : vector<24xf32>
    %583 = vector.multi_reduction <add>, %582, %cst_324 [1] : vector<24x256xf32> to vector<24xf32>
    %584 = vector.shape_cast %583 : vector<24xf32> to vector<24x1xf32>
    %cst_325 = arith.constant 3.906250e-03 : f32
    %585 = vector.broadcast %cst_325 : f32 to vector<24x1xf32>
    %586 = arith.mulf %584, %585 : vector<24x1xf32>
    %587 = arith.mulf %582, %582 : vector<24x256xf32>
    %cst_326 = arith.constant dense<0.000000e+00> : vector<24xf32>
    %588 = vector.multi_reduction <add>, %587, %cst_326 [1] : vector<24x256xf32> to vector<24xf32>
    %589 = vector.shape_cast %588 : vector<24xf32> to vector<24x1xf32>
    %cst_327 = arith.constant 3.906250e-03 : f32
    %590 = vector.broadcast %cst_327 : f32 to vector<24x1xf32>
    %591 = arith.mulf %589, %590 : vector<24x1xf32>
    %592 = arith.mulf %586, %586 : vector<24x1xf32>
    %593 = arith.subf %591, %592 : vector<24x1xf32>
    %cst_328 = arith.constant 0.000000e+00 : f32
    %594 = vector.broadcast %cst_328 : f32 to vector<24x1xf32>
    %595 = arith.maximumf %593, %594 : vector<24x1xf32>
    %c5_329 = arith.constant 5 : index
    %c0_330 = arith.constant 0 : index
    %c0_331 = arith.constant 0 : index
    %596 = vector.load %arg5[%c5_329, %c0_330, %c0_331] : memref<6x24x1xf32, #tpu.memory_space<vmem>>, vector<1x24x1xf32>
    %597 = vector.shape_cast %596 : vector<1x24x1xf32> to vector<24x1xf32>
    %598 = vector.broadcast %586 : vector<24x1xf32> to vector<24x256xf32>
    %599 = arith.subf %582, %598 : vector<24x256xf32>
    %cst_332 = arith.constant 9.99999974E-6 : f32
    %600 = vector.broadcast %cst_332 : f32 to vector<24x1xf32>
    %601 = arith.addf %595, %600 : vector<24x1xf32>
    %602 = math.rsqrt %601 : vector<24x1xf32>
    %603 = vector.broadcast %602 : vector<24x1xf32> to vector<24x256xf32>
    %604 = arith.mulf %599, %603 : vector<24x256xf32>
    %605 = vector.broadcast %597 : vector<24x1xf32> to vector<24x256xf32>
    %606 = arith.mulf %605, %604 : vector<24x256xf32>
    %c5_333 = arith.constant 5 : index
    %c0_334 = arith.constant 0 : index
    %c0_335 = arith.constant 0 : index
    %607 = vector.load %arg6[%c5_333, %c0_334, %c0_335] : memref<6x24x1xf32, #tpu.memory_space<vmem>>, vector<1x24x1xf32>
    %608 = vector.shape_cast %607 : vector<1x24x1xf32> to vector<24x1xf32>
    %609 = vector.broadcast %608 : vector<24x1xf32> to vector<24x256xf32>
    %610 = arith.addf %606, %609 : vector<24x256xf32>
    %c5_336 = arith.constant 5 : index
    %c0_337 = arith.constant 0 : index
    %611 = memref.load %arg7[%c5_336, %c0_337] : memref<6x2xf32, #tpu.memory_space<smem>>
    %612 = vector.broadcast %611 : f32 to vector<24x256xf32>
    %613 = arith.mulf %612, %582 : vector<24x256xf32>
    %c5_338 = arith.constant 5 : index
    %c1_339 = arith.constant 1 : index
    %614 = memref.load %arg7[%c5_338, %c1_339] : memref<6x2xf32, #tpu.memory_space<smem>>
    %615 = vector.broadcast %614 : f32 to vector<24x256xf32>
    %616 = arith.mulf %615, %610 : vector<24x256xf32>
    %617 = arith.addf %613, %616 : vector<24x256xf32>
    %cst_340 = arith.constant 2.000000e-01 : f32
    %618 = vector.broadcast %cst_340 : f32 to vector<24x256xf32>
    %619 = arith.mulf %618, %617 : vector<24x256xf32>
    %620 = arith.maximumf %617, %619 : vector<24x256xf32>
    %c0_341 = arith.constant 0 : index
    %c0_342 = arith.constant 0 : index
    %621 = vector.load %arg8[%c0_341, %c0_342] : memref<1x24xf32, #tpu.memory_space<vmem>>, vector<1x24xf32>
    %cst_343 = arith.constant dense<0.000000e+00> : vector<1x256xf32>
    %622 = tpu.matmul %621, %620, %cst_343 {dimension_numbers = #tpu.dot_dimension_numbers<[1], [0], [0], [1], [0, 0, 1, 1], [], []>} : vector<1x24xf32>, vector<24x256xf32>, vector<1x256xf32> -> vector<1x256xf32>
    %c0_344 = arith.constant 0 : index
    %623 = memref.load %arg9[%c0_344] : memref<1xf32, #tpu.memory_space<smem>>
    %624 = vector.broadcast %623 : f32 to vector<1x256xf32>
    %625 = arith.addf %622, %624 : vector<1x256xf32>
    %c0_345 = arith.constant 0 : index
    %c0_346 = arith.constant 0 : index
    %c0_347 = arith.constant 0 : index
    %626 = vector.load %arg10[%c0_345, %c0_346, %c0_347] : memref<1x1x256xf32, #tpu.memory_space<vmem>>, vector<1x1x256xf32>
    %627 = vector.shape_cast %626 : vector<1x1x256xf32> to vector<1x256xf32>
    %628 = vector.shape_cast %625 : vector<1x256xf32> to vector<1x1x256xf32>
    tpu.vector_store %arg10[%c0_345, %c0_346, %c0_347], %628 {strides = array<i32>} : memref<1x1x256xf32, #tpu.memory_space<vmem>>, vector<1x1x256xf32>,
    return
  }
  func.func @transform_0(%arg0: i32) -> (i32, i32, i32) {
    %c0_i32 = arith.constant 0 : i32
    %c0_i32_0 = arith.constant 0 : i32
    %c0_i32_1 = arith.constant 0 : i32
    return %arg0, %c0_i32, %c0_i32_0 : i32, i32, i32
  }
  func.func @transform_1(%arg0: i32) -> (i32, i32, i32) {
    %c0_i32 = arith.constant 0 : i32
    %c0_i32_0 = arith.constant 0 : i32
    %c0_i32_1 = arith.constant 0 : i32
    %c0_i32_2 = arith.constant 0 : i32
    return %c0_i32, %c0_i32_0, %c0_i32_1 : i32, i32, i32
  }
  func.func @transform_2(%arg0: i32) -> (i32, i32) {
    %c0_i32 = arith.constant 0 : i32
    %c0_i32_0 = arith.constant 0 : i32
    %c0_i32_1 = arith.constant 0 : i32
    return %c0_i32, %c0_i32_0 : i32, i32
  }
  func.func @transform_3(%arg0: i32) -> (i32, i32, i32) {
    %c0_i32 = arith.constant 0 : i32
    %c0_i32_0 = arith.constant 0 : i32
    %c0_i32_1 = arith.constant 0 : i32
    %c0_i32_2 = arith.constant 0 : i32
    return %c0_i32, %c0_i32_0, %c0_i32_1 : i32, i32, i32
  }
  func.func @transform_4(%arg0: i32) -> (i32, i32, i32) {
    %c0_i32 = arith.constant 0 : i32
    %c0_i32_0 = arith.constant 0 : i32
    %c0_i32_1 = arith.constant 0 : i32
    %c0_i32_2 = arith.constant 0 : i32
    return %c0_i32, %c0_i32_0, %c0_i32_1 : i32, i32, i32
  }
  func.func @transform_5(%arg0: i32) -> (i32, i32, i32) {
    %c0_i32 = arith.constant 0 : i32
    %c0_i32_0 = arith.constant 0 : i32
    %c0_i32_1 = arith.constant 0 : i32
    %c0_i32_2 = arith.constant 0 : i32
    return %c0_i32, %c0_i32_0, %c0_i32_1 : i32, i32, i32
  }
  func.func @transform_6(%arg0: i32) -> (i32, i32) {
    %c0_i32 = arith.constant 0 : i32
    %c0_i32_0 = arith.constant 0 : i32
    %c0_i32_1 = arith.constant 0 : i32
    return %c0_i32, %c0_i32_0 : i32, i32
  }
  func.func @transform_7(%arg0: i32) -> (i32, i32) {
    %c0_i32 = arith.constant 0 : i32
    %c0_i32_0 = arith.constant 0 : i32
    %c0_i32_1 = arith.constant 0 : i32
    return %c0_i32, %c0_i32_0 : i32, i32
  }
  func.func @transform_8(%arg0: i32) -> i32 {
    %c0_i32 = arith.constant 0 : i32
    %c0_i32_0 = arith.constant 0 : i32
    return %c0_i32 : i32
  }
  func.func @transform_9(%arg0: i32) -> (i32, i32, i32) {
    %c0_i32 = arith.constant 0 : i32
    %c0_i32_0 = arith.constant 0 : i32
    %c0_i32_1 = arith.constant 0 : i32
    return %arg0, %c0_i32, %c0_i32_0 : i32, i32, i32
  }
}

module attributes {stable_mosaic.version = 11 : i64} {
  func.func @fuse_kernel(%arg0: i32, %arg1: memref<16x96xbf16, #tpu.memory_space<vmem>>, %arg2: memref<16x16xbf16, #tpu.memory_space<vmem>>, %arg3: memref<16x32xbf16, #tpu.memory_space<vmem>>, %arg4: memref<3x16x32xf32, #tpu.memory_space<vmem>>, %arg5: memref<16x32xf32, #tpu.memory_space<vmem>>, %arg6: memref<3x16x32xf32, #tpu.memory_space<vmem>>) attributes {dimension_semantics = [#tpu.dimension_semantics<parallel>], iteration_bounds = array<i64: 2>, scalar_prefetch = 0 : i64, scratch_operands = 0 : i64, tpu.core_type = #tpu.core_type<tc>, window_params = [{pipeline_mode = #tpu.pipeline_mode<synchronous>, transform_indices = @transform_0, window_bounds = array<i64: 16, 96>}, {transform_indices = @transform_1, window_bounds = array<i64: 16, 16>}, {pipeline_mode = #tpu.pipeline_mode<synchronous>, transform_indices = @transform_2, window_bounds = array<i64: 16, 32>}, {transform_indices = @transform_3, window_bounds = array<i64: 3, 16, 32>}, {transform_indices = @transform_4, window_bounds = array<i64: 16, 32>}, {transform_indices = @transform_5, window_bounds = array<i64: 3, 16, 32>}]} {
    %c0 = arith.constant 0 : index
    %c0_0 = arith.constant 0 : index
    %0 = vector.load %arg2[%c0, %c0_0] : memref<16x16xbf16, #tpu.memory_space<vmem>>, vector<16x16xbf16>
    %c0_1 = arith.constant 0 : index
    %c0_2 = arith.constant 0 : index
    %1 = vector.load %arg1[%c0_1, %c0_2] : memref<16x96xbf16, #tpu.memory_space<vmem>>, vector<16x96xbf16>
    %cst = arith.constant dense<0.000000e+00> : vector<16x96xf32>
    %2 = tpu.matmul %0, %1, %cst {dimension_numbers = #tpu.dot_dimension_numbers<[1], [0], [0], [1], [0, 0, 1, 1], [], []>} : vector<16x16xbf16>, vector<16x96xbf16>, vector<16x96xf32> -> vector<16x96xf32>
    %c0_3 = arith.constant 0 : index
    %c0_4 = arith.constant 0 : index
    %3 = vector.load %arg3[%c0_3, %c0_4] : memref<16x32xbf16, #tpu.memory_space<vmem>>, vector<16x32xbf16>
    %4 = vector.extract_strided_slice %2 {offsets = [0, 0], sizes = [16, 16], strides = [1, 1]} : vector<16x96xf32> to vector<16x16xf32>
    %5 = arith.truncf %4 : vector<16x16xf32> to vector<16x16xbf16>
    %cst_5 = arith.constant dense<0.000000e+00> : vector<16x32xf32>
    %6 = tpu.matmul %5, %3, %cst_5 {dimension_numbers = #tpu.dot_dimension_numbers<[1], [0], [0], [1], [0, 0, 1, 1], [], []>} : vector<16x16xbf16>, vector<16x32xbf16>, vector<16x32xf32> -> vector<16x32xf32>
    %7 = vector.extract_strided_slice %2 {offsets = [0, 48], sizes = [16, 16], strides = [1, 1]} : vector<16x96xf32> to vector<16x16xf32>
    %8 = arith.truncf %7 : vector<16x16xf32> to vector<16x16xbf16>
    %cst_6 = arith.constant dense<0.000000e+00> : vector<16x32xf32>
    %9 = tpu.matmul %8, %3, %cst_6 {dimension_numbers = #tpu.dot_dimension_numbers<[1], [0], [0], [1], [0, 0, 1, 1], [], []>} : vector<16x16xbf16>, vector<16x32xbf16>, vector<16x32xf32> -> vector<16x32xf32>
    %c0_7 = arith.constant 0 : index
    %c0_8 = arith.constant 0 : index
    %c0_9 = arith.constant 0 : index
    %10 = vector.load %arg4[%c0_7, %c0_8, %c0_9] : memref<3x16x32xf32, #tpu.memory_space<vmem>>, vector<1x16x32xf32>
    %11 = vector.shape_cast %10 : vector<1x16x32xf32> to vector<16x32xf32>
    %12 = arith.mulf %6, %11 : vector<16x32xf32>
    %13 = arith.addf %12, %9 : vector<16x32xf32>
    %14 = math.absf %13 : vector<16x32xf32>
    %cst_10 = arith.constant 9.99999993E-9 : f32
    %15 = vector.broadcast %cst_10 : f32 to vector<16x32xf32>
    %16 = arith.addf %14, %15 : vector<16x32xf32>
    %c0_11 = arith.constant 0 : index
    %c0_12 = arith.constant 0 : index
    %c0_13 = arith.constant 0 : index
    %17 = vector.load %arg6[%c0_11, %c0_12, %c0_13] : memref<3x16x32xf32, #tpu.memory_space<vmem>>, vector<1x16x32xf32>
    %18 = vector.shape_cast %17 : vector<1x16x32xf32> to vector<16x32xf32>
    %19 = vector.shape_cast %16 : vector<16x32xf32> to vector<1x16x32xf32>
    tpu.vector_store %arg6[%c0_11, %c0_12, %c0_13], %19 {strides = array<i32>} : memref<3x16x32xf32, #tpu.memory_space<vmem>>, vector<1x16x32xf32>,
    %20 = arith.mulf %16, %11 : vector<16x32xf32>
    %21 = vector.extract_strided_slice %2 {offsets = [0, 16], sizes = [16, 16], strides = [1, 1]} : vector<16x96xf32> to vector<16x16xf32>
    %22 = arith.truncf %21 : vector<16x16xf32> to vector<16x16xbf16>
    %cst_14 = arith.constant dense<0.000000e+00> : vector<16x32xf32>
    %23 = tpu.matmul %22, %3, %cst_14 {dimension_numbers = #tpu.dot_dimension_numbers<[1], [0], [0], [1], [0, 0, 1, 1], [], []>} : vector<16x16xbf16>, vector<16x32xbf16>, vector<16x32xf32> -> vector<16x32xf32>
    %24 = vector.extract_strided_slice %2 {offsets = [0, 64], sizes = [16, 16], strides = [1, 1]} : vector<16x96xf32> to vector<16x16xf32>
    %25 = arith.truncf %24 : vector<16x16xf32> to vector<16x16xbf16>
    %cst_15 = arith.constant dense<0.000000e+00> : vector<16x32xf32>
    %26 = tpu.matmul %25, %3, %cst_15 {dimension_numbers = #tpu.dot_dimension_numbers<[1], [0], [0], [1], [0, 0, 1, 1], [], []>} : vector<16x16xbf16>, vector<16x32xbf16>, vector<16x32xf32> -> vector<16x32xf32>
    %c1 = arith.constant 1 : index
    %c0_16 = arith.constant 0 : index
    %c0_17 = arith.constant 0 : index
    %27 = vector.load %arg4[%c1, %c0_16, %c0_17] : memref<3x16x32xf32, #tpu.memory_space<vmem>>, vector<1x16x32xf32>
    %28 = vector.shape_cast %27 : vector<1x16x32xf32> to vector<16x32xf32>
    %29 = arith.mulf %23, %28 : vector<16x32xf32>
    %30 = arith.addf %29, %26 : vector<16x32xf32>
    %31 = math.absf %30 : vector<16x32xf32>
    %cst_18 = arith.constant 9.99999993E-9 : f32
    %32 = vector.broadcast %cst_18 : f32 to vector<16x32xf32>
    %33 = arith.addf %31, %32 : vector<16x32xf32>
    %c1_19 = arith.constant 1 : index
    %c0_20 = arith.constant 0 : index
    %c0_21 = arith.constant 0 : index
    %34 = vector.load %arg6[%c1_19, %c0_20, %c0_21] : memref<3x16x32xf32, #tpu.memory_space<vmem>>, vector<1x16x32xf32>
    %35 = vector.shape_cast %34 : vector<1x16x32xf32> to vector<16x32xf32>
    %36 = vector.shape_cast %33 : vector<16x32xf32> to vector<1x16x32xf32>
    tpu.vector_store %arg6[%c1_19, %c0_20, %c0_21], %36 {strides = array<i32>} : memref<3x16x32xf32, #tpu.memory_space<vmem>>, vector<1x16x32xf32>,
    %37 = arith.addf %16, %33 : vector<16x32xf32>
    %38 = arith.mulf %33, %28 : vector<16x32xf32>
    %39 = arith.addf %20, %38 : vector<16x32xf32>
    %40 = vector.extract_strided_slice %2 {offsets = [0, 32], sizes = [16, 16], strides = [1, 1]} : vector<16x96xf32> to vector<16x16xf32>
    %41 = arith.truncf %40 : vector<16x16xf32> to vector<16x16xbf16>
    %cst_22 = arith.constant dense<0.000000e+00> : vector<16x32xf32>
    %42 = tpu.matmul %41, %3, %cst_22 {dimension_numbers = #tpu.dot_dimension_numbers<[1], [0], [0], [1], [0, 0, 1, 1], [], []>} : vector<16x16xbf16>, vector<16x32xbf16>, vector<16x32xf32> -> vector<16x32xf32>
    %43 = vector.extract_strided_slice %2 {offsets = [0, 80], sizes = [16, 16], strides = [1, 1]} : vector<16x96xf32> to vector<16x16xf32>
    %44 = arith.truncf %43 : vector<16x16xf32> to vector<16x16xbf16>
    %cst_23 = arith.constant dense<0.000000e+00> : vector<16x32xf32>
    %45 = tpu.matmul %44, %3, %cst_23 {dimension_numbers = #tpu.dot_dimension_numbers<[1], [0], [0], [1], [0, 0, 1, 1], [], []>} : vector<16x16xbf16>, vector<16x32xbf16>, vector<16x32xf32> -> vector<16x32xf32>
    %c2 = arith.constant 2 : index
    %c0_24 = arith.constant 0 : index
    %c0_25 = arith.constant 0 : index
    %46 = vector.load %arg4[%c2, %c0_24, %c0_25] : memref<3x16x32xf32, #tpu.memory_space<vmem>>, vector<1x16x32xf32>
    %47 = vector.shape_cast %46 : vector<1x16x32xf32> to vector<16x32xf32>
    %48 = arith.mulf %42, %47 : vector<16x32xf32>
    %49 = arith.addf %48, %45 : vector<16x32xf32>
    %50 = math.absf %49 : vector<16x32xf32>
    %cst_26 = arith.constant 9.99999993E-9 : f32
    %51 = vector.broadcast %cst_26 : f32 to vector<16x32xf32>
    %52 = arith.addf %50, %51 : vector<16x32xf32>
    %c2_27 = arith.constant 2 : index
    %c0_28 = arith.constant 0 : index
    %c0_29 = arith.constant 0 : index
    %53 = vector.load %arg6[%c2_27, %c0_28, %c0_29] : memref<3x16x32xf32, #tpu.memory_space<vmem>>, vector<1x16x32xf32>
    %54 = vector.shape_cast %53 : vector<1x16x32xf32> to vector<16x32xf32>
    %55 = vector.shape_cast %52 : vector<16x32xf32> to vector<1x16x32xf32>
    tpu.vector_store %arg6[%c2_27, %c0_28, %c0_29], %55 {strides = array<i32>} : memref<3x16x32xf32, #tpu.memory_space<vmem>>, vector<1x16x32xf32>,
    %56 = arith.addf %37, %52 : vector<16x32xf32>
    %57 = arith.mulf %52, %47 : vector<16x32xf32>
    %58 = arith.addf %39, %57 : vector<16x32xf32>
    %59 = tpu.reciprocal %56 {approx = true} : vector<16x32xf32> -> vector<16x32xf32>
    %60 = arith.mulf %58, %59 : vector<16x32xf32>
    %cst_30 = arith.constant 0.000000e+00 : f32
    %cst_31 = arith.constant 1.000000e+00 : f32
    %61 = vector.broadcast %cst_30 : f32 to vector<16x32xf32>
    %62 = arith.maximumf %61, %60 : vector<16x32xf32>
    %63 = vector.broadcast %cst_31 : f32 to vector<16x32xf32>
    %64 = arith.minimumf %63, %62 : vector<16x32xf32>
    %c0_32 = arith.constant 0 : index
    %c0_33 = arith.constant 0 : index
    %65 = vector.load %arg5[%c0_32, %c0_33] : memref<16x32xf32, #tpu.memory_space<vmem>>, vector<16x32xf32>
    tpu.vector_store %arg5[%c0_32, %c0_33], %64 {strides = array<i32>} : memref<16x32xf32, #tpu.memory_space<vmem>>, vector<16x32xf32>,
    %c0_34 = arith.constant 0 : index
    %c0_35 = arith.constant 0 : index
    %c0_36 = arith.constant 0 : index
    %66 = vector.load %arg6[%c0_34, %c0_35, %c0_36] : memref<3x16x32xf32, #tpu.memory_space<vmem>>, vector<1x16x32xf32>
    %67 = vector.shape_cast %66 : vector<1x16x32xf32> to vector<16x32xf32>
    %68 = arith.mulf %67, %59 : vector<16x32xf32>
    %c0_37 = arith.constant 0 : index
    %c0_38 = arith.constant 0 : index
    %c0_39 = arith.constant 0 : index
    %69 = vector.load %arg6[%c0_37, %c0_38, %c0_39] : memref<3x16x32xf32, #tpu.memory_space<vmem>>, vector<1x16x32xf32>
    %70 = vector.shape_cast %69 : vector<1x16x32xf32> to vector<16x32xf32>
    %71 = vector.shape_cast %68 : vector<16x32xf32> to vector<1x16x32xf32>
    tpu.vector_store %arg6[%c0_37, %c0_38, %c0_39], %71 {strides = array<i32>} : memref<3x16x32xf32, #tpu.memory_space<vmem>>, vector<1x16x32xf32>,
    %c1_40 = arith.constant 1 : index
    %c0_41 = arith.constant 0 : index
    %c0_42 = arith.constant 0 : index
    %72 = vector.load %arg6[%c1_40, %c0_41, %c0_42] : memref<3x16x32xf32, #tpu.memory_space<vmem>>, vector<1x16x32xf32>
    %73 = vector.shape_cast %72 : vector<1x16x32xf32> to vector<16x32xf32>
    %74 = arith.mulf %73, %59 : vector<16x32xf32>
    %c1_43 = arith.constant 1 : index
    %c0_44 = arith.constant 0 : index
    %c0_45 = arith.constant 0 : index
    %75 = vector.load %arg6[%c1_43, %c0_44, %c0_45] : memref<3x16x32xf32, #tpu.memory_space<vmem>>, vector<1x16x32xf32>
    %76 = vector.shape_cast %75 : vector<1x16x32xf32> to vector<16x32xf32>
    %77 = vector.shape_cast %74 : vector<16x32xf32> to vector<1x16x32xf32>
    tpu.vector_store %arg6[%c1_43, %c0_44, %c0_45], %77 {strides = array<i32>} : memref<3x16x32xf32, #tpu.memory_space<vmem>>, vector<1x16x32xf32>,
    %c2_46 = arith.constant 2 : index
    %c0_47 = arith.constant 0 : index
    %c0_48 = arith.constant 0 : index
    %78 = vector.load %arg6[%c2_46, %c0_47, %c0_48] : memref<3x16x32xf32, #tpu.memory_space<vmem>>, vector<1x16x32xf32>
    %79 = vector.shape_cast %78 : vector<1x16x32xf32> to vector<16x32xf32>
    %80 = arith.mulf %79, %59 : vector<16x32xf32>
    %c2_49 = arith.constant 2 : index
    %c0_50 = arith.constant 0 : index
    %c0_51 = arith.constant 0 : index
    %81 = vector.load %arg6[%c2_49, %c0_50, %c0_51] : memref<3x16x32xf32, #tpu.memory_space<vmem>>, vector<1x16x32xf32>
    %82 = vector.shape_cast %81 : vector<1x16x32xf32> to vector<16x32xf32>
    %83 = vector.shape_cast %80 : vector<16x32xf32> to vector<1x16x32xf32>
    tpu.vector_store %arg6[%c2_49, %c0_50, %c0_51], %83 {strides = array<i32>} : memref<3x16x32xf32, #tpu.memory_space<vmem>>, vector<1x16x32xf32>,
    return
  }
  func.func @transform_0(%arg0: i32) -> (i32, i32) {
    %c0_i32 = arith.constant 0 : i32
    %c0_i32_0 = arith.constant 0 : i32
    %c0_i32_1 = arith.constant 0 : i32
    return %c0_i32, %c0_i32_0 : i32, i32
  }
  func.func @transform_1(%arg0: i32) -> (i32, i32) {
    %c0_i32 = arith.constant 0 : i32
    %c0_i32_0 = arith.constant 0 : i32
    return %arg0, %c0_i32 : i32, i32
  }
  func.func @transform_2(%arg0: i32) -> (i32, i32) {
    %c0_i32 = arith.constant 0 : i32
    %c0_i32_0 = arith.constant 0 : i32
    %c0_i32_1 = arith.constant 0 : i32
    return %c0_i32, %c0_i32_0 : i32, i32
  }
  func.func @transform_3(%arg0: i32) -> (i32, i32, i32) {
    %c0_i32 = arith.constant 0 : i32
    %c0_i32_0 = arith.constant 0 : i32
    %c0_i32_1 = arith.constant 0 : i32
    return %c0_i32, %arg0, %c0_i32_0 : i32, i32, i32
  }
  func.func @transform_4(%arg0: i32) -> (i32, i32) {
    %c0_i32 = arith.constant 0 : i32
    %c0_i32_0 = arith.constant 0 : i32
    return %arg0, %c0_i32 : i32, i32
  }
  func.func @transform_5(%arg0: i32) -> (i32, i32, i32) {
    %c0_i32 = arith.constant 0 : i32
    %c0_i32_0 = arith.constant 0 : i32
    %c0_i32_1 = arith.constant 0 : i32
    return %c0_i32, %arg0, %c0_i32_0 : i32, i32, i32
  }
}

</mosaic_0001>

<bundles_post_ra>
// kernel: mefnet_forward.4
= control target key start
LH: loop header
LB: loop body
LE: loop exit
PB: predicated region body
PF: predicated region fallthrough
CT: control target
= control target key end

     0   :  { %s1253_s18 = smov 0   ;;  %s1308_s0 = inlined_call_operand.vmem [shape: f32[3,16,16], index: 0, kind: input, shape index: {}]   ;;  %s1309_s1 = inlined_call_operand.vmem [shape: f32[3,16,16], index: 1, kind: input, shape index: {}]   ;;  %s1310_s2 = inlined_call_operand.vmem [shape: f32[16,16], index: 2, kind: input, shape index: {}]   ;;  %s1311_s3 = inlined_call_operand.vmem [shape: f32[16,16], index: 3, kind: input, shape index: {}]   ;;  %s1312_s4 = inlined_call_operand.vmem [shape: bf16[3,16,16], index: 4, kind: output, shape index: {0}]   ;;  %s1313_s5 = inlined_call_operand.vmem [shape: bf16[3,16,16], index: 5, kind: output, shape index: {1}]  }
   0x1 LB: > { %s1040_s19 = sadd.s32 4294967295, %s1221_s18   ;;  %p1044_p0 = scmp.ge.s32.totalorder %s1221_s18, 1  ;;  %s1221_s18 = sphi %s1253_s18, %s16_s18  }
   0x2   : > { %p200_p1 = scmp.lt.s32.totalorder %s1221_s18, 4 }
   0x4   : > { %p201_p2 = pnand %p1044_p0, %p200_p1 }
   0x5   : > { %p238_p3 = scmp.lt.s32.totalorder (!%p201_p2), %s1040_s19, 2  ;;  %v258_v0 = vld [vmem:[%s1310_s2] sm:$0xff] (!%p201_p2)  ;;  %vm266_vm0 = vcmask (!%p201_p2), 130048   ;;  %v261_v2 = vld [vmem:[%s1311_s3 + $0x8] sm:$0xff] (!%p201_p2)  ;;  %vm927_vm1 = vcmask (!%p201_p2), 125952  }
   0x6   : > { %204 = sbr.rel (%p201_p2) target bundleno = 486 (0x1e6), region = 36  ;;  %v260_v1 = vld [vmem:[%s1311_s3] sm:$0xff] (!%p201_p2)  ;;  %1119 = vmatprep.mubr.msk.f32.mxu0 (!%p201_p2), %vm266_vm0, %v258_v0  ;;  %v259_v12 = vld [vmem:[%s1310_s2 + $0x8] sm:$0xff] (!%p201_p2) }
   0x7   : > { %v1175_v3 = vpack.c.bf16 (!%p201_p2), %v261_v2, %v260_v1 }
   0x9   : > { %1176 = vmatprep.subr.bf16.mxu1 (!%p201_p2), %v1175_v3 }
   0xa   : > { %1178 = vmatpush3.bf16.msra.mxu1 (!%p201_p2), %v1175_v3 }
   0xb   : > { %1184 = vmatprep.subr.bf16.mxu1 (!%p201_p2), %v1175_v3 }
   0xd   : > { %s1315_s19 = smov (!%p238_p3, %s1040_s19), 2 }
   0xe   : > { %s1075_s26 = sshll.u32 %s1315_s19, 4  ;;  %s1077_s10 = sshll.u32 %s1315_s19, 3 }
   0xf   : > { %s247_s29 = scalar_lea.vmem %s1309_s1, %s1075_s26  ;;  %s242_s7 = scalar_lea.vmem %s1308_s0, %s1075_s26 }
  0x10   : > { %v262_v4 = vld [vmem:[%s247_s29] sm:$0xff]  ;;  %v263_v5 = vld [vmem:[%s247_s29 + $0x8] sm:$0xff]  ;;  %s252_s13 = scalar_lea.vmem %s1312_s4, %s1077_s10  ;;  %s257_s16 = scalar_lea.vmem %s1313_s5, %s1077_s10 }
  0x11   : > { %v1171_v6 = vpack.c.bf16 %v263_v5, %v262_v4  ;;  %v264_v7 = vld [vmem:[%s242_s7] sm:$0xff]  ;;  %v265_v8 = vld [vmem:[%s242_s7 + $0x8] sm:$0xff]  ;;  %v743_v14 = vmul.f32 %v262_v4, %v262_v4  ;;  %v744_v15 = vmul.f32 %v263_v5, %v263_v5 }
  0x12   : > { %v1179_v9 = vpack.c.bf16 %v265_v8, %v264_v7  ;;  %v585_v10 = vmul.f32 %v264_v7, %v262_v4  ;;  %v586_v11 = vmul.f32 %v265_v8, %v263_v5 }
  0x13   : > { %1172 = vmatprep.subr.bf16.mxu0 %v1171_v6  ;;  %v1195_v16 = vpack.c.bf16 %v744_v15, %v743_v14 }
  0x14   : > { %1174 = vmatpush3.bf16.msra.mxu0 %v1171_v6  ;;  %v1187_v13 = vpack.c.bf16 %v586_v11, %v585_v10 }
  0x15   : > { %1180 = vmatprep.subr.bf16.mxu0 %v1179_v9 }
  0x17   : > { %1120 = vmatmul.mubr.msk.f32.vlgmr.msra.gmra.mrb[0].mxu0 %vm266_vm0, %v259_v12 }
  0x18   : > { %1182 = vmatpush3.bf16.msra.mxu0 %v1179_v9  ;;  %1133 = vmatprep.mubr.msk.f32.mxu0 %vm266_vm0, %v258_v0 }
  0x19   : > { %1188 = vmatprep.subr.bf16.mxu0 %v1187_v13 }
  0x1b   : > { %1134 = vmatmul.mubr.msk.f32.vlgmr.msra.gmra.mrb[2].mxu0 %vm266_vm0, %v259_v12 }
  0x1c   : > { %1190 = vmatpush3.bf16.msra.mxu0 %v1187_v13  ;;  %1147 = vmatprep.mubr.msk.f32.mxu0 %vm266_vm0, %v258_v0 }
  0x1d   : > { %1196 = vmatprep.subr.bf16.mxu0 %v1195_v16 }
  0x1f   : > { %1148 = vmatmul.mubr.msk.f32.vlgmr.msra.gmra.mrb[4].mxu0 %vm266_vm0, %v259_v12 }
  0x20   : > { %1198 = vmatpush3.bf16.msra.mxu0 %v1195_v16  ;;  %1161 = vmatprep.mubr.msk.f32.mxu0 %vm266_vm0, %v258_v0 }
  0x23   : > { %1162 = vmatmul.mubr.msk.f32.vlgmr.msra.gmra.mrb[6].mxu0 %vm266_vm0, %v259_v12 }
  0xea   : > { %v1121_v17 = vpop.f32.mrb[0].mxu0 }
  0xeb   : > { %v339_v18 = vpop.f32.mrb[1].mxu0 }
  0xec   : > { %1126 = vmatprep.mubr.msk.f32.mxu1 %vm266_vm0, %v339_v18 }
  0xed   : > { %1127 = vmatmul.mubr.msk.f32.vlgmr.msra.gmra.mrb[0].mxu1 %vm266_vm0, %v1121_v17 }
  0xee   : > { %v1135_v19 = vpop.f32.mrb[2].mxu0  ;;  %1186 = vmatpush3.bf16.msra.mxu1 %v1175_v3 }
  0xef   : > { %v495_v20 = vpop.f32.mrb[3].mxu0  ;;  %1192 = vmatprep.subr.bf16.mxu1 %v1175_v3 }
  0xf0   : > { %1140 = vmatprep.mubr.msk.f32.mxu1 %vm266_vm0, %v495_v20 }
  0xf1   : > { %1141 = vmatmul.mubr.msk.f32.vlgmr.msra.gmra.mrb[2].mxu1 %vm266_vm0, %v1135_v19 }
  0xf2   : > { %v1149_v21 = vpop.f32.mrb[4].mxu0  ;;  %1194 = vmatpush3.bf16.msra.mxu1 %v1175_v3 }
  0xf3   : > { %v653_v22 = vpop.f32.mrb[5].mxu0  ;;  %1200 = vmatprep.subr.bf16.mxu1 %v1175_v3 }
  0xf4   : > { %1154 = vmatprep.mubr.msk.f32.mxu1 %vm266_vm0, %v653_v22 }
  0xf5   : > { %1155 = vmatmul.mubr.msk.f32.vlgmr.msra.gmra.mrb[4].mxu1 %vm266_vm0, %v1149_v21 }
  0xf6   : > { %v1163_v23 = vpop.f32.mrb[6].mxu0  ;;  %1202 = vmatpush3.bf16.msra.mxu1 %v1175_v3 }
  0xf7   : > { %v811_v24 = vpop.f32.mrb[7].mxu0 }
  0xf8   : > { %1168 = vmatprep.mubr.msk.f32.mxu1 %vm266_vm0, %v811_v24 }
  0xf9   : > { %1169 = vmatmul.mubr.msk.f32.vlgmr.msra.gmra.mrb[6].mxu1 %vm266_vm0, %v1163_v23 }
 0x1c0   : > { %v1128_v25 = vpop.f32.mrb[0].mxu1 }
 0x1c1   : > { %v420_v26 = vpop.f32.mrb[1].mxu1  ;;  %v906_v35 = vmul.f32 %v1128_v25, %v1128_v25 }
 0x1c2   : > { %v905_v37 = vmul.f32 %v420_v26, %v420_v26 }
 0x1c4   : > { %v1142_v27 = vpop.f32.mrb[2].mxu1 }
 0x1c5   : > { %v902_v28 = vmul.f32 %v1142_v27, %v1128_v25  ;;  %v576_v29 = vpop.f32.mrb[3].mxu1 }
 0x1c6   : > { %v901_v30 = vmul.f32 %v576_v29, %v420_v26 }
 0x1c8   : > { %v1156_v31 = vpop.f32.mrb[4].mxu1 }
 0x1c9   : > { %v904_v32 = vsub.f32 %v1156_v31, %v902_v28  ;;  %v734_v33 = vpop.f32.mrb[5].mxu1 }
 0x1ca   : > { %v903_v34 = vsub.f32 %v734_v33, %v901_v30 }
 0x1cc   : > { %v1170_v36 = vpop.f32.mrb[6].mxu1 }
 0x1cd   : > { %v908_v38 = vsub.f32 %v1170_v36, %v906_v35  ;;  %v892_v39 = vpop.f32.mrb[7].mxu1 }
 0x1ce   : > { %v907_v40 = vsub.f32 %v892_v39, %v905_v37 }
 0x1cf   : > { %v910_v41 = vadd.f32 0.0001, %v908_v38 }
 0x1d0   : > { %v909_v42 = vadd.f32 0.0001, %v907_v40 }
 0x1d1   : > { %1211 = vrcp.f32 %v910_v41 }
 0x1d2   : > { %1213 = vrcp.f32 %v909_v42 }
 0x1db   : > { %v1212_v43 = vpop.eup %1211 }
 0x1dc   : > { %v1214_v44 = vpop.eup %1213  ;;  %v914_v45 = vmul.f32 %v1212_v43, %v904_v32 }
 0x1dd   : > { %v912_v46 = vmul.f32 %v1214_v44, %v903_v34 }
 0x1de   : > { %v916_v47 = vmul.f32 %v1128_v25, %v914_v45  ;;  %v1080_v48 = vpack.c.bf16 %v914_v45, %v914_v45 }
 0x1df   : > { %v915_v49 = vmul.f32 %v912_v46, %v420_v26  ;;  %v1079_v50 = vpack.c.bf16 %v912_v46, %v912_v46 }
 0x1e0   : > { %v918_v51 = vsub.f32 %v1142_v27, %v916_v47  ;;  %929 = vst.msk [vmem:[%s252_s13 + $0x4] sm:$0xf] %vm927_vm1, %v1080_v48 }
 0x1e1   : > { %v917_v52 = vsub.f32 %v576_v29, %v915_v49  ;;  %928 = vst.msk [vmem:[%s252_s13] sm:$0xf] %vm927_vm1, %v1079_v50 }
 0x1e2   : > { %v1082_v53 = vpack.c.bf16 %v918_v51, %v918_v51 }
 0x1e3   : > { %v1081_v54 = vpack.c.bf16 %v917_v52, %v917_v52 }
 0x1e4   : > { %939 = vst.msk [vmem:[%s257_s16 + $0x4] sm:$0xf] %vm927_vm1, %v1082_v53 }
 0x1e5   : > { %938 = vst.msk [vmem:[%s257_s16] sm:$0xf] %vm927_vm1, %v1081_v54 }
 0x1e6 PF: > { %s16_s18 = sadd.s32 1, %s1221_s18  }
 0x1e7   : > { %p13_p4 = scmp.ge.s32.totalorder %s16_s18, 5  }
 0x1e9   :  { %15 = sbr.rel (!%p13_p4) target bundleno = 1 (0x1), region = 81 }

// kernel: mefnet_forward.5
= control target key start
LH: loop header
LB: loop body
LE: loop exit
PB: predicated region body
PF: predicated region fallthrough
CT: control target
= control target key end

     0   :  { %11 = vsyncpa [#allocation4], 0  ;;  %s1410_s0 = inlined_call_operand.vmem [shape: bf16[16,96], index: 0, kind: input, shape index: {}]   ;;  %s1411_s1 = inlined_call_operand.vmem [shape: bf16[32,16], index: 1, kind: input, shape index: {}]   ;;  %s1412_s2 = inlined_call_operand.vmem [shape: bf16[16,32], index: 2, kind: input, shape index: {}]   ;;  %s1413_s3 = inlined_call_operand.vmem [shape: f32[3,32,32], index: 3, kind: input, shape index: {}]   ;;  %s1414_s4 = inlined_call_operand.hbm [shape: f32[32,32], index: 4, kind: output, shape index: {0}]   ;;  %s1415_s5 = inlined_call_operand.hbm [shape: f32[3,32,32], index: 5, kind: output, shape index: {1}]  }
   0x1   :  { %13 = vsyncpa [#allocation4 + $0x1], 0 }
   0x2   :  { %14 = vsyncpa [#allocation6], 0 }
   0x3   :  { %16 = vsyncpa [#allocation6 + $0x1], 0  ;;  %s1209_s18 = smov 0   ;;  %s1211_s19 = smov 0  }
   0x4   :  { %s1213_s20 = smov 0   ;;  %s1215_s21 = smov 0  }
   0x5 LB: > { %s1230_s22 = sadd.s32 4294967295, %s1160_s21   ;;  %s918_s23 = sadd.s32 4294967294, %s1160_s21   ;;  %s1160_s21 = sphi %s1215_s21, %s1421_s21   ;;  %s1156_s20 = sphi %s1213_s20, %s1420_s20   ;;  %s1152_s19 = sphi %s1211_s19, %s1419_s19   ;;  %s1148_s18 = sphi %s1209_s18, %s1418_s18  }
   0x6   : > { %s1234_s24 = sadd.s32 1, %s1160_s21   ;;  %s97_s25 = sadd.s32 1, %s1156_s20 }
   0x7   : > { %s94_s26 = ssub.s32 %s1160_s21, %s1234_s24  ;;  %p104_p0 = scmp.ne.s32.totalorder %s1156_s20, %s1152_s19 }
   0x8   : > { %p95_p1 = scmp.eq.s32.totalorder %s94_s26, 0  ;;  %p105_p2 = scmp.eq.s32.totalorder %s1160_s21, 0 }
   0x9   : > { %p134_p3 = scmp.eq.s32.totalorder %s1230_s22, 1  ;;  %p139_p4 = scmp.ne.s32.totalorder %s1152_s19, %s1148_s18 }
   0xa   : > { %s1246_s27 = scalar_select %p95_p1, %s1156_s20, %s97_s25  }
   0xb   : > { %p106_p5 = por %p105_p2, %p104_p0  ;;  %p1248_p6 = por %p134_p3, %p104_p0 }
   0xc   : > { %p140_p7 = scmp.eq.s32.totalorder %s918_s23, 1  ;;  %p920_p9 = scmp.ge.s32.totalorder %s1160_s21, 2 }
   0xe   : > { %p1252_p8 = por %p140_p7, %p139_p4  ;;  %188 = sbr.rel (%p920_p9) target bundleno = 28 (0x1c), region = 24 }
  0x15   : > { %200 = sbr.rel (!%p106_p5) target bundleno = 28 (0x1c), region = 32  ;;  %s202_s30 = sand.u32 (%p106_p5), 1, %s1156_s20  }
  0x16   : > { %s960_s6 = sshll.u32 (%p106_p5), %s1160_s21, 4  ;;  %s1019_s7 = smul.u32 (%p106_p5), 48, %s202_s30 }
  0x17   : > { %s207_s10 = scalar_lea.vmem (%p106_p5), %s1413_s3, %s960_s6 }
  0x18   : > { %v245_v0 = vld [vmem:[%s207_s10] sm:$0xff] (%p106_p5)  ;;  %v247_v1 = vld [vmem:[%s207_s10 + $0x8] sm:$0xff] (%p106_p5)  ;;  %s204_s11 = scalar_lea.vmem (%p106_p5), [#allocation2], %s1019_s7 }
  0x19   : > { %v249_v2 = vld [vmem:[%s207_s10 + $0x20] sm:$0xff] (%p106_p5)  ;;  %v251_v3 = vld [vmem:[%s207_s10 + $0x28] sm:$0xff] (%p106_p5)  ;;  %246 = vst [vmem:[%s204_s11] sm:$0xff] (%p106_p5), %v245_v0  ;;  %248 = vst [vmem:[%s204_s11 + $0x8] sm:$0xff] (%p106_p5), %v247_v1 }
  0x1a   : > { %v253_v4 = vld [vmem:[%s207_s10 + $0x40] sm:$0xff] (%p106_p5)  ;;  %v255_v5 = vld [vmem:[%s207_s10 + $0x48] sm:$0xff] (%p106_p5)  ;;  %250 = vst [vmem:[%s204_s11 + $0x10] sm:$0xff] (%p106_p5), %v249_v2  ;;  %252 = vst [vmem:[%s204_s11 + $0x18] sm:$0xff] (%p106_p5), %v251_v3 }
  0x1b   : > { %254 = vst [vmem:[%s204_s11 + $0x20] sm:$0xff] (%p106_p5), %v253_v4  ;;  %256 = vst [vmem:[%s204_s11 + $0x28] sm:$0xff] (%p106_p5), %v255_v5 }
  0x1c PF: > { %p923_p10 = scmp.ge.s32.totalorder %s1160_s21, 1  ;;  %p261_p11 = scmp.lt.s32.totalorder %s1160_s21, 3 }
  0x1e   : > { %p262_p12 = pnand %p923_p10, %p261_p11 }
  0x1f   : > { %v1087_v6 = vld [vmem:[%s1410_s0] sm:$0xff] (!%p262_p12)   ;;  %v1162_v7 = vmov (!%p262_p12), 0.0   ;;  %s925_s14 = sshll.u32 (!%p262_p12), %s1230_s22, 1  ;;  %vm1163_vm0 = vmmov (!%p262_p12), 0   ;;  %vm330_vm1 = vcmask (!%p262_p12), 130048   ;;  %s1164_s30 = smov (!%p262_p12), 64  }
  0x20   : > { %265 = sbr.rel (%p262_p12) target bundleno = 654 (0x28e), region = 70  ;;  %977 = vmatprep.subr.bf16.mxu0 (!%p262_p12), %v1162_v7  ;;  %983 = vmatprep.subr.bf16.mxu1 (!%p262_p12), %v1162_v7  ;;  %p306_p13 = scmp.lt.s32.totalorder (!%p262_p12), %s925_s14, 3  ;;  %v1089_v9 = vld [vmem:[%s1412_s2] sm:$0xff] (!%p262_p12)   ;;  %vm485_vm2 = vcmask (!%p262_p12), 261120  }
  0x21   : > { %978 = vmatpush3.bf16.msra.mxu0 (!%p262_p12), %v1087_v6  ;;  %979 = vmatprep.mubr.msk.bf16.mxu0 (!%p262_p12), %vm1163_vm0, %v1162_v7  ;;  %s1165_s6 = smov (!%p262_p12), 80   ;;  %s1166_s7 = smov (!%p262_p12), 96  }
  0x22   : > { %985 = vmatprep.mubr.msk.bf16.mxu1 (!%p262_p12), %vm1163_vm0, %v1162_v7  ;;  %989 = vmatprep.subr.bf16.mxu0 (!%p262_p12), %v1162_v7  ;;  %s1167_s8 = smov (!%p262_p12), 112   ;;  %s1168_s9 = smov (!%p262_p12), 48  }
  0x23   : > { %984 = vmatpush3.bf16.msra.mxu1 (!%p262_p12), %v1089_v9  ;;  %s1283_s10 = sand.u32 (!%p262_p12), 1, %s1152_s19  }
  0x24   : > { %995 = vmatprep.subr.bf16.mxu1 (!%p262_p12), %v1162_v7  ;;  %s1020_s11 = smul.u32 (!%p262_p12), 48, %s1283_s10 }
  0x26   : > { %s1294_s12 = scalar_lea.vmem (!%p262_p12), [#allocation2], %s1020_s11  ;;  %s1300_s13 = scalar_lea.vmem (!%p262_p12), [#allocation5], %s1020_s11 }
  0x27   : > { %s1423_s14 = smov (!%p306_p13, %s925_s14), 3  ;;  %v475_v24 = vld [vmem:[%s1294_s12] sm:$0xff]  ;;  %v476_v25 = vld [vmem:[%s1294_s12 + $0x8] sm:$0xff]  ;;  %v935_v36 = vld [vmem:[%s1294_s12 + $0x10] sm:$0xff] }
  0x28   : > { %s926_s15 = sshll.u32 %s1423_s14, 2  ;;  %v936_v41 = vld [vmem:[%s1294_s12 + $0x18] sm:$0xff]  ;;  %v941_v54 = vld [vmem:[%s1294_s12 + $0x20] sm:$0xff]  ;;  %v942_v58 = vld [vmem:[%s1294_s12 + $0x28] sm:$0xff]  ;;  %s924_s14 = sshll.u32 %s1283_s10, 4 }
  0x29   : > { %s309_s23 = scalar_lea.vmem %s1411_s1, %s926_s15  ;;  %s961_s15 = sshll.u32 %s1230_s22, 8 }
  0x2a   : > { %v1088_v8 = vld [vmem:[%s309_s23] sm:$0xff]   ;;  %s297_s16 = scalar_lea.vmem [#allocation3], %s924_s14  ;;  %s1341_s26 = scalar_lea.hbm %s1414_s4, %s961_s15 }
  0x2b   : > { %980 = vmatmul.mubr.msk.bf16.vlgmr.msra.gmra.mrb[0].mxu0 %vm330_vm1, %v1088_v8  ;;  %s761_s17 = sshll.u32 %s297_s16, 4  ;;  %s1343_s17 = int_to_ptr.vmem [resolvable:$true] %s761_s17 }
  0x2c   : > { %991 = vmatprep.mubr.msk.bf16.mxu0 %vm1163_vm0, %v1162_v7  ;;  %990 = vmatpush3.bf16.msra.mxu0 %v1089_v9 }
  0x2d   : > { %1001 = vmatprep.subr.bf16.mxu0 %v1162_v7 }
  0xfe   : > { %v368_v10 = vpop.f32.mrb[0].mxu0 }
  0xff   : > { %v981_v11 = vpop.f32.mrb[1].mxu0 }
 0x100   : > { %v371_v12 = vpop.f32.mrb[2].mxu0 }
 0x101   : > { %v377_v13 = vpack.c.bf16 %v371_v12, %v368_v10  ;;  %v982_v14 = vpop.f32.mrb[3].mxu0 }
 0x103   : > { %536 = vrot.lane.b32.xlu1 %v377_v13, %s1164_s30  ;;  %429 = vrot.lane.b32.xlu0 %v377_v13, %s1165_s6  ;;  %s743_s30 = scalar_lea.sflag [#allocation4], %s1283_s10  ;;  %s1094_s6 = scalar_lea.vmem %s1343_s17, 256 }
 0x104   : > { %986 = vmatmul.mubr.msk.bf16.vlgmr.msra.gmra.mrb[0].mxu1 %vm330_vm1, %v377_v13  ;;  %p1095_p0 = scmp.ne.s32.totalorder %s1343_s17, %s1094_s6 }
 0x105   : > { %996 = vmatpush3.bf16.msra.mxu1 %v1089_v9  ;;  %997 = vmatprep.mubr.msk.bf16.mxu1 %vm1163_vm0, %v1162_v7 }
 0x106   : > { %1007 = vmatprep.subr.bf16.mxu1 %v1162_v7  ;;  %p1096_p1 = pnand %p1095_p0, %p1248_p6 }
 0x107   : > { %602 = vrot.lane.b32.xlu1 %v377_v13, %s1166_s7  ;;  %490 = vrot.lane.b32.xlu0 %v377_v13, %s1167_s8  ;;  %s1169_s7 = smov [#allocation3]  }
 0x108   : > { %p1097_p2 = pneg %p1096_p1  ;;  %s1098_s8 = sshll.u32 %s1169_s7, 4  ;;  %s1099_s8 = int_to_ptr.vmem [resolvable:$false] %s1098_s8 }
 0x109   : > { %p1101_p3 = scmp.lt.s32.totalorder %s1343_s17, %s1099_s8 }
 0x10b   : > { %648 = vrot.lane.b32.xlu0 %v377_v13, %s1168_s9  ;;  %s1100_s9 = scalar_lea.vmem %s1099_s8, 512 }
 0x10c   : > { %p1102_p4 = scmp.lt.s32.totalorder %s1100_s9, %s1094_s6 }
 0x10e   : > { %p1103_p5 = por %p1102_p4, %p1101_p3 }
 0x110   : > { %p1104_p7 = pnand %p1103_p5, %p1097_p2 }
 0x175   : > { %v430_v15 = vpop.permute.xlu0 %429  ;;  %v537_v17 = vpop.permute.xlu1 %536 }
 0x176   : > { %992 = vmatmul.mubr.msk.bf16.vlgmr.msra.gmra.mrb[4].mxu0 %vm330_vm1, %v430_v15 }
 0x177   : > { %1002 = vmatpush3.bf16.msra.mxu0 %v1089_v9  ;;  %1003 = vmatprep.mubr.msk.bf16.mxu0 %vm1163_vm0, %v1162_v7 }
 0x178   : > { %1013 = vmatprep.subr.bf16.mxu0 %v1162_v7 }
 0x179   : > { %v491_v16 = vpop.permute.xlu0 %490  ;;  %v603_v18 = vpop.permute.xlu1 %602 }
 0x17a   : > { %998 = vmatmul.mubr.msk.bf16.vlgmr.msra.gmra.mrb[4].mxu1 %vm330_vm1, %v491_v16 }
 0x17b   : > { %1008 = vmatpush3.bf16.msra.mxu1 %v1089_v9  ;;  %1009 = vmatprep.mubr.msk.bf16.mxu1 %vm1163_vm0, %v1162_v7 }
 0x17d   : > { %v649_v19 = vpop.permute.xlu0 %648 }
 0x17e   : > { %1004 = vmatmul.mubr.msk.bf16.vlgmr.msra.gmra.mrb[8].mxu0 %vm330_vm1, %v537_v17 }
 0x17f   : > { %1014 = vmatpush3.bf16.msra.mxu0 %v1089_v9  ;;  %1015 = vmatprep.mubr.msk.bf16.mxu0 %vm1163_vm0, %v1162_v7 }
 0x182   : > { %1010 = vmatmul.mubr.msk.bf16.vlgmr.msra.gmra.mrb[8].mxu1 %vm330_vm1, %v603_v18 }
 0x186   : > { %1016 = vmatmul.mubr.msk.bf16.vlgmr.msra.gmra.mrb[12].mxu0 %vm330_vm1, %v649_v19 }
 0x1d7   : > { %v421_v20 = vpop.f32.mrb[0].mxu1 }
 0x1d8   : > { %v987_v21 = vpop.f32.mrb[1].mxu1  ;;  %v477_v26 = vmul.f32 %v475_v24, %v421_v20 }
 0x1d9   : > { %v424_v22 = vpop.f32.mrb[2].mxu1 }
 0x1da   : > { %v988_v23 = vpop.f32.mrb[3].mxu1  ;;  %v478_v28 = vmul.f32 %v476_v25, %v424_v22 }
 0x249   : > { %v468_v27 = vpop.f32.mrb[4].mxu0 }
 0x24a   : > { %v479_v29 = vadd.f32 %v477_v26, %v468_v27  ;;  %v993_v30 = vpop.f32.mrb[5].mxu0 }
 0x24b   : > { %v471_v31 = vpop.f32.mrb[6].mxu0 }
 0x24c   : > { %v481_v32 = vand.u32 2147483647, %v479_v29  ;;  %v480_v33 = vadd.f32 %v478_v28, %v471_v31  ;;  %v994_v34 = vpop.f32.mrb[7].mxu0 }
 0x24d   : > { %v529_v35 = vpop.f32.mrb[4].mxu1 }
 0x24e   : > { %v483_v37 = vadd.f32 1e-08, %v481_v32  ;;  %v482_v38 = vand.u32 2147483647, %v480_v33  ;;  %v999_v39 = vpop.f32.mrb[5].mxu1  ;;  %v585_v43 = vmul.f32 %v935_v36, %v529_v35 }
 0x24f   : > { %v532_v40 = vpop.f32.mrb[6].mxu1 }
 0x250   : > { %486 = vst.msk [vmem:[%s1300_s13] sm:$0xff] %vm485_vm2, %v483_v37  ;;  %v484_v42 = vadd.f32 1e-08, %v482_v38  ;;  %v1000_v44 = vpop.f32.mrb[7].mxu1  ;;  %v586_v46 = vmul.f32 %v936_v41, %v532_v40  ;;  %v488_v59 = vmul.f32 %v483_v37, %v475_v24 }
 0x251   : > { %v575_v45 = vpop.f32.mrb[8].mxu0 }
 0x252   : > { %487 = vst.msk [vmem:[%s1300_s13 + $0x8] sm:$0xff] %vm485_vm2, %v484_v42  ;;  %v587_v47 = vadd.f32 %v585_v43, %v575_v45  ;;  %v1005_v48 = vpop.f32.mrb[9].mxu0  ;;  %v489_v2 = vmul.f32 %v484_v42, %v476_v25 }
 0x253   : > { %v578_v49 = vpop.f32.mrb[10].mxu0 }
 0x254   : > { %v589_v50 = vand.u32 2147483647, %v587_v47  ;;  %v588_v51 = vadd.f32 %v586_v46, %v578_v49  ;;  %v1006_v52 = vpop.f32.mrb[11].mxu0 }
 0x255   : > { %v641_v53 = vpop.f32.mrb[8].mxu1 }
 0x256   : > { %v591_v55 = vadd.f32 1e-08, %v589_v50  ;;  %v590_v56 = vand.u32 2147483647, %v588_v51  ;;  %v1011_v57 = vpop.f32.mrb[9].mxu1  ;;  %v697_v0 = vmul.f32 %v941_v54, %v641_v53 }
 0x257   : > { %v644_v60 = vpop.f32.mrb[10].mxu1  ;;  %v724_v25 = vld [vmem:[%s1300_s13] sm:$0xff] }
 0x258   : > { %937 = vst.msk [vmem:[%s1300_s13 + $0x10] sm:$0xff] %vm485_vm2, %v591_v55  ;;  %v596_v61 = vadd.f32 %v591_v55, %v483_v37  ;;  %v598_v62 = vmul.f32 %v935_v36, %v591_v55  ;;  %v592_v63 = vadd.f32 1e-08, %v590_v56  ;;  %v1012_v1 = vpop.f32.mrb[11].mxu1  ;;  %v698_v3 = vmul.f32 %v942_v58, %v644_v60 }
 0x259   : > { %v687_v4 = vpop.f32.mrb[12].mxu0  ;;  %v725_v33 = vld [vmem:[%s1300_s13 + $0x8] sm:$0xff] }
 0x25a   : > { %v600_v5 = vadd.f32 %v598_v62, %v488_v59  ;;  %938 = vst.msk [vmem:[%s1300_s13 + $0x18] sm:$0xff] %vm485_vm2, %v592_v63  ;;  %v597_v6 = vadd.f32 %v592_v63, %v484_v42  ;;  %v599_v7 = vmul.f32 %v936_v41, %v592_v63  ;;  %v699_v8 = vadd.f32 %v697_v0, %v687_v4  ;;  %v1017_v9 = vpop.f32.mrb[13].mxu0 }
 0x25b   : > { %v690_v10 = vpop.f32.mrb[14].mxu0 }
 0x25c   : > { %v601_v11 = vadd.f32 %v599_v7, %v489_v2  ;;  %v701_v12 = vand.u32 2147483647, %v699_v8  ;;  %v700_v13 = vadd.f32 %v698_v3, %v690_v10  ;;  %v1018_v14 = vpop.f32.mrb[15].mxu0 }
 0x25e   : > { %v703_v15 = vadd.f32 1e-08, %v701_v12  ;;  %v702_v16 = vand.u32 2147483647, %v700_v13 }
 0x25f   : > { %v945_v26 = vld [vmem:[%s1300_s13 + $0x10] sm:$0xff] }
 0x260   : > { %943 = vst.msk [vmem:[%s1300_s13 + $0x20] sm:$0xff] %vm485_vm2, %v703_v15  ;;  %v708_v17 = vadd.f32 %v703_v15, %v596_v61  ;;  %v710_v18 = vmul.f32 %v941_v54, %v703_v15  ;;  %v704_v19 = vadd.f32 1e-08, %v702_v16 }
 0x261   : > { %v946_v34 = vld [vmem:[%s1300_s13 + $0x18] sm:$0xff] }
 0x262   : > { %v712_v20 = vadd.f32 %v710_v18, %v600_v5  ;;  %1090 = vrcp.f32 %v708_v17  ;;  %944 = vst.msk [vmem:[%s1300_s13 + $0x28] sm:$0xff] %vm485_vm2, %v704_v19  ;;  %v709_v21 = vadd.f32 %v704_v19, %v597_v6  ;;  %v711_v22 = vmul.f32 %v942_v58, %v704_v19 }
 0x264   : > { %v713_v23 = vadd.f32 %v711_v22, %v601_v11  ;;  %1092 = vrcp.f32 %v709_v21 }
 0x267   : > { %v949_v27 = vld [vmem:[%s1300_s13 + $0x20] sm:$0xff] }
 0x269   : > { %v950_v39 = vld [vmem:[%s1300_s13 + $0x28] sm:$0xff] }
 0x26c   : > { %v1091_v24 = vpop.eup %1090 }
 0x26d   : > { %v716_v28 = vmul.f32 %v1091_v24, %v712_v20  ;;  %v726_v29 = vmul.f32 %v1091_v24, %v724_v25  ;;  %v732_v30 = vmul.f32 %v1091_v24, %v945_v26  ;;  %v738_v31 = vmul.f32 %v1091_v24, %v949_v27 }
 0x26e   : > { %v1093_v32 = vpop.eup %1092 }
 0x26f   : > { %v718_v35 = vmax.f32 %v716_v28, 0.0  ;;  %728 = vst.msk [vmem:[%s1300_s13] sm:$0xff] %vm485_vm2, %v726_v29  ;;  %947 = vst.msk [vmem:[%s1300_s13 + $0x10] sm:$0xff] %vm485_vm2, %v732_v30  ;;  %v717_v36 = vmul.f32 %v1093_v32, %v713_v23  ;;  %v727_v37 = vmul.f32 %v1093_v32, %v725_v33  ;;  %v733_v38 = vmul.f32 %v1093_v32, %v946_v34 }
 0x270   : > { %951 = vst.msk [vmem:[%s1300_s13 + $0x20] sm:$0xff] %vm485_vm2, %v738_v31  ;;  %v739_v40 = vmul.f32 %v1093_v32, %v950_v39 }
 0x271   : > { %v720_v41 = vmin.f32 %v718_v35, 1.0  ;;  %v719_v42 = vmax.f32 %v717_v36, 0.0  ;;  %729 = vst.msk [vmem:[%s1300_s13 + $0x8] sm:$0xff] %vm485_vm2, %v727_v37  ;;  %948 = vst.msk [vmem:[%s1300_s13 + $0x18] sm:$0xff] %vm485_vm2, %v733_v38 }
 0x272   : > { %952 = vst.msk [vmem:[%s1300_s13 + $0x28] sm:$0xff] %vm485_vm2, %v739_v40 }
 0x273   : > { %v721_v43 = vmin.f32 %v719_v42, 1.0  ;;  %722 = vst.msk [vmem:[%s297_s16] sm:$0xff] %vm485_vm2, %v720_v41 }
 0x275   : > { %723 = vst.msk [vmem:[%s297_s16 + $0x8] sm:$0xff] %vm485_vm2, %v721_v43 }
 0x276   : > { %1107 = shalt.err (!%p1104_p7)
}
 0x277   : > { %s1108_s11 = scalar_lea.hbm %s1341_s26, 256  ;;  %s1112_s16 = scalar_lea.hbm %s1414_s4, 512 }
 0x278   : > { %p1109_p10 = scmp.ne.s32.totalorder %s1341_s26, %s1108_s11  ;;  %p1113_p13 = scmp.lt.u32.totalorder %s1341_s26, %s1414_s4 }
 0x279   : > { %p1114_p0 = scmp.lt.u32.totalorder %s1112_s16, %s1108_s11  ;;  %p1116_p2 = scmp.lt.u32.totalorder %s1108_s11, %s1341_s26 }
 0x27a   : > { %p1110_p11 = pnand %p1109_p10, %p1248_p6 }
 0x27b   : > { %p1115_p1 = por %p1114_p0, %p1113_p13 }
 0x27c   : > { %p1111_p12 = pneg %p1110_p11 }
 0x27d   : > { %p1117_p3 = por %p1116_p2, %p1115_p1 }
 0x27f   : > { %p1118_p4 = pnand %p1117_p3, %p1111_p12 }
 0x281   : > { %1121 = shalt.err (!%p1118_p4)
}
 0x282   : > { %s1170_s6 = smov 128   ;;  %s1171_s7 = smov 8  }
 0x283   : > { %1021 = dma.vmem_to_hbm [thread:$0]  (%p1248_p6), %s1343_s17, 256, %s1341_s26, %s743_s30, %s1170_s6, %s1170_s6, %s1171_s7  }
 0x284   : > { %s748_s8 = scalar_lea.sflag [#allocation6], %s1283_s10 }
 0x285   : > { %s776_s11 = scalar_lea.hbm %s1415_s5, %s961_s15  ;;  %s793_s14 = sshll.u32 %s1300_s13, 4  ;;  %s794_s14 = int_to_ptr.vmem [resolvable:$true] %s793_s14 }
 0x286   : > { %s1172_s16 = smov 256   ;;  %s1173_s10 = smov 512  }
 0x287   : > { %1022 = sst [smem:[#allocation8]] (%p1248_p6), %s1172_s16  ;;  %s1174_s22 = smov 2  }
 0x288   : > { %1023 = sst [smem:[#allocation8 + $0x1]] (%p1248_p6), %s1173_s10  ;;  %s1175_s17 = smov 128  }
 0x289   : > { %1024 = sst [smem:[#allocation8 + $0x2]] (%p1248_p6), %s1174_s22  ;;  %s1176_s26 = smov 8  }
 0x28a   : > { %1025 = sst [smem:[#allocation8 + $0x3]] (%p1248_p6), %s1175_s17  ;;  %s1177_s15 = smov [#allocation7]  }
 0x28b   : > { %1026 = sst [smem:[#allocation8 + $0x4]] (%p1248_p6), %s1175_s17  ;;  %s1178_s13 = smov 0  }
 0x28c   : > { %1027 = sst [smem:[#allocation8 + $0x5]] (%p1248_p6), %s1176_s26 }
 0x28d   : > { %1028 = dma.general (%p1248_p6), %s794_s14, 768, %s776_s11, %s748_s8, %s1177_s15, [#allocation8], %s1178_s13, 0  }
 0x28e PF: > { %s821_s30 = sand.u32 1, %s1148_s18   ;;  %p1032_p5 = pnand %p920_p9, %p1252_p8 }
 0x28f   : > { %s822_s23 = scalar_lea.sflag [#allocation4], %s821_s30 }
 0x290   : > { %1139 = dma.done.wait (!%p1032_p5), %s822_s23, 256  }
 0x291   : > { %1141 = vsyncadd (!%p1032_p5), %s822_s23, 4294967040  ;;  %s831_s25 = scalar_lea.sflag [#allocation6], %s821_s30 }
 0x292   : > { %1143 = dma.done.wait (!%p1032_p5), %s831_s25, 768  }
 0x293   : > { %1145 = vsyncadd (!%p1032_p5), %s831_s25, 4294966528  ;;  %p19_p6 = scmp.ge.s32.totalorder %s1234_s24, 4   ;;  %s1418_s18 = smov %s1152_s19 }
 0x294   : > { %s1419_s19 = smov %s1156_s20  ;;  %s1420_s20 = smov %s1246_s27 }
 0x295   : > { %s1421_s21 = smov %s1234_s24  ;;  %21 = sbr.rel (!%p19_p6) target bundleno = 5 (0x5), region = 143 }
 0x29c   :  { %836 = vsyncpa [#allocation4], 1 }
 0x29d   :  { %838 = vsyncpa [#allocation4 + $0x1], 1 }
 0x29e   :  { %839 = vsyncpa [#allocation6], 1 }
 0x29f   :  { %841 = vsyncpa [#allocation6 + $0x1], 1 }

// kernel: mefnet_forward.3
= control target key start
LH: loop header
LB: loop body
LE: loop exit
PB: predicated region body
PF: predicated region fallthrough
CT: control target
= control target key end

     0   :  { %s6671_s0 = inlined_call_operand.vmem [shape: f32[3,1,256], index: 0, kind: input, shape index: {}]   ;;  %s6672_s1 = inlined_call_operand.vmem [shape: s32[2,1,256], index: 1, kind: input, shape index: {}]   ;;  %s6673_s2 = inlined_call_operand.vmem [shape: bf16[24,9], index: 2, kind: input, shape index: {}]   ;;  %s6674_s3 = inlined_call_operand.vmem [shape: bf16[5,24,216], index: 3, kind: input, shape index: {}]   ;;  %s6675_s4 = inlined_call_operand.vmem [shape: f32[6,24,1], index: 4, kind: input, shape index: {}]   ;;  %s6676_s5 = inlined_call_operand.vmem [shape: f32[6,24,1], index: 5, kind: input, shape index: {}]   ;;  %s6677_s6 = inlined_call_operand.vmem [shape: f32[6,2], index: 6, kind: input, shape index: {}]   ;;  %s6678_s7 = inlined_call_operand.vmem [shape: f32[1,24], index: 7, kind: input, shape index: {}]   ;;  %s6679_s8 = inlined_call_operand.<no memory space> [shape: f32[1], index: 8, kind: input, shape index: {}]   ;;  %s6680_s9 = inlined_call_operand.vmem [shape: f32[3,1,256], index: 9, kind: output, shape index: {}]  }
   0x1   :  { %14 = sst [smem:[#allocation3]] %s6679_s8 }
   0x2   :  { %15 = vsyncpa [#allocation5], 0  ;;  %s4405_s11 = smov 0  }
   0x3 LB: > { %s3785_s12 = sadd.s32 4294967295, %s4320_s11   ;;  %p3787_p0 = scmp.ge.s32.totalorder %s4320_s11, 1  ;;  %s4320_s11 = sphi %s4405_s11, %s21_s11  }
   0x4   : > { %p246_p1 = scmp.lt.s32.totalorder %s4320_s11, 4  ;;  %s274_s15 = sshll.u32 %s6677_s6, 4  ;;  %s275_s15 = int_to_ptr.vmem [resolvable:$true] %s274_s15 }
   0x5   : > { %p3902_p3 = scmp.eq.s32.totalorder %s3785_s12, 0  ;;  %s4295_s16 = scalar_lea.vmem %s275_s15, 128 }
   0x6   : > { %p4416_p2 = pnand %p3787_p0, %p246_p1  ;;  %p4296_p6 = scmp.ne.s32.totalorder %s275_s15, %s4295_s16 }
   0x7   : > { %p4303_p10 = scmp.lt.s32.totalorder %s275_s15, %s275_s15  ;;  %p4304_p11 = scmp.lt.s32.totalorder %s4295_s16, %s4295_s16 }
   0x8   : > { %p3898_p4 = pneg %p4416_p2 }
   0x9   : > { %p4305_p12 = por %p4304_p11, %p4303_p10 }
   0xa   : > { %p3899_p5 = pnand %p3902_p3, %p3898_p4 }
   0xc   : > { %p4297_p7 = pneg %p3899_p5 }
   0xe   : > { %p4298_p8 = pnand %p4297_p7, %p4296_p6 }
  0x10   : > { %p4299_p9 = pneg %p4298_p8 }
  0x12   : > { %p4306_p13 = pnand %p4305_p12, %p4299_p9 }
  0x14   : > { %4309 = shalt.err (!%p4306_p13)
}
  0x15   : > { %s4322_s17 = smov [#allocation4]   ;;  %300 = sbr.rel (%p4416_p2) target bundleno = 3661 (0xe4d), region = 56 }
  0x16   : > { %3901 = dma.vmem_to_smem (!%p3899_p5), %s275_s15, 128, %s4322_s17, [#allocation5]  }
  0x1c   : > { %4315 = dma.done.wait (%p3902_p3), [#allocation5], 128  }
  0x1d   : > { %4317 = vsyncadd (%p3902_p3), [#allocation5], 4294967168 }
  0x1e   : > { %306 = sfence }
  0x1f   : > { %p335_p0 = scmp.lt.s32.totalorder %s3785_s12, 2  ;;  %v381_v0 = vlaneseq  ;;  %v6704_v5 = vmov 0  ;;  %s4323_s22 = smov 16   ;;  %v4331_v8 = vmov 0   ;;  %v755_v9 = vld [vmem:[%s6675_s4] sm:$0xff] }
  0x20   : > { %s4324_s23 = smov 17   ;;  %s4325_s24 = smov 15   ;;  %697 = vmatprep.mubr.bf16.mxu0 %v4331_v8  ;;  %3940 = vset.pattern.permute.xlu1 %v4331_v8  ;;  %v4332_v10 = vmov 1966171168   ;;  %v4474_v16 = vld [vmem:[%s6672_s1] sm:$0x3] }
  0x21   : > { %s6916_s12 = smov (!%p335_p0, %s3785_s12), 2  ;;  %v382_v1 = vshrl.u32 %v381_v0, 7  ;;  %vm4439_vm0 = vcmp.lt.s32.totalorder %v381_v0, 256  ;;  %s4326_s25 = smov 1   ;;  %3941 = vset.pattern.permute.xlu0 %v4331_v8  ;;  %v404_v11 = vunpack.c.l.s4 %v4332_v10  ;;  %v4469_v12 = vand.u32 127, %v381_v0 }
  0x22   : > { %s3792_s18 = sshll.u32 %s6916_s12, 1  ;;  %v6705_v5 = vsel %vm4439_vm0, 4294967295, %v6704_v5  ;;  %s4327_s26 = smov 127   ;;  %v4481_v17 = vld [vmem:[%s6672_s1 + $0x2] sm:$0x3]  ;;  %vm6692_vm3 = vcmp.ge.s32.totalorder %v4474_v16, 1 }
  0x23   : > { %v4430_v2 = vsub.s32 0, %v382_v1  ;;  %s338_s21 = scalar_lea.vmem %s6671_s0, %s3792_s18  ;;  %v4437_v3 = vsub.s32 1, %v382_v1  ;;  %s4328_s27 = smov 113   ;;  %v405_v15 = vunpack.c.0.s8 %v404_v11  ;;  %vm6690_vm1 = vcmp.lt.s32.totalorder %v4469_v12, 16 }
  0x24   : > { %v379_v4 = vld [vmem:[%s338_s21] sm:$0x3]  ;;  %s4329_s28 = smov 112   ;;  %s4330_s29 = smov 111   ;;  %vm6691_vm2 = vcmp.lt.s32.totalorder %v4469_v12, 17  ;;  %vm6689_vm4 = vcmp.ge.s32.totalorder %v4481_v17, 1 }
  0x25   : > { %v384_v6 = vrot.slane %v379_v4, %v4430_v2  ;;  %513 = vst.msk [vmem:[#allocation2 + $0x4] ss:$8 sm:$0x3] %vm4439_vm0, %v379_v4  ;;  %v388_v7 = vrot.slane %v379_v4, %v4437_v3  ;;  %v4484_v18 = vsub.s32 %v405_v15, %v382_v1  ;;  %vm6687_vm5 = vcmp.lt.s32.totalorder %v4469_v12, 15  ;;  %vm4502_vm6 = vmand %vm6692_vm3, %vm6689_vm4  ;;  %s821_s20 = sld [smem:[#allocation4]]  ;;  %s3799_s21 = sld [smem:[#allocation4 + $0x1]] }
  0x26   : > { %vm6686_vm7 = vcmp.lt.s32.totalorder %v4469_v12, 1  ;;  %vm6688_vm8 = vcmp.lt.s32.totalorder %v4481_v17, 15  ;;  %vm6685_vm10 = vcmp.lt.s32.totalorder %v4469_v12, 127  ;;  %vm6683_vm11 = vcmp.lt.s32.totalorder %v4469_v12, 113  ;;  %s4334_s30 = smov 32   ;;  %s4335_s10 = smov 34  }
  0x27   : > { %425 = vrot.lane.b32.xlu1 %v384_v6, %s4323_s22  ;;  %391 = vrot.lane.b32.xlu0 %v384_v6, %s4324_s23  ;;  %vm4527_vm9 = vmand %vm6692_vm3, %vm6688_vm8  ;;  %vm6684_vm12 = vcmp.lt.s32.totalorder %v4474_v16, 15  ;;  %vm6681_vm13 = vcmp.lt.s32.totalorder %v4469_v12, 112  ;;  %vm6682_vm15 = vcmp.lt.s32.totalorder %v4469_v12, 111  ;;  %s4336_s13 = smov 30   ;;  %s4337_s14 = smov 2  }
  0x28   : > { %vm4569_vm14 = vmand %vm6684_vm12, %vm6689_vm4  ;;  %s4338_s15 = smov 126   ;;  %s4339_s8 = smov 98  }
  0x29   : > { %s4340_s16 = smov 96   ;;  %s4341_s17 = smov 94  }
  0x2a   : > { %s4345_s19 = smov 60  }
  0x2b   : > { %427 = vrot.lane.b32.xlu1 %v388_v7, %s4323_s22  ;;  %393 = vrot.lane.b32.xlu0 %v388_v7, %s4324_s23 }
  0x2f   : > { %456 = vrot.lane.b32.xlu1 %v388_v7, %s4325_s24  ;;  %454 = vrot.lane.b32.xlu0 %v384_v6, %s4325_s24 }
  0x33   : > { %485 = vrot.lane.b32.xlu1 %v388_v7, %s4326_s25  ;;  %483 = vrot.lane.b32.xlu0 %v384_v6, %s4326_s25 }
  0x37   : > { %517 = vrot.lane.b32.xlu1 %v388_v7, %s4327_s26  ;;  %515 = vrot.lane.b32.xlu0 %v384_v6, %s4327_s26 }
  0x3b   : > { %546 = vrot.lane.b32.xlu1 %v388_v7, %s4328_s27  ;;  %544 = vrot.lane.b32.xlu0 %v384_v6, %s4328_s27 }
  0x3f   : > { %575 = vrot.lane.b32.xlu1 %v388_v7, %s4329_s28  ;;  %573 = vrot.lane.b32.xlu0 %v384_v6, %s4329_s28 }
  0x43   : > { %604 = vrot.lane.b32.xlu1 %v388_v7, %s4330_s29  ;;  %602 = vrot.lane.b32.xlu0 %v384_v6, %s4330_s29  ;;  %v6867_v6 = vmov 0 }
  0x47   : > { %778 = vperm.xlu1 %3940, %v755_v9  }
  0x99   : > { %v426_v13 = vpop.permute.xlu1 %425  ;;  %v392_v14 = vpop.permute.xlu0 %391 }
  0x9d   : > { %v428_v19 = vpop.permute.xlu1 %427  ;;  %v394_v20 = vpop.permute.xlu0 %393 }
  0x9e   : > { %v430_v21 = vsel %vm6690_vm1, %v426_v13, %v428_v19  ;;  %v431_v22 = vsel %vm6690_vm1, %v428_v19, %v426_v13  ;;  %v398_v23 = vsel %vm6691_vm2, %v392_v14, %v394_v20  ;;  %v399_v24 = vsel %vm6691_vm2, %v394_v20, %v392_v14 }
  0x9f   : > { %v434_v25 = vcombine.low %v431_v22, %v430_v21  ;;  %v402_v26 = vcombine.low %v399_v24, %v398_v23  ;;  %vm358_vm2 = vcmp.lt.s32.totalorder %v4481_v17, 14 }
  0xa1   : > { %v441_v27 = vrot.slane %v434_v25, %v4484_v18  ;;  %v409_v28 = vrot.slane %v402_v26, %v4484_v18  ;;  %v457_v29 = vpop.permute.xlu1 %456  ;;  %v455_v30 = vpop.permute.xlu0 %454  ;;  %v6712_v26 = vmov 0 }
  0xa2   : > { %v459_v32 = vsel %vm6687_vm5, %v455_v30, %v457_v29  ;;  %v460_v33 = vsel %vm6687_vm5, %v457_v29, %v455_v30  ;;  %v4333_v29 = vmov 65535   ;;  %vm867_vm5 = vcmp.lt.s32.totalorder %v4469_v12, 34 }
  0xa3   : > { %v448_v34 = vrot.slane %v441_v27, %v4484_v18  ;;  %v416_v35 = vrot.slane %v409_v28, %v4484_v18  ;;  %v463_v36 = vcombine.low %v460_v33, %v459_v32 }
  0xa5   : > { %v450_v37 = vsel %vm6692_vm3, %v448_v34, 0.0  ;;  %v418_v38 = vsel %vm4502_vm6, %v416_v35, 0.0  ;;  %v470_v39 = vrot.slane %v463_v36, %v4484_v18  ;;  %v486_v40 = vpop.permute.xlu1 %485  ;;  %v484_v41 = vpop.permute.xlu0 %483  ;;  %vm909_vm3 = vcmp.lt.s32.totalorder %v4469_v12, 32 }
  0xa6   : > { %452 = vst.msk [vmem:[#allocation2 + $0x1] ss:$8 sm:$0x3] %vm4439_vm0, %v450_v37  ;;  %423 = vst.msk [vmem:[#allocation2] ss:$8 sm:$0x3] %vm4439_vm0, %v418_v38  ;;  %v488_v43 = vsel %vm6686_vm7, %v484_v41, %v486_v40  ;;  %v489_v44 = vsel %vm6686_vm7, %v486_v40, %v484_v41 }
  0xa7   : > { %v477_v45 = vrot.slane %v470_v39, %v4484_v18  ;;  %v492_v46 = vcombine.low %v489_v44, %v488_v43  ;;  %v3942_v41 = vld [vmem:[%s6673_s2] sm:$0xff]   ;;  %v3943_v43 = vld [vmem:[%s6673_s2 + $0x8] ss:$0 sps:$4 sm:$0xff]  }
  0xa9   : > { %v479_v47 = vsel %vm4527_vm9, %v477_v45, 0.0  ;;  %v499_v48 = vrot.slane %v492_v46, %v4484_v18  ;;  %v518_v49 = vpop.permute.xlu1 %517  ;;  %v516_v50 = vpop.permute.xlu0 %515 }
  0xaa   : > { %481 = vst.msk [vmem:[#allocation2 + $0x2] ss:$8 sm:$0x3] %vm4439_vm0, %v479_v47  ;;  %v520_v51 = vsel %vm6685_vm10, %v516_v50, %v518_v49  ;;  %v521_v52 = vsel %vm6685_vm10, %v518_v49, %v516_v50  ;;  %vm356_vm10 = vcmp.ge.s32.totalorder %v4481_v17, 2 }
  0xab   : > { %v506_v53 = vrot.slane %v499_v48, %v4484_v18  ;;  %v524_v54 = vcombine.low %v520_v51, %v521_v52 }
  0xad   : > { %v508_v55 = vsel %vm6689_vm4, %v506_v53, 0.0  ;;  %v531_v56 = vrot.slane %v524_v54, %v4484_v18  ;;  %v547_v57 = vpop.permute.xlu1 %546  ;;  %v545_v58 = vpop.permute.xlu0 %544 }
  0xae   : > { %510 = vst.msk [vmem:[#allocation2 + $0x3] ss:$8 sm:$0x3] %vm4439_vm0, %v508_v55  ;;  %v549_v59 = vsel %vm6683_vm11, %v545_v58, %v547_v57  ;;  %v550_v60 = vsel %vm6683_vm11, %v547_v57, %v545_v58  ;;  %vm656_vm11 = vcmask 1044480  }
  0xaf   : > { %v538_v61 = vrot.slane %v531_v56, %v4484_v18  ;;  %v553_v62 = vcombine.low %v549_v59, %v550_v60 }
  0xb1   : > { %v540_v63 = vsel %vm6688_vm8, %v538_v61, 0.0  ;;  %v560_v0 = vrot.slane %v553_v62, %v4484_v18  ;;  %v576_v1 = vpop.permute.xlu1 %575  ;;  %v574_v4 = vpop.permute.xlu0 %573 }
  0xb2   : > { %542 = vst.msk [vmem:[#allocation2 + $0x5] ss:$8 sm:$0x3] %vm4439_vm0, %v540_v63  ;;  %v578_v7 = vsel %vm6681_vm13, %v574_v4, %v576_v1  ;;  %v579_v9 = vsel %vm6681_vm13, %v576_v1, %v574_v4  ;;  %vm4598_vm13 = vmand %vm6684_vm12, %vm6688_vm8  ;;  %v798_v1 = vld [vmem:[%s6676_s5 + $0x8] sm:$0xff]  ;;  %v757_v4 = vld [vmem:[%s6675_s4 + $0x10] sm:$0xff] }
  0xb3   : > { %v567_v10 = vrot.slane %v560_v0, %v4484_v18  ;;  %v582_v11 = vcombine.low %v578_v7, %v579_v9  ;;  %v6713_v26 = vsel %vm4598_vm13, 4294967295, %v6712_v26  ;;  %v797_v0 = vld [vmem:[%s6676_s5] sm:$0xff]  ;;  %v756_v7 = vld [vmem:[%s6675_s4 + $0x8] sm:$0xff]  ;;  %v799_v9 = vld [vmem:[%s6676_s5 + $0x10] sm:$0xff] }
  0xb5   : > { %v569_v13 = vsel %vm4569_vm14, %v567_v10, 0.0  ;;  %v589_v14 = vrot.slane %v582_v11, %v4484_v18  ;;  %v605_v15 = vpop.permute.xlu1 %604  ;;  %v603_v19 = vpop.permute.xlu0 %602 }
  0xb6   : > { %571 = vst.msk [vmem:[#allocation2 + $0x6] ss:$8 sm:$0x3] %vm4439_vm0, %v569_v13  ;;  %v607_v20 = vsel %vm6682_vm15, %v603_v19, %v605_v15  ;;  %v608_v21 = vsel %vm6682_vm15, %v605_v15, %v603_v19  ;;  %vm6694_vm15 = vcmask 1043456  }
  0xb7   : > { %v596_v22 = vrot.slane %v589_v14, %v4484_v18  ;;  %v611_v23 = vcombine.low %v607_v20, %v608_v21  ;;  %v657_v30 = vsel %vm6694_vm15, 4294967295, %v4333_v29 }
  0xb8   : > { %v658_v34 = vsel %vm656_vm11, %v657_v30, 0  ;;  %vm6693_vm11 = vcmask 719872  }
  0xb9   : > { %v598_v24 = vsel %vm6684_vm12, %v596_v22, 0.0  ;;  %v618_v25 = vrot.slane %v611_v23, %v4484_v18  ;;  %vm648_vm12 = vcmask 72704  }
  0xba   : > { %600 = vst.msk [vmem:[#allocation2 + $0x7] ss:$8 sm:$0x3] %vm4439_vm0, %v598_v24 }
  0xbb   : > { %v625_v27 = vrot.slane %v618_v25, %v4484_v18 }
  0xbd   : > { %v627_v28 = vsel %vm4598_vm13, %v625_v27, 0.0 }
  0xbe   : > { %629 = vst.msk [vmem:[#allocation2 + $0x10] ss:$8 sm:$0x3] %vm4439_vm0, %v627_v28 }
  0xc1   : > { %v632_v32 = vld [vmem:[#allocation2 + $0x8] sm:$0xff]  ;;  %v631_v35 = vld [vmem:[#allocation2] sm:$0xff] }
  0xc5   : > { %v634_v33 = vld [vmem:[#allocation2 + $0x18] sm:$0x1]  ;;  %v633_v36 = vld [vmem:[#allocation2 + $0x10] sm:$0x1] }
  0xc6   : > { %v636_v37 = vpack.c.bf16 %v634_v33, %v632_v32  ;;  %v635_v38 = vpack.c.bf16 %v633_v36, %v631_v35  ;;  %v779_v10 = vpop.permute.xlu1 %778 }
  0xc8   : > { %v663_v39 = vand.u32 %v658_v34, %v636_v37  ;;  %v660_v40 = vand.u32 %v658_v34, %v635_v38 }
  0xca   : > { %665 = vmatprep.subr.bf16.mxu0 %v663_v39 }
  0xcb   : > { %666 = vmatpush1.bf16.msra.mxu0 %v660_v40 }
  0xce   : > { %3797 = vmatmul.mubr.msk.bf16.vlgmr.msra.gmra.mrb[0].mxu0 %vm648_vm12, %v3942_v41 }
  0xcf   : > { %707 = vmatprep.mubr.bf16.mxu0 %v4331_v8 }
  0xd6   : > { %3798 = vmatmul.mubr.msk.bf16.gmra.mrb[4].mxu0 %vm648_vm12, %v3943_v43  ;;  %vm355_vm12 = vcmp.ge.s32.totalorder %v4474_v16, 2 }
  0xd7   : > { %vm357_vm7 = vmand %vm355_vm12, %vm356_vm10 }
 0x1a1   : > { %v4615_v44 = vpop.f32.mrb[0].mxu0 }
 0x1a2   : > { %v4617_v45 = vpop.f32.mrb[1].mxu0  ;;  %v728_v46 = vmul.f32 %v4615_v44, %v4615_v44 }
 0x1a3   : > { %v4621_v47 = vpop.f32.mrb[2].mxu0  ;;  %v716_v48 = vadd.f32 %v4617_v45, %v4615_v44  ;;  %v729_v49 = vmul.f32 %v4617_v45, %v4617_v45 }
 0x1a4   : > { %v4627_v50 = vpop.f32.mrb[3].mxu0  ;;  %v730_v51 = vmul.f32 %v4621_v47, %v4621_v47 }
 0x1a5   : > { %717 = vadd.xlane.f32.xlu0 %v716_v48  ;;  %v719_v52 = vadd.f32 %v4627_v50, %v4621_v47  ;;  %v734_v53 = vadd.f32 %v729_v49, %v728_v46  ;;  %v731_v54 = vmul.f32 %v4627_v50, %v4627_v50  ;;  %v4662_v48 = vstv %s821_s20  ;;  %s4346_s20 = smov 4  }
 0x1a7   : > { %720 = vadd.xlane.f32.xlu1 %v719_v52  ;;  %v737_v55 = vadd.f32 %v731_v54, %v730_v51 }
 0x1a9   : > { %735 = vadd.xlane.f32.xlu0 %v734_v53  ;;  %v4635_v56 = vpop.f32.mrb[4].mxu0  ;;  %v4664_v53 = vstv %s3799_s21  ;;  %s4347_s21 = smov 124  }
 0x1aa   : > { %v4637_v57 = vpop.f32.mrb[5].mxu0  ;;  %v732_v58 = vmul.f32 %v4635_v56, %v4635_v56 }
 0x1ab   : > { %v722_v59 = vadd.f32 %v4637_v57, %v4635_v56  ;;  %v733_v60 = vmul.f32 %v4637_v57, %v4637_v57  ;;  %v713_v61 = vpop.f32.mrb[6].mxu0 }
 0x1ac   : > { %v714_v62 = vpop.f32.mrb[7].mxu0  ;;  %v824_v61 = vmul.f32 %v4662_v48, %v4617_v45 }
 0x1ad   : > { %738 = vadd.xlane.f32.xlu0 %v737_v55  ;;  %723 = vadd.xlane.f32.xlu1 %v722_v59  ;;  %v740_v63 = vadd.f32 %v733_v60, %v732_v58  ;;  %v823_v60 = vmul.f32 %v4662_v48, %v4615_v44 }
 0x1b1   : > { %741 = vadd.xlane.f32.xlu0 %v740_v63 }
 0x1be   : > { %802 = vperm.xlu1 %3940, %v797_v0  }
 0x1c2   : > { %807 = vperm.xlu1 %3940, %v798_v1  }
 0x1c6   : > { %788 = vperm.xlu1 %3940, %v757_v4  }
 0x1c7   : > { %783 = vperm.xlu0 %3941, %v756_v7  }
 0x1ca   : > { %812 = vperm.xlu1 %3940, %v799_v9  }
 0x232   : > { %v718_v11 = vpop.xlane.xlu0 %717 }
 0x233   : > { %v725_v13 = vmul.f32 0.00390625, %v718_v11 }
 0x234   : > { %v721_v14 = vpop.xlane.xlu1 %720 }
 0x235   : > { %v726_v19 = vmul.f32 0.00390625, %v721_v14  ;;  %v746_v20 = vmul.f32 %v725_v13, %v725_v13  ;;  %v758_v38 = vsub.f32 %v4615_v44, %v725_v13  ;;  %v759_v39 = vsub.f32 %v4617_v45, %v725_v13 }
 0x236   : > { %v736_v15 = vpop.xlane.xlu0 %735 }
 0x237   : > { %v743_v21 = vmul.f32 0.00390625, %v736_v15  ;;  %v747_v27 = vmul.f32 %v726_v19, %v726_v19  ;;  %v760_v62 = vsub.f32 %v4621_v47, %v726_v19  ;;  %v761_v11 = vsub.f32 %v4627_v50, %v726_v19 }
 0x239   : > { %v749_v22 = vsub.f32 %v743_v21, %v746_v20 }
 0x23a   : > { %v739_v23 = vpop.xlane.xlu0 %738  ;;  %v724_v32 = vpop.xlane.xlu1 %723 }
 0x23b   : > { %v752_v24 = vmax.f32 %v749_v22, 0.0  ;;  %v744_v25 = vmul.f32 0.00390625, %v739_v23  ;;  %v727_v35 = vmul.f32 0.00390625, %v724_v32 }
 0x23d   : > { %v764_v28 = vadd.f32 1e-05, %v752_v24  ;;  %v750_v29 = vsub.f32 %v744_v25, %v747_v27  ;;  %v748_v37 = vmul.f32 %v727_v35, %v727_v35  ;;  %v825_v27 = vmul.f32 %v4662_v48, %v4621_v47 }
 0x23e   : > { %v742_v34 = vpop.xlane.xlu0 %741  ;;  %v803_v54 = vpop.permute.xlu1 %802 }
 0x23f   : > { %3969 = vrsqrt.f32 %v764_v28  ;;  %v753_v30 = vmax.f32 %v750_v29, 0.0  ;;  %v745_v36 = vmul.f32 0.00390625, %v742_v34  ;;  %v762_v28 = vsub.f32 %v4635_v56, %v727_v35 }
 0x240   : > { %v763_v29 = vsub.f32 %v4637_v57, %v727_v35 }
 0x241   : > { %v765_v33 = vadd.f32 1e-05, %v753_v30  ;;  %v751_v41 = vsub.f32 %v745_v36, %v748_v37  ;;  %v826_v37 = vmul.f32 %v4662_v48, %v4627_v50 }
 0x242   : > { %v808_v20 = vpop.permute.xlu1 %807 }
 0x243   : > { %3971 = vrsqrt.f32 %v765_v33  ;;  %v754_v52 = vmax.f32 %v751_v41, 0.0 }
 0x245   : > { %v766_v1 = vadd.f32 1e-05, %v754_v52 }
 0x246   : > { %v789_v36 = vpop.permute.xlu1 %788 }
 0x247   : > { %3973 = vrsqrt.f32 %v766_v1 }
 0x249   : > { %v3970_v40 = vpop.eup %3969 }
 0x24a   : > { %v770_v43 = vmul.f32 %v3970_v40, %v758_v38  ;;  %v771_v46 = vmul.f32 %v3970_v40, %v759_v39  ;;  %v813_v40 = vpop.permute.xlu1 %812 }
 0x24c   : > { %v791_v49 = vmul.f32 %v779_v10, %v770_v43  ;;  %v792_v51 = vmul.f32 %v779_v10, %v771_v46  ;;  %v784_v10 = vpop.permute.xlu0 %783 }
 0x24d   : > { %v3972_v59 = vpop.eup %3971 }
 0x24e   : > { %v815_v55 = vadd.f32 %v803_v54, %v791_v49  ;;  %v816_v58 = vadd.f32 %v803_v54, %v792_v51  ;;  %v772_v9 = vmul.f32 %v3972_v59, %v760_v62  ;;  %v773_v15 = vmul.f32 %v3972_v59, %v761_v11  ;;  %v3807_v62 = vld [vmem:[%s6675_s4 + $0x18] sm:$0xff] }
 0x24f   : > { %v827_v54 = vmul.f32 %v4662_v48, %v4635_v56 }
 0x250   : > { %v831_v63 = vmul.f32 %v4664_v53, %v815_v55  ;;  %v832_v0 = vmul.f32 %v4664_v53, %v816_v58  ;;  %v793_v45 = vmul.f32 %v784_v10, %v772_v9  ;;  %v794_v22 = vmul.f32 %v784_v10, %v773_v15 }
 0x251   : > { %v3974_v25 = vpop.eup %3973  ;;  %v828_v55 = vmul.f32 %v4662_v48, %v4637_v57  ;;  %v3808_v48 = vld [vmem:[%s6675_s4 + $0x20] sm:$0xff]  ;;  %v874_v15 = vsel %vm357_vm7, 1, %v4331_v8 }
 0x252   : > { %v837_v4 = vadd.f32 %v831_v63, %v823_v60  ;;  %v838_v7 = vadd.f32 %v832_v0, %v824_v61  ;;  %v817_v19 = vadd.f32 %v808_v20, %v793_v45  ;;  %v818_v23 = vadd.f32 %v808_v20, %v794_v22  ;;  %v3946_v61 = vld [vmem:[%s6674_s3 + $0x4] ss:$8 sps:$4 sm:$0xff]   ;;  %v3810_v63 = vld [vmem:[%s6676_s5 + $0x18] sm:$0xff] }
 0x253   : > { %v774_v30 = vmul.f32 %v3974_v25, %v762_v28  ;;  %v775_v32 = vmul.f32 %v3974_v25, %v763_v29  ;;  %3805 = vmatprep.mubr.msk.bf16.mxu1 %vm6693_vm11, %v3946_v61  ;;  %v3811_v0 = vld [vmem:[%s6676_s5 + $0x20] sm:$0xff]  ;;  %v878_v22 = vrot.slane %v874_v15, %v4430_v2 }
 0x254   : > { %v843_v13 = vmul.f32 0.2, %v837_v4  ;;  %v844_v14 = vmul.f32 0.2, %v838_v7  ;;  %v833_v24 = vmul.f32 %v4664_v53, %v817_v19  ;;  %v834_v33 = vmul.f32 %v4664_v53, %v818_v23 }
 0x255   : > { %v795_v47 = vmul.f32 %v789_v36, %v774_v30  ;;  %v796_v35 = vmul.f32 %v789_v36, %v775_v32  ;;  %v882_v19 = vrot.slane %v874_v15, %v4437_v3  ;;  %vm4816_vm8 = vcmp.eq.s32.totalorder %v878_v22, 1 }
 0x256   : > { %v4674_v44 = vmax.f32 %v837_v4, %v843_v13  ;;  %v4680_v21 = vmax.f32 %v838_v7, %v844_v14  ;;  %v839_v34 = vadd.f32 %v833_v24, %v825_v27  ;;  %v840_v38 = vadd.f32 %v834_v33, %v826_v37  ;;  %vm4010_vm1 = vmpackc.low %vm4816_vm8, %vm4816_vm8 }
 0x257   : > { %v819_v50 = vadd.f32 %v813_v40, %v795_v47  ;;  %v820_v41 = vadd.f32 %v813_v40, %v796_v35  ;;  %vm4820_vm4 = vcmp.eq.s32.totalorder %v882_v19, 1  ;;  %v916_v36 = vsel %vm355_vm12, 1, %v4331_v8 }
 0x258   : > { %897 = vrot.lane.b32.xlu0 %v4674_v44, %s4334_s30  ;;  %855 = vrot.lane.b32.xlu1 %v4674_v44, %s4335_s10  ;;  %v845_v39 = vmul.f32 0.2, %v839_v34  ;;  %v846_v43 = vmul.f32 0.2, %v840_v38  ;;  %vm4007_vm7 = vmpackc.low %vm4820_vm4, %vm4820_vm4  ;;  %v924_v40 = vrot.slane %v916_v36, %v4437_v3 }
 0x259   : > { %v835_v49 = vmul.f32 %v4664_v53, %v819_v50  ;;  %v836_v51 = vmul.f32 %v4664_v53, %v820_v41 }
 0x25a   : > { %v4706_v46 = vmax.f32 %v839_v34, %v845_v39  ;;  %v4714_v52 = vmax.f32 %v840_v38, %v846_v43  ;;  %v920_v39 = vrot.slane %v916_v36, %v4430_v2 }
 0x25b   : > { %v841_v58 = vadd.f32 %v835_v49, %v827_v54  ;;  %v842_v59 = vadd.f32 %v836_v51, %v828_v55  ;;  %v3944_v49 = vld [vmem:[%s6674_s3] ss:$8 sps:$4 sm:$0xff]  }
 0x25c   : > { %939 = vrot.lane.b32.xlu0 %v4674_v44, %s4336_s13  ;;  %861 = vrot.lane.b32.xlu1 %v4680_v21, %s4335_s10  ;;  %vm4853_vm11 = vcmp.eq.s32.totalorder %v920_v39, 1 }
 0x25d   : > { %v847_v53 = vmul.f32 0.2, %v841_v58  ;;  %v848_v60 = vmul.f32 0.2, %v842_v59 }
 0x25f   : > { %v4732_v56 = vmax.f32 %v841_v58, %v847_v53  ;;  %v4734_v57 = vmax.f32 %v842_v59, %v848_v60 }
 0x260   : > { %945 = vrot.lane.b32.xlu0 %v4680_v21, %s4336_s13  ;;  %903 = vrot.lane.b32.xlu1 %v4680_v21, %s4334_s30 }
 0x264   : > { %981 = vrot.lane.b32.xlu0 %v4674_v44, %s4337_s14  ;;  %987 = vrot.lane.b32.xlu1 %v4680_v21, %s4337_s14 }
 0x268   : > { %1029 = vrot.lane.b32.xlu0 %v4674_v44, %s4338_s15  ;;  %1035 = vrot.lane.b32.xlu1 %v4680_v21, %s4338_s15 }
 0x26c   : > { %899 = vrot.lane.b32.xlu0 %v4706_v46, %s4334_s30  ;;  %857 = vrot.lane.b32.xlu1 %v4706_v46, %s4335_s10 }
 0x270   : > { %905 = vrot.lane.b32.xlu0 %v4714_v52, %s4334_s30  ;;  %863 = vrot.lane.b32.xlu1 %v4714_v52, %s4335_s10 }
 0x274   : > { %983 = vrot.lane.b32.xlu0 %v4706_v46, %s4337_s14  ;;  %941 = vrot.lane.b32.xlu1 %v4706_v46, %s4336_s13 }
 0x278   : > { %989 = vrot.lane.b32.xlu0 %v4714_v52, %s4337_s14  ;;  %947 = vrot.lane.b32.xlu1 %v4714_v52, %s4336_s13 }
 0x27c   : > { %865 = vrot.lane.b32.xlu1 %v4734_v57, %s4335_s10  ;;  %859 = vrot.lane.b32.xlu0 %v4732_v56, %s4335_s10  ;;  %s3832_s10 = sld [smem:[#allocation4 + $0x101]] }
 0x280   : > { %901 = vrot.lane.b32.xlu1 %v4732_v56, %s4334_s30  ;;  %1031 = vrot.lane.b32.xlu0 %v4706_v46, %s4338_s15 }
 0x284   : > { %907 = vrot.lane.b32.xlu1 %v4734_v57, %s4334_s30  ;;  %1037 = vrot.lane.b32.xlu0 %v4714_v52, %s4338_s15  ;;  %s3831_s30 = sld [smem:[#allocation4 + $0x100]] }
 0x288   : > { %1073 = vrot.lane.b32.xlu1 %v4706_v46, %s4339_s8  ;;  %943 = vrot.lane.b32.xlu0 %v4732_v56, %s4336_s13 }
 0x28c   : > { %1079 = vrot.lane.b32.xlu1 %v4714_v52, %s4339_s8  ;;  %1071 = vrot.lane.b32.xlu0 %v4674_v44, %s4339_s8 }
 0x290   : > { %1119 = vrot.lane.b32.xlu1 %v4680_v21, %s4340_s16  ;;  %1077 = vrot.lane.b32.xlu0 %v4680_v21, %s4339_s8 }
 0x294   : > { %949 = vrot.lane.b32.xlu1 %v4734_v57, %s4336_s13  ;;  %1113 = vrot.lane.b32.xlu0 %v4674_v44, %s4340_s16  ;;  %s4348_s13 = smov 8  }
 0x298   : > { %985 = vrot.lane.b32.xlu1 %v4732_v56, %s4337_s14  ;;  %1115 = vrot.lane.b32.xlu0 %v4706_v46, %s4340_s16 }
 0x29c   : > { %991 = vrot.lane.b32.xlu1 %v4734_v57, %s4337_s14  ;;  %1121 = vrot.lane.b32.xlu0 %v4714_v52, %s4340_s16  ;;  %s4349_s14 = smov 120  }
 0x2a0   : > { %1033 = vrot.lane.b32.xlu1 %v4732_v56, %s4338_s15  ;;  %1075 = vrot.lane.b32.xlu0 %v4732_v56, %s4339_s8 }
 0x2a4   : > { %1039 = vrot.lane.b32.xlu1 %v4734_v57, %s4338_s15  ;;  %1155 = vrot.lane.b32.xlu0 %v4674_v44, %s4341_s17  ;;  %s3813_s15 = sld [smem:[#allocation4 + $0x80]] }
 0x2a8   : > { %1157 = vrot.lane.b32.xlu1 %v4706_v46, %s4341_s17  ;;  %1161 = vrot.lane.b32.xlu0 %v4680_v21, %s4341_s17 }
 0x2ac   : > { %1081 = vrot.lane.b32.xlu1 %v4734_v57, %s4339_s8  ;;  %1159 = vrot.lane.b32.xlu0 %v4732_v56, %s4341_s17  ;;  %s3814_s8 = sld [smem:[#allocation4 + $0x81]] }
 0x2b0   : > { %1117 = vrot.lane.b32.xlu1 %v4732_v56, %s4340_s16  ;;  %1429 = vperm.xlu0 %3941, %v3808_v48  }
 0x2b4   : > { %1123 = vrot.lane.b32.xlu1 %v4734_v57, %s4340_s16  ;;  %s4343_s16 = smov 64  }
 0x2b8   : > { %1163 = vrot.lane.b32.xlu1 %v4714_v52, %s4341_s17 }
 0x2bc   : > { %1165 = vrot.lane.b32.xlu1 %v4734_v57, %s4341_s17  ;;  %s4344_s17 = smov 68  }
 0x2c0   : > { %1424 = vperm.xlu1 %3940, %v3807_v62  }
 0x2c4   : > { %1449 = vperm.xlu1 %3940, %v3810_v63  }
 0x2c8   : > { %1454 = vperm.xlu1 %3940, %v3811_v0  }
 0x2ca   : > { %v898_v1 = vpop.permute.xlu0 %897  ;;  %v856_v4 = vpop.permute.xlu1 %855 }
 0x2ce   : > { %v4794_v7 = vpop.permute.xlu0 %939  ;;  %v862_v9 = vpop.permute.xlu1 %861 }
 0x2cf   : > { %v868_v28 = vsel %vm867_vm5, %v856_v4, %v862_v9  ;;  %v871_v29 = vsel %vm867_vm5, %v862_v9, %v856_v4 }
 0x2d2   : > { %v4796_v10 = vpop.permute.xlu0 %945  ;;  %v904_v11 = vpop.permute.xlu1 %903 }
 0x2d3   : > { %v910_v51 = vsel %vm909_vm3, %v898_v1, %v904_v11  ;;  %v913_v54 = vsel %vm909_vm3, %v904_v11, %v898_v1 }
 0x2d6   : > { %v4800_v13 = vpop.permute.xlu0 %981  ;;  %v4802_v14 = vpop.permute.xlu1 %987 }
 0x2da   : > { %v4809_v45 = vpop.permute.xlu0 %1029  ;;  %v4811_v20 = vpop.permute.xlu1 %1035 }
 0x2de   : > { %v900_v23 = vpop.permute.xlu0 %899  ;;  %v858_v24 = vpop.permute.xlu1 %857 }
 0x2e2   : > { %v906_v30 = vpop.permute.xlu0 %905  ;;  %v864_v32 = vpop.permute.xlu1 %863 }
 0x2e3   : > { %v869_v33 = vsel %vm867_vm5, %v858_v24, %v864_v32  ;;  %v872_v34 = vsel %vm867_vm5, %v864_v32, %v858_v24  ;;  %v911_v0 = vsel %vm909_vm3, %v900_v23, %v906_v30  ;;  %v914_v1 = vsel %vm909_vm3, %v906_v30, %v900_v23 }
 0x2e4   : > { %v4008_v35 = vpack.c.bf16 %v869_v33, %v868_v28  ;;  %v4011_v38 = vpack.c.bf16 %v872_v34, %v871_v29 }
 0x2e6   : > { %v4835_v37 = vpop.permute.xlu0 %983  ;;  %v942_v47 = vpop.permute.xlu1 %941  ;;  %4009 = vmatprep.subr.msk.bf16.mxu1 %vm4007_vm7, %v4008_v35  ;;  %vm359_vm7 = vmand %vm355_vm12, %vm358_vm2  ;;  %vm951_vm12 = vcmp.lt.s32.totalorder %v4469_v12, 30 }
 0x2e7   : > { %4012 = vmatpush1.bf16.msk.msra.mxu1 %vm4010_vm1, %v4011_v38  ;;  %vm4857_vm1 = vcmp.eq.s32.totalorder %v924_v40, 1  ;;  %v958_v59 = vsel %vm359_vm7, 1, %v4331_v8  ;;  %v952_v22 = vsel %vm951_vm12, %v4794_v7, %v4796_v10  ;;  %v955_v29 = vsel %vm951_vm12, %v4796_v10, %v4794_v7 }
 0x2e8   : > { %v966_v48 = vrot.slane %v958_v59, %v4437_v3  ;;  %vm4013_vm15 = vmpackc.low %vm4857_vm1, %vm4820_vm4  ;;  %v962_v11 = vrot.slane %v958_v59, %v4430_v2  ;;  %v1000_v10 = vsel %vm356_vm10, 1, %v4331_v8 }
 0x2e9   : > { %v1004_v38 = vrot.slane %v1000_v10, %v4430_v2  ;;  %v1008_v39 = vrot.slane %v1000_v10, %v4437_v3 }
 0x2ea   : > { %v4847_v50 = vpop.permute.xlu0 %989  ;;  %v948_v41 = vpop.permute.xlu1 %947  ;;  %vm4889_vm4 = vcmp.eq.s32.totalorder %v966_v48, 1 }
 0x2eb   : > { %v953_v9 = vsel %vm951_vm12, %v942_v47, %v948_v41  ;;  %v956_v27 = vsel %vm951_vm12, %v948_v41, %v942_v47  ;;  %vm4025_vm7 = vmpackc.low %vm4889_vm4, %vm4889_vm4 }
 0x2ec   : > { %v4026_v7 = vpack.c.bf16 %v953_v9, %v952_v22  ;;  %v4029_v35 = vpack.c.bf16 %v956_v27, %v955_v29 }
 0x2ee   : > { %v860_v55 = vpop.permute.xlu0 %859  ;;  %v866_v58 = vpop.permute.xlu1 %865 }
 0x2ef   : > { %v870_v53 = vsel %vm867_vm5, %v860_v55, %v866_v58  ;;  %v873_v60 = vsel %vm867_vm5, %v866_v58, %v860_v55  ;;  %vm4016_vm5 = vmpackc.low %vm4853_vm11, %vm4816_vm8  ;;  %vm4905_vm8 = vcmp.eq.s32.totalorder %v962_v11, 1 }
 0x2f0   : > { %v4014_v63 = vpack.c.bf16 %v910_v51, %v870_v53  ;;  %v4017_v4 = vpack.c.bf16 %v913_v54, %v873_v60  ;;  %v1048_v60 = vsel %vm358_vm2, 1, %v4331_v8 }
 0x2f1   : > { %v1052_v9 = vrot.slane %v1048_v60, %v4430_v2 }
 0x2f2   : > { %v4871_v61 = vpop.permute.xlu0 %1031  ;;  %v902_v62 = vpop.permute.xlu1 %901  ;;  %4015 = vmatprep.subr.msk.bf16.mxu1 %vm4013_vm15, %v4014_v63  ;;  %vm4019_vm15 = vmpackc.low %vm4857_vm1, %vm4857_vm1  ;;  %vm993_vm1 = vcmp.lt.s32.totalorder %v4469_v12, 2 }
 0x2f3   : > { %4018 = vmatpush1.bf16.msk.msra.mxu1 %vm4016_vm5, %v4017_v4  ;;  %vm4941_vm5 = vcmp.eq.s32.totalorder %v1004_v38, 1  ;;  %v994_v51 = vsel %vm993_vm1, %v4800_v13, %v4802_v14  ;;  %v997_v54 = vsel %vm993_vm1, %v4802_v14, %v4800_v13  ;;  %v995_v63 = vsel %vm993_vm1, %v4835_v37, %v4847_v50 }
 0x2f6   : > { %v4897_v19 = vpop.permute.xlu0 %1037  ;;  %v908_v23 = vpop.permute.xlu1 %907 }
 0x2f7   : > { %v912_v24 = vsel %vm909_vm3, %v902_v62, %v908_v23  ;;  %v915_v25 = vsel %vm909_vm3, %v908_v23, %v902_v62  ;;  %vm4022_vm3 = vmpackc.low %vm4853_vm11, %vm4853_vm11  ;;  %v1056_v62 = vrot.slane %v1048_v60, %v4437_v3 }
 0x2f8   : > { %v4020_v33 = vpack.c.bf16 %v912_v24, %v911_v0  ;;  %v4023_v34 = vpack.c.bf16 %v915_v25, %v914_v1  ;;  %vm4028_vm11 = vmpackc.low %vm4905_vm8, %vm4905_vm8  ;;  %v998_v0 = vsel %vm993_vm1, %v4847_v50, %v4835_v37  ;;  %v1264_v25 = vpack.c.bf16 %v4714_v52, %v4680_v21 }
 0x2fa   : > { %v944_v30 = vpop.permute.xlu0 %943  ;;  %v4913_v32 = vpop.permute.xlu1 %1073  ;;  %4021 = vmatprep.subr.msk.bf16.mxu1 %vm4019_vm15, %v4020_v33  ;;  %vm4945_vm15 = vcmp.eq.s32.totalorder %v1008_v39, 1 }
 0x2fb   : > { %4024 = vmatpush1.bf16.msk.msra.mxu1 %vm4022_vm3, %v4023_v34  ;;  %vm4031_vm3 = vmpackc.low %vm4945_vm15, %vm4889_vm4  ;;  %vm1041_vm4 = vcmp.lt.s32.totalorder %v4469_v12, 126  ;;  %v1263_v34 = vpack.c.bf16 %v4706_v46, %v4674_v44 }
 0x2fc   : > { %4027 = vmatprep.subr.msk.bf16.mxu1 %vm4025_vm7, %v4026_v7  ;;  %vm4034_vm7 = vmpackc.low %vm4941_vm5, %vm4905_vm8  ;;  %v1045_v50 = vsel %vm1041_vm4, %v4811_v20, %v4809_v45  ;;  %v1042_v28 = vsel %vm1041_vm4, %v4809_v45, %v4811_v20  ;;  %v1046_v45 = vsel %vm1041_vm4, %v4897_v19, %v4871_v61 }
 0x2fd   : > { %v4044_v46 = vpack.c.bf16 %v1045_v50, %v4734_v57 }
 0x2fe   : > { %v4927_v36 = vpop.permute.xlu0 %1071  ;;  %v4929_v47 = vpop.permute.xlu1 %1079 }
 0x2ff   : > { %4030 = vmatpush1.bf16.msk.msra.mxu1 %vm4028_vm11, %v4029_v35  ;;  %vm4996_vm11 = vcmp.eq.s32.totalorder %v1056_v62, 1  ;;  %v1043_v35 = vsel %vm1041_vm4, %v4871_v61, %v4897_v19  ;;  %v4047_v61 = vpack.c.bf16 %v1042_v28, %v4732_v56 }
 0x302   : > { %v4937_v40 = vpop.permute.xlu0 %1077  ;;  %v4939_v41 = vpop.permute.xlu1 %1119 }
 0x306   : > { %v950_v55 = vpop.permute.xlu1 %949  ;;  %v4961_v53 = vpop.permute.xlu0 %1113 }
 0x307   : > { %v954_v58 = vsel %vm951_vm12, %v944_v30, %v950_v55  ;;  %v957_v59 = vsel %vm951_vm12, %v950_v55, %v944_v30  ;;  %vm360_vm12 = vcmp.lt.s32.totalorder %v4474_v16, 14 }
 0x308   : > { %v4032_v13 = vpack.c.bf16 %v994_v51, %v954_v58  ;;  %v4035_v14 = vpack.c.bf16 %v997_v54, %v957_v59  ;;  %vm361_vm8 = vmand %vm360_vm12, %vm356_vm10  ;;  %vm5010_vm10 = vcmp.eq.s32.totalorder %v1052_v9, 1  ;;  %v1132_v21 = vsel %vm360_vm12, 1, %v4331_v8 }
 0x309   : > { %v1090_v23 = vsel %vm361_vm8, 1, %v4331_v8  ;;  %v1140_v38 = vrot.slane %v1132_v21, %v4437_v3  ;;  %v1136_v54 = vrot.slane %v1132_v21, %v4430_v2 }
 0x30a   : > { %v986_v48 = vpop.permute.xlu1 %985  ;;  %4033 = vmatprep.subr.msk.bf16.mxu1 %vm4031_vm3, %v4032_v13  ;;  %v4985_v1 = vpop.permute.xlu0 %1115  ;;  %vm4040_vm3 = vmpackc.low %vm4941_vm5, %vm4941_vm5  ;;  %v1098_v33 = vrot.slane %v1090_v23, %v4437_v3  ;;  %vm1083_vm5 = vcmp.lt.s32.totalorder %v4469_v12, 98  ;;  %v1094_v10 = vrot.slane %v1090_v23, %v4430_v2 }
 0x30b   : > { %4036 = vmatpush1.bf16.msk.msra.mxu1 %vm4034_vm7, %v4035_v14  ;;  %v1087_v44 = vsel %vm1083_vm5, %v4937_v40, %v4927_v36  ;;  %v1088_v51 = vsel %vm1083_vm5, %v4929_v47, %v4913_v32  ;;  %v1084_v57 = vsel %vm1083_vm5, %v4927_v36, %v4937_v40  ;;  %v1085_v56 = vsel %vm1083_vm5, %v4913_v32, %v4929_v47 }
 0x30c   : > { %vm5050_vm8 = vcmp.eq.s32.totalorder %v1098_v33, 1  ;;  %v4056_v47 = vpack.c.bf16 %v1088_v51, %v1087_v44  ;;  %v4059_v9 = vpack.c.bf16 %v1085_v56, %v1084_v57 }
 0x30e   : > { %v992_v4 = vpop.permute.xlu1 %991  ;;  %v1122_v29 = vpop.permute.xlu0 %1121 }
 0x30f   : > { %v996_v11 = vsel %vm993_vm1, %v986_v48, %v992_v4  ;;  %v999_v15 = vsel %vm993_vm1, %v992_v4, %v986_v48  ;;  %vm4037_vm1 = vmpackc.low %vm4945_vm15, %vm4945_vm15  ;;  %vm6695_vm15 = vmmov 1  }
 0x310   : > { %v4038_v24 = vpack.c.bf16 %v996_v11, %v995_v63  ;;  %v4041_v30 = vpack.c.bf16 %v999_v15, %v998_v0  ;;  %vm4043_vm7 = vmpackc.low %vm4996_vm11, %vm6695_vm15 }
 0x312   : > { %v1034_v22 = vpop.permute.xlu1 %1033  ;;  %4039 = vmatprep.subr.msk.bf16.mxu1 %vm4037_vm1, %v4038_v24  ;;  %v1076_v39 = vpop.permute.xlu0 %1075  ;;  %vm4046_vm1 = vmpackc.low %vm5010_vm10, %vm6695_vm15 }
 0x313   : > { %4042 = vmatpush1.bf16.msk.msra.mxu1 %vm4040_vm3, %v4041_v30  ;;  %vm5067_vm3 = vcmp.eq.s32.totalorder %v1094_v10, 1 }
 0x314   : > { %1322 = vmatprep.subr.bf16.mxu1 %v1264_v25 }
 0x316   : > { %v1040_v52 = vpop.permute.xlu1 %1039  ;;  %v1156_v60 = vpop.permute.xlu0 %1155 }
 0x317   : > { %v1047_v20 = vsel %vm1041_vm4, %v1040_v52, %v1034_v22  ;;  %v1044_v7 = vsel %vm1041_vm4, %v1034_v22, %v1040_v52  ;;  %1323 = vmatpush1.bf16.msra.mxu1 %v1263_v34  ;;  %vm4049_vm4 = vmpackc.low %vm4996_vm11, %vm4996_vm11 }
 0x318   : > { %4045 = vmatprep.subr.msk.bf16.mxu1 %vm4043_vm7, %v4044_v46  ;;  %vm362_vm7 = vmand %vm360_vm12, %vm358_vm2  ;;  %v4050_v36 = vpack.c.bf16 %v1047_v20, %v1046_v45  ;;  %vm6740_vm2 = vcmp.lt.s32.totalorder %v4469_v12, 96  ;;  %v4053_v32 = vpack.c.bf16 %v1044_v7, %v1043_v35 }
 0x319   : > { %v1129_v58 = vsel %vm6740_vm2, %v4939_v41, %v4961_v53  ;;  %v1174_v48 = vsel %vm362_vm7, 1, %v4331_v8  ;;  %vm4052_vm12 = vmpackc.low %vm5010_vm10, %vm5010_vm10  ;;  %v1130_v15 = vsel %vm6740_vm2, %v1122_v29, %v4985_v1 }
 0x31a   : > { %v1158_v43 = vpop.permute.xlu1 %1157  ;;  %vm4055_vm11 = vmpackc.low %vm5050_vm8, %vm5050_vm8  ;;  %v1178_v0 = vrot.slane %v1174_v48, %v4430_v2  ;;  %v1182_v4 = vrot.slane %v1174_v48, %v4437_v3 }
 0x31b   : > { %4048 = vmatpush1.bf16.msk.msra.mxu1 %vm4046_vm1, %v4047_v61  ;;  %vm5083_vm1 = vcmp.eq.s32.totalorder %v1140_v38, 1  ;;  %vm4058_vm10 = vmpackc.low %vm5067_vm3, %vm5067_vm3 }
 0x31c   : > { %4051 = vmatprep.subr.msk.bf16.mxu1 %vm4049_vm4, %v4050_v36  ;;  %vm5102_vm4 = vcmp.eq.s32.totalorder %v1136_v54, 1  ;;  %vm6744_vm7 = vmmov %vm6740_vm2 }
 0x31d   : > { %v1127_v11 = vsel %vm6744_vm7, %v4985_v1, %v1122_v29  ;;  %vm6749_vm7 = vmmov %vm6740_vm2 }
 0x31e   : > { %v1082_v55 = vpop.permute.xlu1 %1081 }
 0x31f   : > { %v1089_v59 = vsel %vm1083_vm5, %v1082_v55, %v1076_v39  ;;  %v1086_v13 = vsel %vm1083_vm5, %v1076_v39, %v1082_v55  ;;  %4054 = vmatpush1.bf16.msk.msra.mxu1 %vm4052_vm12, %v4053_v32  ;;  %vm6743_vm5 = vmmov %vm6740_vm2  ;;  %v1281_v39 = vld [vmem:[%s6674_s3 + $0x10] sm:$0xff] }
 0x320   : > { %4057 = vmatprep.subr.msk.bf16.mxu1 %vm4055_vm11, %v4056_v47  ;;  %v1126_v62 = vsel %vm6743_vm5, %v4961_v53, %v4939_v41  ;;  %vm4061_vm12 = vmpackc.low %vm5083_vm1, %vm5050_vm8  ;;  %v4062_v41 = vpack.c.bf16 %v1129_v58, %v1089_v59  ;;  %vm1167_vm11 = vcmp.lt.s32.totalorder %v4469_v12, 94  ;;  %v1162_v53 = vpop.permute.xlu0 %1161  ;;  %vm5126_vm5 = vcmp.eq.s32.totalorder %v1178_v0, 1 }
 0x321   : > { %vm4064_vm8 = vmpackc.low %vm5102_vm4, %vm5067_vm3  ;;  %v4065_v24 = vpack.c.bf16 %v1126_v62, %v1086_v13  ;;  %v1168_v25 = vsel %vm1167_vm11, %v1156_v60, %v1162_v53  ;;  %v1171_v27 = vsel %vm1167_vm11, %v1162_v53, %v1156_v60  ;;  %v3803_v51 = vcombine.high %v1281_v39, %v1281_v39 }
 0x322   : > { %v1118_v63 = vpop.permute.xlu1 %1117  ;;  %vm4070_vm3 = vmpackc.low %vm5102_vm4, %vm5102_vm4  ;;  %v3802_v57 = vcombine.low %v1281_v39, %v1281_v39 }
 0x323   : > { %4060 = vmatpush1.bf16.msk.msra.mxu1 %vm4058_vm10, %v4059_v9  ;;  %vm5130_vm10 = vcmp.eq.s32.totalorder %v1182_v4, 1  ;;  %vm4076_vm4 = vmpackc.low %vm5126_vm5, %vm5126_vm5 }
 0x324   : > { %4063 = vmatprep.subr.msk.bf16.mxu1 %vm4061_vm12, %v4062_v41  ;;  %vm4067_vm12 = vmpackc.low %vm5083_vm1, %vm5083_vm1  ;;  %v1160_v52 = vpop.permute.xlu0 %1159 }
 0x325   : > { %vm4073_vm1 = vmpackc.low %vm5130_vm10, %vm5130_vm10 }
 0x326   : > { %v1124_v37 = vpop.permute.xlu1 %1123 }
 0x327   : > { %v1128_v1 = vsel %vm6749_vm7, %v1118_v63, %v1124_v37  ;;  %v1131_v23 = vsel %vm6740_vm2, %v1124_v37, %v1118_v63  ;;  %4066 = vmatpush1.bf16.msk.msra.mxu1 %vm4064_vm8, %v4065_v24 }
 0x328   : > { %v4068_v33 = vpack.c.bf16 %v1131_v23, %v1130_v15  ;;  %v4071_v21 = vpack.c.bf16 %v1128_v1, %v1127_v11  ;;  %v3812_v11 = vld [vmem:[%s6676_s5 + $0x28] sm:$0xff] }
 0x329   : > { %v3809_v15 = vld [vmem:[%s6675_s4 + $0x28] sm:$0xff] }
 0x32a   : > { %v1164_v28 = vpop.permute.xlu1 %1163  ;;  %4069 = vmatprep.subr.msk.bf16.mxu1 %vm4067_vm12, %v4068_v33 }
 0x32b   : > { %v1169_v29 = vsel %vm1167_vm11, %v1158_v43, %v1164_v28  ;;  %v1172_v30 = vsel %vm1167_vm11, %v1164_v28, %v1158_v43  ;;  %4072 = vmatpush1.bf16.msk.msra.mxu1 %vm4070_vm3, %v4071_v21  ;;  %vm1514_vm3 = vcmp.lt.s32.totalorder %v4469_v12, 68 }
 0x32c   : > { %v4074_v7 = vpack.c.bf16 %v1172_v30, %v1171_v27  ;;  %v4077_v46 = vpack.c.bf16 %v1169_v29, %v1168_v25 }
 0x32e   : > { %v1166_v34 = vpop.permute.xlu1 %1165  ;;  %4075 = vmatprep.subr.msk.bf16.mxu1 %vm4073_vm1, %v4074_v7 }
 0x32f   : > { %v1170_v45 = vsel %vm1167_vm11, %v1160_v52, %v1166_v34  ;;  %v1173_v20 = vsel %vm1167_vm11, %v1166_v34, %v1160_v52  ;;  %4078 = vmatpush1.bf16.msk.msra.mxu1 %vm4076_vm4, %v4077_v46  ;;  %vm6750_vm11 = vcmask 1043456   ;;  %v1430_v37 = vpop.permute.xlu0 %1429 }
 0x330   : > { %v1189_v10 = vsel %vm5126_vm5, %v1170_v45, 0.0  ;;  %v1190_v44 = vsel %vm5130_vm10, %v1173_v20, 0.0  ;;  %vm6751_vm7 = vmmov %vm6750_vm11  ;;  %vm6752_vm5 = vcmask 719872  }
 0x331   : > { %v1278_v35 = vpack.c.bf16 %v1190_v44, %v1190_v44  ;;  %v1277_v38 = vpack.c.bf16 %v1189_v10, %v1189_v10  ;;  %vm6753_vm10 = vmmov %vm6752_vm5 }
 0x333   : > { %3804 = vmatprep.subr.msk.bf16.mxu1 %vm6750_vm11, %v1278_v35  ;;  %v1305_v43 = vsel %vm6751_vm7, %v1277_v38, 0 }
 0x334   : > { %1337 = vmatpush1.bf16.msra.mxu1 %v1305_v43 }
 0x337   : > { %1343 = vmatmul.mubr.bf16.vlgmr.msra.gmra.mrb[0].mxu1 %v3944_v49 }
 0x338   : > { %3806 = vmatprep.mubr.msk.bf16.mxu1 %vm6752_vm5, %v3803_v51 }
 0x33f   : > { %1353 = vmatmul.mubr.bf16.gmra.mrb[4].mxu1 %v3802_v57  ;;  %v1425_v41 = vpop.permute.xlu1 %1424 }
 0x343   : > { %v1450_v53 = vpop.permute.xlu1 %1449 }
 0x347   : > { %v1455_v50 = vpop.permute.xlu1 %1454 }
 0x40a   : > { %v5179_v61 = vpop.f32.mrb[0].mxu1 }
 0x40b   : > { %v5181_v19 = vpop.f32.mrb[1].mxu1  ;;  %v1373_v54 = vmul.f32 %v5179_v61, %v5179_v61 }
 0x40c   : > { %v5185_v36 = vpop.f32.mrb[2].mxu1  ;;  %v1361_v56 = vadd.f32 %v5181_v19, %v5179_v61  ;;  %v1374_v40 = vmul.f32 %v5181_v19, %v5181_v19 }
 0x40d   : > { %v5191_v55 = vpop.f32.mrb[3].mxu1  ;;  %v1375_v58 = vmul.f32 %v5185_v36, %v5185_v36 }
 0x40e   : > { %1362 = vadd.xlane.f32.xlu0 %v1361_v56  ;;  %v1364_v59 = vadd.f32 %v5191_v55, %v5185_v36  ;;  %v1379_v60 = vadd.f32 %v1374_v40, %v1373_v54  ;;  %v1376_v48 = vmul.f32 %v5191_v55, %v5191_v55 }
 0x410   : > { %1365 = vadd.xlane.f32.xlu1 %v1364_v59  ;;  %v1382_v13 = vadd.f32 %v1376_v48, %v1375_v58 }
 0x412   : > { %1380 = vadd.xlane.f32.xlu0 %v1379_v60  ;;  %v5199_v32 = vpop.f32.mrb[4].mxu1 }
 0x413   : > { %v5201_v47 = vpop.f32.mrb[5].mxu1  ;;  %v1377_v14 = vmul.f32 %v5199_v32, %v5199_v32 }
 0x414   : > { %v1367_v62 = vadd.f32 %v5201_v47, %v5199_v32  ;;  %v1378_v63 = vmul.f32 %v5201_v47, %v5201_v47  ;;  %v1358_v0 = vpop.f32.mrb[6].mxu1 }
 0x415   : > { %v1359_v4 = vpop.f32.mrb[7].mxu1 }
 0x416   : > { %1383 = vadd.xlane.f32.xlu0 %v1382_v13  ;;  %1368 = vadd.xlane.f32.xlu1 %v1367_v62  ;;  %v1385_v9 = vadd.f32 %v1378_v63, %v1377_v14  ;;  %v1469_v14 = vstv %s3813_s15  ;;  %v1477_v62 = vstv %s3814_s8 }
 0x41a   : > { %1386 = vadd.xlane.f32.xlu0 %v1385_v9 }
 0x427   : > { %1459 = vperm.xlu1 %3940, %v3812_v11  }
 0x430   : > { %1434 = vperm.xlu0 %3941, %v3809_v15  }
 0x49b   : > { %v1363_v22 = vpop.xlane.xlu0 %1362 }
 0x49c   : > { %v1370_v1 = vmul.f32 0.00390625, %v1363_v22 }
 0x49d   : > { %v1366_v23 = vpop.xlane.xlu1 %1365 }
 0x49e   : > { %v1371_v25 = vmul.f32 0.00390625, %v1366_v23  ;;  %v1391_v27 = vmul.f32 %v1370_v1, %v1370_v1  ;;  %v1404_v51 = vsub.f32 %v5179_v61, %v1370_v1  ;;  %v1405_v57 = vsub.f32 %v5181_v19, %v1370_v1 }
 0x49f   : > { %v1381_v24 = vpop.xlane.xlu0 %1380  ;;  %v1470_v23 = vmul.f32 %v1469_v14, %v5179_v61 }
 0x4a0   : > { %v1388_v28 = vmul.f32 0.00390625, %v1381_v24  ;;  %v1392_v34 = vmul.f32 %v1371_v25, %v1371_v25  ;;  %v1406_v58 = vsub.f32 %v5185_v36, %v1371_v25  ;;  %v1407_v59 = vsub.f32 %v5191_v55, %v1371_v25 }
 0x4a1   : > { %v1471_v24 = vmul.f32 %v1469_v14, %v5181_v19 }
 0x4a2   : > { %v1394_v29 = vsub.f32 %v1388_v28, %v1391_v27 }
 0x4a3   : > { %v1384_v30 = vpop.xlane.xlu0 %1383  ;;  %v1369_v33 = vpop.xlane.xlu1 %1368 }
 0x4a4   : > { %v1397_v21 = vmax.f32 %v1394_v29, 0.0  ;;  %v1389_v52 = vmul.f32 0.00390625, %v1384_v30  ;;  %v5215_v45 = vmul.f32 0.00390625, %v1369_v33  ;;  %v1472_v30 = vmul.f32 %v1469_v14, %v5185_v36 }
 0x4a5   : > { %v1473_v33 = vmul.f32 %v1469_v14, %v5191_v55 }
 0x4a6   : > { %v1410_v20 = vadd.f32 1e-05, %v1397_v21  ;;  %v1395_v7 = vsub.f32 %v1389_v52, %v1392_v34  ;;  %v1393_v44 = vmul.f32 %v5215_v45, %v5215_v45  ;;  %v1408_v36 = vsub.f32 %v5199_v32, %v5215_v45 }
 0x4a7   : > { %v1387_v10 = vpop.xlane.xlu0 %1386 }
 0x4a8   : > { %3975 = vrsqrt.f32 %v1410_v20  ;;  %v1398_v46 = vmax.f32 %v1395_v7, 0.0  ;;  %v1390_v35 = vmul.f32 0.00390625, %v1387_v10 }
 0x4aa   : > { %v1411_v38 = vadd.f32 1e-05, %v1398_v46  ;;  %v1396_v39 = vsub.f32 %v1390_v35, %v1393_v44 }
 0x4ac   : > { %3977 = vrsqrt.f32 %v1411_v38  ;;  %v1399_v43 = vmax.f32 %v1396_v39, 0.0 }
 0x4ae   : > { %v1412_v49 = vadd.f32 1e-05, %v1399_v43  ;;  %v1460_v43 = vpop.permute.xlu1 %1459 }
 0x4af   : > { %v1435_v55 = vpop.permute.xlu0 %1434 }
 0x4b0   : > { %3979 = vrsqrt.f32 %v1412_v49 }
 0x4b2   : > { %v3976_v54 = vpop.eup %3975 }
 0x4b3   : > { %v1416_v56 = vmul.f32 %v3976_v54, %v1404_v51  ;;  %v1417_v40 = vmul.f32 %v3976_v54, %v1405_v57 }
 0x4b5   : > { %v1437_v60 = vmul.f32 %v1425_v41, %v1416_v56  ;;  %v1438_v48 = vmul.f32 %v1425_v41, %v1417_v40  ;;  %v1475_v40 = vmul.f32 %v1469_v14, %v5201_v47 }
 0x4b6   : > { %v3978_v13 = vpop.eup %3977 }
 0x4b7   : > { %v1462_v63 = vadd.f32 %v1450_v53, %v1437_v60  ;;  %v1463_v0 = vadd.f32 %v1450_v53, %v1438_v48  ;;  %v1418_v4 = vmul.f32 %v3978_v13, %v1406_v58  ;;  %v1419_v9 = vmul.f32 %v3978_v13, %v1407_v59 }
 0x4b8   : > { %v1474_v60 = vmul.f32 %v1469_v14, %v5199_v32  ;;  %v3825_v14 = vld [vmem:[%s6675_s4 + $0x30] sm:$0xff] }
 0x4b9   : > { %v1439_v11 = vmul.f32 %v1430_v37, %v1418_v4  ;;  %v1440_v15 = vmul.f32 %v1430_v37, %v1419_v9  ;;  %v1479_v22 = vmul.f32 %v1477_v62, %v1463_v0  ;;  %v1478_v1 = vmul.f32 %v1477_v62, %v1462_v63  ;;  %v3828_v0 = vld [vmem:[%s6676_s5 + $0x30] sm:$0xff]  ;;  %v3829_v4 = vld [vmem:[%s6676_s5 + $0x38] sm:$0xff] }
 0x4ba   : > { %v3980_v41 = vpop.eup %3979  ;;  %v1409_v37 = vsub.f32 %v5201_v47, %v5215_v45  ;;  %v3951_v9 = vld [vmem:[%s6674_s3 + $0x1c] ss:$8 sps:$4 sm:$0xff]  }
 0x4bb   : > { %v1464_v27 = vadd.f32 %v1455_v50, %v1439_v11  ;;  %v1465_v28 = vadd.f32 %v1455_v50, %v1440_v15  ;;  %v1485_v25 = vadd.f32 %v1479_v22, %v1471_v24  ;;  %v1484_v29 = vadd.f32 %v1478_v1, %v1470_v23  ;;  %3823 = vmatprep.mubr.msk.bf16.mxu0 %vm6753_vm10, %v3951_v9  ;;  %v5310_v11 = vld [vmem:[%s6672_s1] sm:$0x3]  ;;  %v5316_v15 = vld [vmem:[%s6672_s1 + $0x2] sm:$0x3] }
 0x4bc   : > { %v1421_v7 = vmul.f32 %v3980_v41, %v1409_v37  ;;  %v1420_v38 = vmul.f32 %v3980_v41, %v1408_v36  ;;  %vm363_vm2 = vcmp.ge.s32.totalorder %v5310_v11, 4  ;;  %vm6697_vm8 = vcmp.ge.s32.totalorder %v5316_v15, 4 }
 0x4bd   : > { %v1480_v53 = vmul.f32 %v1477_v62, %v1464_v27  ;;  %v1481_v21 = vmul.f32 %v1477_v62, %v1465_v28  ;;  %v1491_v52 = vmul.f32 0.2, %v1485_v25  ;;  %v1490_v34 = vmul.f32 0.2, %v1484_v29  ;;  %vm365_vm12 = vmand %vm363_vm2, %vm6697_vm8 }
 0x4be   : > { %v1442_v39 = vmul.f32 %v1435_v55, %v1421_v7  ;;  %v1441_v49 = vmul.f32 %v1435_v55, %v1420_v38  ;;  %v1521_v23 = vsel %vm365_vm12, 1, %v4331_v8  ;;  %vm6698_vm7 = vcmp.lt.s32.totalorder %v5316_v15, 12 }
 0x4bf   : > { %v1486_v20 = vadd.f32 %v1480_v53, %v1472_v30  ;;  %v1487_v61 = vadd.f32 %v1481_v21, %v1473_v33  ;;  %v5229_v19 = vmax.f32 %v1485_v25, %v1491_v52  ;;  %v5231_v50 = vmax.f32 %v1484_v29, %v1490_v34  ;;  %vm367_vm10 = vmand %vm363_vm2, %vm6698_vm7 }
 0x4c0   : > { %v1467_v51 = vadd.f32 %v1460_v43, %v1442_v39  ;;  %v1466_v54 = vadd.f32 %v1460_v43, %v1441_v49  ;;  %v1525_v24 = vrot.slane %v1521_v23, %v4430_v2  ;;  %v1529_v27 = vrot.slane %v1521_v23, %v4437_v3 }
 0x4c1   : > { %v1492_v10 = vmul.f32 0.2, %v1486_v20  ;;  %v1493_v44 = vmul.f32 0.2, %v1487_v61  ;;  %1550 = vrot.lane.b32.xlu1 %v5229_v19, %s4343_s16  ;;  %1502 = vrot.lane.b32.xlu0 %v5231_v50, %s4344_s17  ;;  %v1563_v36 = vsel %vm363_vm2, 1, %v4331_v8  ;;  %v1605_v39 = vsel %vm367_vm10, 1, %v4331_v8 }
 0x4c2   : > { %v1483_v56 = vmul.f32 %v1477_v62, %v1467_v51  ;;  %v1482_v58 = vmul.f32 %v1477_v62, %v1466_v54  ;;  %v3826_v62 = vld [vmem:[%s6675_s4 + $0x38] sm:$0xff]  ;;  %vm5327_vm1 = vcmp.eq.s32.totalorder %v1525_v24, 1  ;;  %vm5331_vm4 = vcmp.eq.s32.totalorder %v1529_v27, 1 }
 0x4c3   : > { %v5239_v46 = vmax.f32 %v1486_v20, %v1492_v10  ;;  %v5241_v35 = vmax.f32 %v1487_v61, %v1493_v44  ;;  %vm4079_vm11 = vmpackc.low %vm5331_vm4, %vm5331_vm4  ;;  %v1567_v43 = vrot.slane %v1563_v36, %v4430_v2  ;;  %v1571_v49 = vrot.slane %v1563_v36, %v4437_v3 }
 0x4c4   : > { %v1489_v59 = vadd.f32 %v1483_v56, %v1475_v40  ;;  %v1488_v48 = vadd.f32 %v1482_v58, %v1474_v60  ;;  %vm4082_vm5 = vmpackc.low %vm5327_vm1, %vm5327_vm1  ;;  %vm1556_vm12 = vcmp.lt.s32.totalorder %v4469_v12, 64  ;;  %v1613_v51 = vrot.slane %v1605_v39, %v4437_v3 }
 0x4c5   : > { %1508 = vrot.lane.b32.xlu0 %v5229_v19, %s4344_s17  ;;  %1504 = vrot.lane.b32.xlu1 %v5239_v46, %s4344_s17  ;;  %v1854_v45 = vpack.c.bf16 %v5241_v35, %v5229_v19  ;;  %v1853_v57 = vpack.c.bf16 %v5239_v46, %v5231_v50  ;;  %vm1598_vm2 = vcmp.lt.s32.totalorder %v4469_v12, 60 }
 0x4c6   : > { %v1495_v13 = vmul.f32 0.2, %v1489_v59  ;;  %v1494_v47 = vmul.f32 0.2, %v1488_v48  ;;  %vm5382_vm10 = vcmp.eq.s32.totalorder %v1613_v51, 1 }
 0x4c8   : > { %v5264_v63 = vmax.f32 %v1489_v59, %v1495_v13  ;;  %v5270_v32 = vmax.f32 %v1488_v48, %v1494_v47  ;;  %v1609_v48 = vrot.slane %v1605_v39, %v4430_v2 }
 0x4c9   : > { %1544 = vrot.lane.b32.xlu0 %v5231_v50, %s4343_s16  ;;  %1510 = vrot.lane.b32.xlu1 %v5241_v35, %s4344_s17 }
 0x4ca   : > { %vm5398_vm15 = vcmp.eq.s32.totalorder %v1609_v48, 1 }
 0x4cd   : > { %1586 = vrot.lane.b32.xlu0 %v5231_v50, %s4345_s19  ;;  %1588 = vrot.lane.b32.xlu1 %v5239_v46, %s4345_s19 }
 0x4d1   : > { %1592 = vrot.lane.b32.xlu0 %v5229_v19, %s4345_s19  ;;  %1594 = vrot.lane.b32.xlu1 %v5241_v35, %s4345_s19 }
 0x4d5   : > { %1546 = vrot.lane.b32.xlu0 %v5239_v46, %s4343_s16  ;;  %1634 = vrot.lane.b32.xlu1 %v5229_v19, %s4346_s20 }
 0x4d9   : > { %1552 = vrot.lane.b32.xlu0 %v5241_v35, %s4343_s16  ;;  %1512 = vrot.lane.b32.xlu1 %v5264_v63, %s4344_s17 }
 0x4dd   : > { %1548 = vrot.lane.b32.xlu1 %v5270_v32, %s4343_s16  ;;  %1506 = vrot.lane.b32.xlu0 %v5270_v32, %s4344_s17 }
 0x4e1   : > { %1554 = vrot.lane.b32.xlu1 %v5264_v63, %s4343_s16  ;;  %1628 = vrot.lane.b32.xlu0 %v5231_v50, %s4346_s20 }
 0x4e5   : > { %1596 = vrot.lane.b32.xlu1 %v5264_v63, %s4345_s19  ;;  %1630 = vrot.lane.b32.xlu0 %v5239_v46, %s4346_s20 }
 0x4e9   : > { %1632 = vrot.lane.b32.xlu1 %v5270_v32, %s4346_s20  ;;  %1590 = vrot.lane.b32.xlu0 %v5270_v32, %s4345_s19 }
 0x4ed   : > { %1638 = vrot.lane.b32.xlu1 %v5264_v63, %s4346_s20  ;;  %1636 = vrot.lane.b32.xlu0 %v5241_v35, %s4346_s20  ;;  %s3867_s20 = sld [smem:[#allocation4 + $0x200]] }
 0x4f1   : > { %1682 = vrot.lane.b32.xlu1 %v5229_v19, %s4347_s21  ;;  %1676 = vrot.lane.b32.xlu0 %v5231_v50, %s4347_s21 }
 0x4f5   : > { %1680 = vrot.lane.b32.xlu1 %v5270_v32, %s4347_s21  ;;  %1678 = vrot.lane.b32.xlu0 %v5239_v46, %s4347_s21 }
 0x4f9   : > { %1686 = vrot.lane.b32.xlu1 %v5264_v63, %s4347_s21  ;;  %1684 = vrot.lane.b32.xlu0 %v5241_v35, %s4347_s21  ;;  %s3849_s21 = sld [smem:[#allocation4 + $0x180]] }
 0x4fd   : > { %2014 = vperm.xlu1 %3940, %v3825_v14   ;;  %2019 = vperm.xlu0 %3941, %v3826_v62  }
 0x501   : > { %2039 = vperm.xlu1 %3940, %v3828_v0  }
 0x505   : > { %2044 = vperm.xlu1 %3940, %v3829_v4  }
 0x533   : > { %v1503_v22 = vpop.permute.xlu0 %1502  ;;  %v1551_v1 = vpop.permute.xlu1 %1550 }
 0x537   : > { %v1509_v28 = vpop.permute.xlu0 %1508  ;;  %v1505_v25 = vpop.permute.xlu1 %1504 }
 0x538   : > { %v1515_v30 = vsel %vm1514_vm3, %v1503_v22, %v1509_v28  ;;  %v1518_v33 = vsel %vm1514_vm3, %v1509_v28, %v1503_v22  ;;  %v1647_v28 = vsel %vm6697_vm8, 1, %v4331_v8 }
 0x539   : > { %v1655_v41 = vrot.slane %v1647_v28, %v4437_v3 }
 0x53b   : > { %v1545_v53 = vpop.permute.xlu0 %1544  ;;  %v1511_v21 = vpop.permute.xlu1 %1510 }
 0x53c   : > { %v1516_v37 = vsel %vm1514_vm3, %v1505_v25, %v1511_v21  ;;  %v1519_v52 = vsel %vm1514_vm3, %v1511_v21, %v1505_v25  ;;  %v1557_v59 = vsel %vm1556_vm12, %v1545_v53, %v1551_v1  ;;  %v1560_v60 = vsel %vm1556_vm12, %v1551_v1, %v1545_v53 }
 0x53d   : > { %v5346_v61 = vpack.c.bf16 %v1516_v37, %v1515_v30  ;;  %v5353_v7 = vpack.c.bf16 %v1519_v52, %v1518_v33  ;;  %v1651_v52 = vrot.slane %v1647_v28, %v4430_v2 }
 0x53f   : > { %v1587_v34 = vpop.permute.xlu0 %1586  ;;  %v1589_v20 = vpop.permute.xlu1 %1588  ;;  %4081 = vmatprep.subr.msk.bf16.mxu0 %vm4079_vm11, %v5346_v61  ;;  %vm5368_vm11 = vcmp.eq.s32.totalorder %v1567_v43, 1 }
 0x540   : > { %4084 = vmatpush1.bf16.msk.msra.mxu0 %vm4082_vm5, %v5353_v7  ;;  %vm5372_vm5 = vcmp.eq.s32.totalorder %v1571_v49, 1  ;;  %vm4088_vm8 = vmpackc.low %vm5368_vm11, %vm5327_vm1  ;;  %vm5442_vm1 = vcmp.eq.s32.totalorder %v1651_v52, 1 }
 0x543   : > { %v1593_v10 = vpop.permute.xlu0 %1592  ;;  %v1595_v44 = vpop.permute.xlu1 %1594 }
 0x544   : > { %v1599_v4 = vsel %vm1598_vm2, %v1587_v34, %v1593_v10  ;;  %v1600_v9 = vsel %vm1598_vm2, %v1589_v20, %v1595_v44  ;;  %v1602_v24 = vsel %vm1598_vm2, %v1593_v10, %v1587_v34  ;;  %v1603_v27 = vsel %vm1598_vm2, %v1595_v44, %v1589_v20 }
 0x545   : > { %v5457_v43 = vpack.c.bf16 %v1600_v9, %v1599_v4  ;;  %v5475_v40 = vpack.c.bf16 %v1603_v27, %v1602_v24 }
 0x547   : > { %v1547_v55 = vpop.permute.xlu0 %1546  ;;  %v1635_v38 = vpop.permute.xlu1 %1634 }
 0x54b   : > { %v1553_v54 = vpop.permute.xlu0 %1552  ;;  %v1513_v56 = vpop.permute.xlu1 %1512 }
 0x54c   : > { %v1558_v22 = vsel %vm1556_vm12, %v1547_v55, %v1553_v54  ;;  %v1561_v1 = vsel %vm1556_vm12, %v1553_v54, %v1547_v55  ;;  %v1695_v54 = vsel %vm6698_vm7, 1, %v4331_v8 }
 0x54d   : > { %v1703_v58 = vrot.slane %v1695_v54, %v4437_v3  ;;  %v1699_v48 = vrot.slane %v1695_v54, %v4430_v2 }
 0x54f   : > { %v1507_v47 = vpop.permute.xlu0 %1506  ;;  %v1549_v14 = vpop.permute.xlu1 %1548  ;;  %vm5503_vm7 = vcmp.eq.s32.totalorder %v1703_v58, 1 }
 0x550   : > { %v1517_v62 = vsel %vm1514_vm3, %v1507_v47, %v1513_v56  ;;  %v1520_v0 = vsel %vm1514_vm3, %v1513_v56, %v1507_v47  ;;  %vm4085_vm3 = vmpackc.low %vm5372_vm5, %vm5331_vm4 }
 0x551   : > { %v5417_v21 = vpack.c.bf16 %v1557_v59, %v1517_v62  ;;  %v5424_v37 = vpack.c.bf16 %v1560_v60, %v1520_v0  ;;  %vm4091_vm4 = vmpackc.low %vm5372_vm5, %vm5372_vm5  ;;  %vm368_vm5 = vcmp.lt.s32.totalorder %v5310_v11, 12 }
 0x553   : > { %v1629_v25 = vpop.permute.xlu0 %1628  ;;  %v1555_v30 = vpop.permute.xlu1 %1554  ;;  %4087 = vmatprep.subr.msk.bf16.mxu0 %vm4085_vm3, %v5417_v21  ;;  %vm5446_vm3 = vcmp.eq.s32.totalorder %v1655_v41, 1  ;;  %v1741_v41 = vsel %vm368_vm5, 1, %v4331_v8 }
 0x554   : > { %v1559_v33 = vsel %vm1556_vm12, %v1549_v14, %v1555_v30  ;;  %v1562_v53 = vsel %vm1556_vm12, %v1555_v30, %v1549_v14  ;;  %4090 = vmatpush1.bf16.msk.msra.mxu0 %vm4088_vm8, %v5424_v37  ;;  %vm1640_vm12 = vcmp.lt.s32.totalorder %v4469_v12, 4  ;;  %vm4094_vm8 = vmpackc.low %vm5368_vm11, %vm5368_vm11 }
 0x555   : > { %v5433_v29 = vpack.c.bf16 %v1559_v33, %v1558_v22  ;;  %v5439_v10 = vpack.c.bf16 %v1562_v53, %v1561_v1  ;;  %v1641_v55 = vsel %vm1640_vm12, %v1629_v25, %v1635_v38  ;;  %v1644_v39 = vsel %vm1640_vm12, %v1635_v38, %v1629_v25  ;;  %vm4097_vm11 = vmpackc.low %vm5382_vm10, %vm5382_vm10 }
 0x557   : > { %v1631_v34 = vpop.permute.xlu0 %1630  ;;  %v1597_v20 = vpop.permute.xlu1 %1596  ;;  %4093 = vmatprep.subr.msk.bf16.mxu0 %vm4091_vm4, %v5433_v29  ;;  %vm4100_vm4 = vmpackc.low %vm5398_vm15, %vm5398_vm15 }
 0x558   : > { %4096 = vmatpush1.bf16.msk.msra.mxu0 %vm4094_vm8, %v5439_v10  ;;  %vm1688_vm8 = vcmp.lt.s32.totalorder %v4469_v12, 124 }
 0x559   : > { %4099 = vmatprep.subr.msk.bf16.mxu0 %vm4097_vm11, %v5457_v43  ;;  %vm6770_vm11 = vcmp.ge.s32.totalorder %v5316_v15, 4 }
 0x55b   : > { %v1591_v49 = vpop.permute.xlu0 %1590  ;;  %v1633_v51 = vpop.permute.xlu1 %1632 }
 0x55c   : > { %v5466_v56 = vsel %vm1598_vm2, %v1591_v49, %v1597_v20  ;;  %v5470_v38 = vsel %vm1598_vm2, %v1597_v20, %v1591_v49  ;;  %4102 = vmatpush1.bf16.msk.msra.mxu0 %vm4100_vm4, %v5475_v40  ;;  %vm369_vm2 = vmand %vm368_vm5, %vm6770_vm11 }
 0x55d   : > { %vm4103_vm4 = vmpackc.low %vm5446_vm3, %vm5382_vm10  ;;  %v4104_v4 = vpack.c.bf16 %v1641_v55, %v5466_v56  ;;  %v4107_v9 = vpack.c.bf16 %v1644_v39, %v5470_v38  ;;  %v1718_v13 = vsel %vm369_vm2, 1, %v4331_v8  ;;  %v1745_v39 = vrot.slane %v1741_v41, %v4430_v2 }
 0x55e   : > { %vm4106_vm11 = vmpackc.low %vm5442_vm1, %vm5398_vm15  ;;  %vm5513_vm15 = vcmp.eq.s32.totalorder %v1699_v48, 1  ;;  %v1726_v33 = vrot.slane %v1718_v13, %v4437_v3  ;;  %v1722_v35 = vrot.slane %v1718_v13, %v4430_v2 }
 0x55f   : > { %v1637_v59 = vpop.permute.xlu0 %1636  ;;  %v1639_v60 = vpop.permute.xlu1 %1638  ;;  %4105 = vmatprep.subr.msk.bf16.mxu0 %vm4103_vm4, %v4104_v4  ;;  %vm4109_vm10 = vmpackc.low %vm5446_vm3, %vm5446_vm3  ;;  %vm6778_vm4 = vcmp.lt.s32.totalorder %v5316_v15, 12 }
 0x560   : > { %v1642_v47 = vsel %vm1640_vm12, %v1631_v34, %v1637_v59  ;;  %v1645_v14 = vsel %vm1640_vm12, %v1637_v59, %v1631_v34  ;;  %v1643_v62 = vsel %vm1640_vm12, %v1633_v51, %v1639_v60  ;;  %v1646_v0 = vsel %vm1640_vm12, %v1639_v60, %v1633_v51  ;;  %4108 = vmatpush1.bf16.msk.msra.mxu0 %vm4106_vm11, %v4107_v9  ;;  %vm4112_vm12 = vmpackc.low %vm5442_vm1, %vm5442_vm1  ;;  %v3827_v34 = vld [vmem:[%s6675_s4 + $0x40] sm:$0xff] }
 0x561   : > { %v4110_v23 = vpack.c.bf16 %v1643_v62, %v1642_v47  ;;  %v4113_v30 = vpack.c.bf16 %v1646_v0, %v1645_v14  ;;  %vm5532_vm3 = vcmp.eq.s32.totalorder %v1726_v33, 1  ;;  %vm6777_vm1 = vmmov 1   ;;  %vm370_vm11 = vmand %vm368_vm5, %vm6778_vm4 }
 0x562   : > { %vm4115_vm2 = vmpackc.low %vm5503_vm7, %vm6777_vm1  ;;  %vm5558_vm5 = vcmp.eq.s32.totalorder %v1722_v35, 1  ;;  %v1764_v49 = vsel %vm370_vm11, 1, %v4331_v8  ;;  %vm5579_vm11 = vcmp.eq.s32.totalorder %v1745_v39, 1 }
 0x563   : > { %v1677_v1 = vpop.permute.xlu0 %1676  ;;  %v1683_v24 = vpop.permute.xlu1 %1682  ;;  %4111 = vmatprep.subr.msk.bf16.mxu0 %vm4109_vm10, %v4110_v23  ;;  %vm4118_vm10 = vmpackc.low %vm5513_vm15, %vm6777_vm1  ;;  %v1772_v58 = vrot.slane %v1764_v49, %v4437_v3  ;;  %v1768_v60 = vrot.slane %v1764_v49, %v4430_v2 }
 0x564   : > { %v1692_v27 = vsel %vm1688_vm8, %v1683_v24, %v1677_v1  ;;  %v1689_v25 = vsel %vm1688_vm8, %v1677_v1, %v1683_v24  ;;  %4114 = vmatpush1.bf16.msk.msra.mxu0 %vm4112_vm12, %v4113_v30  ;;  %vm4127_vm4 = vmpackc.low %vm5532_vm3, %vm5532_vm3 }
 0x565   : > { %1912 = vmatprep.subr.bf16.mxu0 %v1854_v45  ;;  %v4116_v19 = vpack.c.bf16 %v1692_v27, %v5264_v63  ;;  %v1749_v45 = vrot.slane %v1741_v41, %v4437_v3  ;;  %v4119_v36 = vpack.c.bf16 %v1689_v25, %v5270_v32  ;;  %v3830_v41 = vld [vmem:[%s6676_s5 + $0x40] sm:$0xff] }
 0x567   : > { %v1679_v53 = vpop.permute.xlu0 %1678  ;;  %v1681_v52 = vpop.permute.xlu1 %1680  ;;  %vm5564_vm12 = vcmp.eq.s32.totalorder %v1749_v45, 1 }
 0x568   : > { %1913 = vmatpush1.bf16.msra.mxu0 %v1853_v57 }
 0x569   : > { %4117 = vmatprep.subr.msk.bf16.mxu0 %vm4115_vm2, %v4116_v19  ;;  %vm4124_vm2 = vmpackc.low %vm5513_vm15, %vm5513_vm15  ;;  %vm1774_vm15 = vcmp.eq.s32.totalorder %v1772_v58, 1 }
 0x56b   : > { %v1685_v20 = vpop.permute.xlu0 %1684  ;;  %v1687_v44 = vpop.permute.xlu1 %1686 }
 0x56c   : > { %v1690_v50 = vsel %vm1688_vm8, %v1679_v53, %v1685_v20  ;;  %v1693_v46 = vsel %vm1688_vm8, %v1685_v20, %v1679_v53  ;;  %v1691_v57 = vsel %vm1688_vm8, %v1681_v52, %v1687_v44  ;;  %v1694_v63 = vsel %vm1688_vm8, %v1687_v44, %v1681_v52  ;;  %4120 = vmatpush1.bf16.msk.msra.mxu0 %vm4118_vm10, %v4119_v36  ;;  %vm4121_vm8 = vmpackc.low %vm5503_vm7, %vm5503_vm7 }
 0x56d   : > { %v4122_v54 = vpack.c.bf16 %v1694_v63, %v1693_v46  ;;  %v4125_v32 = vpack.c.bf16 %v1691_v57, %v1690_v50  ;;  %vm4130_vm7 = vmpackc.low %vm5558_vm5, %vm5558_vm5 }
 0x56e   : > { %vm4133_vm10 = vmpackc.low %vm5564_vm12, %vm5532_vm3 }
 0x56f   : > { %4123 = vmatprep.subr.msk.bf16.mxu0 %vm4121_vm8, %v4122_v54  ;;  %vm1773_vm8 = vcmp.eq.s32.totalorder %v1768_v60, 1  ;;  %vm4142_vm3 = vmpackc.low %vm5579_vm11, %vm5579_vm11 }
 0x570   : > { %4126 = vmatpush1.bf16.msk.msra.mxu0 %vm4124_vm2, %v4125_v32  ;;  %vm4136_vm2 = vmpackc.low %vm5579_vm11, %vm5558_vm5  ;;  %vm6787_vm11 = vcmask 719872  }
 0x571   : > { %4129 = vmatprep.subr.msk.bf16.mxu0 %vm4127_vm4, %v5353_v7  ;;  %vm4139_vm4 = vmpackc.low %vm5564_vm12, %vm5564_vm12  ;;  %v1780_v7 = vsel %vm1774_vm15, %v5470_v38, 0.0  ;;  %vm6785_vm12 = vcmask 1043456  }
 0x572   : > { %vm4148_vm5 = vmpackc.low %vm1773_vm8, %vm1773_vm8 }
 0x574   : > { %4132 = vmatpush1.bf16.msk.msra.mxu0 %vm4130_vm7, %v5346_v61  ;;  %v1779_v61 = vsel %vm1773_vm8, %v5466_v56, 0.0  ;;  %vm4145_vm7 = vmpackc.low %vm1774_vm15, %vm1774_vm15  ;;  %vm372_vm8 = vcmp.ge.s32.totalorder %v5316_v15, 8 }
 0x575   : > { %4135 = vmatprep.subr.msk.bf16.mxu0 %vm4133_vm10, %v5424_v37  ;;  %v1867_v37 = vpack.c.bf16 %v1779_v61, %v1779_v61  ;;  %vm6786_vm10 = vmmov %vm6785_vm12 }
 0x576   : > { %vm6788_vm15 = vmmov %vm6787_vm11 }
 0x577   : > { %v1895_v56 = vsel %vm6786_vm10, %v1867_v37, 0 }
 0x578   : > { %4138 = vmatpush1.bf16.msk.msra.mxu0 %vm4136_vm2, %v5417_v21  ;;  %v1868_v21 = vpack.c.bf16 %v1780_v7, %v1780_v7  ;;  %vm371_vm2 = vcmp.ge.s32.totalorder %v5310_v11, 8 }
 0x579   : > { %4141 = vmatprep.subr.msk.bf16.mxu0 %vm4139_vm4, %v5439_v10  ;;  %v3817_v10 = vld [vmem:[%s6674_s3 + $0x28] sm:$0xff]  ;;  %vm373_vm4 = vmand %vm371_vm2, %vm372_vm8 }
 0x57a   : > { %v3821_v38 = vcombine.high %v3817_v10, %v3817_v10 }
 0x57c   : > { %4144 = vmatpush1.bf16.msk.msra.mxu0 %vm4142_vm3, %v5433_v29  ;;  %v3949_v29 = vld [vmem:[%s6674_s3 + $0x18] ss:$8 sps:$4 sm:$0xff]   ;;  %v2015_v19 = vpop.permute.xlu1 %2014  ;;  %v2020_v45 = vpop.permute.xlu0 %2019  ;;  %vm2104_vm3 = vcmp.lt.s32.totalorder %v4469_v12, 8 }
 0x57d   : > { %4147 = vmatprep.subr.msk.bf16.mxu0 %vm4145_vm7, %v5475_v40  ;;  %v3820_v40 = vcombine.low %v3817_v10, %v3817_v10  ;;  %vm374_vm7 = vcmp.lt.s32.totalorder %v5316_v15, 8 }
 0x57e   : > { %vm375_vm10 = vmand %vm371_vm2, %vm374_vm7 }
 0x580   : > { %4150 = vmatpush1.bf16.msk.msra.mxu0 %vm4148_vm5, %v5457_v43  ;;  %v2040_v35 = vpop.permute.xlu1 %2039 }
 0x581   : > { %3822 = vmatprep.subr.msk.bf16.mxu0 %vm6785_vm12, %v1868_v21 }
 0x584   : > { %1927 = vmatpush1.bf16.msra.mxu0 %v1895_v56  ;;  %v2045_v20 = vpop.permute.xlu1 %2044 }
 0x587   : > { %1933 = vmatmul.mubr.bf16.vlgmr.msra.gmra.mrb[8].mxu0 %v3949_v29 }
 0x588   : > { %3824 = vmatprep.mubr.msk.bf16.mxu0 %vm6787_vm11, %v3821_v38 }
 0x58f   : > { %1943 = vmatmul.mubr.bf16.gmra.mrb[12].mxu0 %v3820_v40 }
 0x65a   : > { %v5619_v43 = vpop.f32.mrb[8].mxu0 }
 0x65b   : > { %v1963_v48 = vmul.f32 %v5619_v43, %v5619_v43  ;;  %v5623_v47 = vpop.f32.mrb[9].mxu0 }
 0x65c   : > { %v1964_v14 = vmul.f32 %v5623_v47, %v5623_v47  ;;  %v5627_v62 = vpop.f32.mrb[10].mxu0  ;;  %v1951_v0 = vadd.f32 %v5623_v47, %v5619_v43 }
 0x65d   : > { %v1965_v4 = vmul.f32 %v5627_v62, %v5627_v62  ;;  %v5633_v9 = vpop.f32.mrb[11].mxu0 }
 0x65e   : > { %v1966_v22 = vmul.f32 %v5633_v9, %v5633_v9  ;;  %1952 = vadd.xlane.f32.xlu0 %v1951_v0  ;;  %v1954_v13 = vadd.f32 %v5633_v9, %v5627_v62  ;;  %v1969_v1 = vadd.f32 %v1964_v14, %v1963_v48 }
 0x660   : > { %1955 = vadd.xlane.f32.xlu1 %v1954_v13  ;;  %v1972_v24 = vadd.f32 %v1966_v22, %v1965_v4  ;;  %v2059_v13 = vstv %s3831_s30  ;;  %s3850_s30 = sld [smem:[#allocation4 + $0x181]] }
 0x662   : > { %1970 = vadd.xlane.f32.xlu0 %v1969_v1  ;;  %v5639_v27 = vpop.f32.mrb[12].mxu0 }
 0x663   : > { %v1967_v23 = vmul.f32 %v5639_v27, %v5639_v27  ;;  %v5643_v28 = vpop.f32.mrb[13].mxu0 }
 0x664   : > { %v1968_v25 = vmul.f32 %v5643_v28, %v5643_v28  ;;  %v1957_v30 = vadd.f32 %v5643_v28, %v5639_v27  ;;  %v1948_v33 = vpop.f32.mrb[14].mxu0 }
 0x665   : > { %v1949_v53 = vpop.f32.mrb[15].mxu0  ;;  %v2067_v33 = vstv %s3832_s10 }
 0x666   : > { %1973 = vadd.xlane.f32.xlu0 %v1972_v24  ;;  %1958 = vadd.xlane.f32.xlu1 %v1957_v30  ;;  %v1975_v52 = vadd.f32 %v1968_v25, %v1967_v23 }
 0x66a   : > { %1976 = vadd.xlane.f32.xlu0 %v1975_v52 }
 0x677   : > { %2049 = vperm.xlu1 %3940, %v3830_v41  }
 0x680   : > { %2024 = vperm.xlu0 %3941, %v3827_v34  }
 0x6eb   : > { %v1953_v44 = vpop.xlane.xlu0 %1952 }
 0x6ec   : > { %v1960_v50 = vmul.f32 0.00390625, %v1953_v44  ;;  %v2060_v44 = vmul.f32 %v2059_v13, %v5619_v43 }
 0x6ed   : > { %v1956_v46 = vpop.xlane.xlu1 %1955 }
 0x6ee   : > { %v1961_v63 = vmul.f32 0.00390625, %v1956_v46  ;;  %v1981_v36 = vmul.f32 %v1960_v50, %v1960_v50  ;;  %v1994_v48 = vsub.f32 %v5619_v43, %v1960_v50  ;;  %v1995_v14 = vsub.f32 %v5623_v47, %v1960_v50 }
 0x6ef   : > { %v1971_v57 = vpop.xlane.xlu0 %1970  ;;  %v2061_v50 = vmul.f32 %v2059_v13, %v5623_v47  ;;  %v2062_v47 = vmul.f32 %v2059_v13, %v5627_v62 }
 0x6f0   : > { %v1978_v55 = vmul.f32 0.00390625, %v1971_v57  ;;  %v1982_v58 = vmul.f32 %v1961_v63, %v1961_v63  ;;  %v1996_v1 = vsub.f32 %v5627_v62, %v1961_v63  ;;  %v1997_v24 = vsub.f32 %v5633_v9, %v1961_v63 }
 0x6f1   : > { %v2065_v62 = vmul.f32 %v2059_v13, %v5643_v28 }
 0x6f2   : > { %v1984_v39 = vsub.f32 %v1978_v55, %v1981_v36 }
 0x6f3   : > { %v1974_v49 = vpop.xlane.xlu0 %1973  ;;  %v1959_v51 = vpop.xlane.xlu1 %1958 }
 0x6f4   : > { %v1987_v54 = vmax.f32 %v1984_v39, 0.0  ;;  %v1979_v32 = vmul.f32 0.00390625, %v1974_v49  ;;  %v1962_v59 = vmul.f32 0.00390625, %v1959_v51 }
 0x6f6   : > { %v2000_v60 = vadd.f32 1e-05, %v1987_v54  ;;  %v1985_v61 = vsub.f32 %v1979_v32, %v1982_v58  ;;  %v1983_v7 = vmul.f32 %v1962_v59, %v1962_v59  ;;  %v1998_v46 = vsub.f32 %v5639_v27, %v1962_v59 }
 0x6f7   : > { %v1977_v21 = vpop.xlane.xlu0 %1976  ;;  %v1999_v57 = vsub.f32 %v5643_v28, %v1962_v59  ;;  %v2050_v59 = vpop.permute.xlu1 %2049 }
 0x6f8   : > { %3981 = vrsqrt.f32 %v2000_v60  ;;  %v1988_v37 = vmax.f32 %v1985_v61, 0.0  ;;  %v1980_v10 = vmul.f32 0.00390625, %v1977_v21  ;;  %v2063_v21 = vmul.f32 %v2059_v13, %v5633_v9 }
 0x6fa   : > { %v2001_v56 = vadd.f32 1e-05, %v1988_v37  ;;  %v1986_v29 = vsub.f32 %v1980_v10, %v1983_v7 }
 0x6fc   : > { %3983 = vrsqrt.f32 %v2001_v56  ;;  %v1989_v38 = vmax.f32 %v1986_v29, 0.0 }
 0x6fe   : > { %v2002_v40 = vadd.f32 1e-05, %v1989_v38 }
 0x6ff   : > { %v2025_v58 = vpop.permute.xlu0 %2024 }
 0x700   : > { %3985 = vrsqrt.f32 %v2002_v40 }
 0x702   : > { %v3982_v0 = vpop.eup %3981 }
 0x703   : > { %v2006_v4 = vmul.f32 %v3982_v0, %v1994_v48  ;;  %v2007_v22 = vmul.f32 %v3982_v0, %v1995_v14  ;;  %v2064_v14 = vmul.f32 %v2059_v13, %v5639_v27 }
 0x705   : > { %v2027_v23 = vmul.f32 %v2015_v19, %v2006_v4  ;;  %v2028_v25 = vmul.f32 %v2015_v19, %v2007_v22 }
 0x706   : > { %v3984_v30 = vpop.eup %3983 }
 0x707   : > { %v2008_v53 = vmul.f32 %v3984_v30, %v1996_v1  ;;  %v2009_v52 = vmul.f32 %v3984_v30, %v1997_v24  ;;  %v2052_v41 = vadd.f32 %v2040_v35, %v2027_v23  ;;  %v2053_v34 = vadd.f32 %v2040_v35, %v2028_v25 }
 0x709   : > { %v2029_v36 = vmul.f32 %v2020_v45, %v2008_v53  ;;  %v2030_v55 = vmul.f32 %v2020_v45, %v2009_v52  ;;  %v2068_v39 = vmul.f32 %v2067_v33, %v2052_v41  ;;  %v2069_v63 = vmul.f32 %v2067_v33, %v2053_v34  ;;  %v3844_v52 = vld [vmem:[%s6675_s4 + $0x50] sm:$0xff]  ;;  %v3843_v41 = vld [vmem:[%s6675_s4 + $0x48] sm:$0xff] }
 0x70a   : > { %v3986_v49 = vpop.eup %3985  ;;  %v3846_v34 = vld [vmem:[%s6676_s5 + $0x48] sm:$0xff] }
 0x70b   : > { %v2010_v19 = vmul.f32 %v3986_v49, %v1998_v46  ;;  %v2011_v51 = vmul.f32 %v3986_v49, %v1999_v57  ;;  %v2074_v54 = vadd.f32 %v2068_v39, %v2060_v44  ;;  %v2075_v32 = vadd.f32 %v2069_v63, %v2061_v50  ;;  %v3847_v44 = vld [vmem:[%s6676_s5 + $0x50] sm:$0xff] }
 0x70c   : > { %v2054_v60 = vadd.f32 %v2045_v20, %v2029_v36  ;;  %v2055_v35 = vadd.f32 %v2045_v20, %v2030_v55  ;;  %v3956_v50 = vld [vmem:[%s6674_s3 + $0x34] ss:$8 sps:$4 sm:$0xff]   ;;  %v2111_v57 = vsel %vm373_vm4, 1, %v4331_v8  ;;  %v2134_v36 = vsel %vm371_vm2, 1, %v4331_v8 }
 0x70d   : > { %v2031_v61 = vmul.f32 %v2025_v58, %v2010_v19  ;;  %v2032_v43 = vmul.f32 %v2025_v58, %v2011_v51  ;;  %v2080_v7 = vmul.f32 0.2, %v2074_v54  ;;  %v2081_v38 = vmul.f32 0.2, %v2075_v32  ;;  %3841 = vmatprep.mubr.msk.bf16.mxu1 %vm6788_vm15, %v3956_v50 }
 0x70e   : > { %v2070_v37 = vmul.f32 %v2067_v33, %v2054_v60  ;;  %v2071_v45 = vmul.f32 %v2067_v33, %v2055_v35  ;;  %v2115_v55 = vrot.slane %v2111_v57, %v4430_v2  ;;  %v2119_v39 = vrot.slane %v2111_v57, %v4437_v3 }
 0x70f   : > { %v2056_v10 = vadd.f32 %v2050_v59, %v2031_v61  ;;  %v2057_v56 = vadd.f32 %v2050_v59, %v2032_v43  ;;  %v5665_v29 = vmax.f32 %v2074_v54, %v2080_v7  ;;  %v5670_v1 = vmax.f32 %v2075_v32, %v2081_v38 }
 0x710   : > { %v2076_v40 = vadd.f32 %v2070_v37, %v2062_v47  ;;  %v2077_v48 = vadd.f32 %v2071_v45, %v2063_v21  ;;  %v2138_v19 = vrot.slane %v2134_v36, %v4430_v2  ;;  %v2142_v51 = vrot.slane %v2134_v36, %v4437_v3 }
 0x711   : > { %v2072_v20 = vmul.f32 %v2067_v33, %v2056_v10  ;;  %v2073_v0 = vmul.f32 %v2067_v33, %v2057_v56  ;;  %2092 = vrot.lane.b32.xlu0 %v5665_v29, %s4348_s13  ;;  %vm5727_vm5 = vcmp.eq.s32.totalorder %v2115_v55, 1  ;;  %vm5731_vm12 = vcmp.eq.s32.totalorder %v2119_v39, 1 }
 0x712   : > { %v2082_v9 = vmul.f32 0.2, %v2076_v40  ;;  %v2083_v4 = vmul.f32 0.2, %v2077_v48  ;;  %vm5747_vm11 = vcmp.eq.s32.totalorder %v2138_v19, 1  ;;  %vm5759_vm15 = vcmp.eq.s32.totalorder %v2142_v51, 1  ;;  %vm4151_vm2 = vmpackc.low %vm5731_vm12, %vm5731_vm12 }
 0x713   : > { %v2078_v22 = vadd.f32 %v2072_v20, %v2064_v14  ;;  %v2079_v24 = vadd.f32 %v2073_v0, %v2065_v62  ;;  %v2176_v37 = vsel %vm375_vm10, 1, %v4331_v8  ;;  %v2199_v45 = vsel %vm372_vm8, 1, %v4331_v8  ;;  %vm4154_vm4 = vmpackc.low %vm5727_vm5, %vm5727_vm5 }
 0x714   : > { %v5672_v23 = vmax.f32 %v2076_v40, %v2082_v9  ;;  %v5676_v27 = vmax.f32 %v2077_v48, %v2083_v4  ;;  %v2180_v48 = vrot.slane %v2176_v37, %v4430_v2  ;;  %v2184_v20 = vrot.slane %v2176_v37, %v4437_v3  ;;  %vm4157_vm10 = vmpackc.low %vm5759_vm15, %vm5731_vm12 }
 0x715   : > { %v2084_v25 = vmul.f32 0.2, %v2078_v22  ;;  %2098 = vrot.lane.b32.xlu0 %v5670_v1, %s4348_s13  ;;  %v2085_v33 = vmul.f32 0.2, %v2079_v24  ;;  %v2203_v9 = vrot.slane %v2199_v45, %v4430_v2  ;;  %v2228_v39 = vsel %vm374_vm7, 1, %v4331_v8 }
 0x716   : > { %2094 = vrot.lane.b32.xlu1 %v5672_v23, %s4348_s13  ;;  %v2387_v28 = vpack.c.bf16 %v5676_v27, %v5670_v1  ;;  %v2386_v13 = vpack.c.bf16 %v5672_v23, %v5665_v29  ;;  %vm5815_vm12 = vcmp.eq.s32.totalorder %v2184_v20, 1  ;;  %v2232_v43 = vrot.slane %v2228_v39, %v4430_v2 }
 0x717   : > { %v5678_v30 = vmax.f32 %v2078_v22, %v2084_v25  ;;  %v5686_v53 = vmax.f32 %v2079_v24, %v2085_v33  ;;  %v2207_v22 = vrot.slane %v2199_v45, %v4437_v3 }
 0x719   : > { %2096 = vrot.lane.b32.xlu0 %v5678_v30, %s4348_s13  ;;  %v5844_v36 = vpack.c.bf16 %v5686_v53, %v5676_v27 }
 0x71a   : > { %2100 = vrot.lane.b32.xlu1 %v5676_v27, %s4348_s13 }
 0x71d   : > { %2157 = vrot.lane.b32.xlu0 %v5665_v29, %s4349_s14 }
 0x71e   : > { %2102 = vrot.lane.b32.xlu1 %v5686_v53, %s4348_s13 }
 0x721   : > { %2163 = vrot.lane.b32.xlu0 %v5670_v1, %s4349_s14 }
 0x722   : > { %2159 = vrot.lane.b32.xlu1 %v5672_v23, %s4349_s14 }
 0x725   : > { %2161 = vrot.lane.b32.xlu0 %v5678_v30, %s4349_s14 }
 0x726   : > { %2165 = vrot.lane.b32.xlu1 %v5676_v27, %s4349_s14 }
 0x729   : > { %2552 = vperm.xlu0 %3941, %v3844_v52  }
 0x72a   : > { %2167 = vrot.lane.b32.xlu1 %v5686_v53, %s4349_s14 }
 0x72e   : > { %2547 = vperm.xlu1 %3940, %v3843_v41  }
 0x732   : > { %2572 = vperm.xlu1 %3940, %v3846_v34   ;;  %v5828_v34 = vpack.c.bf16 %v5678_v30, %v5672_v23 }
 0x736   : > { %2577 = vperm.xlu1 %3940, %v3847_v44  }
 0x783   : > { %v2093_v46 = vpop.permute.xlu0 %2092 }
 0x787   : > { %v2099_v63 = vpop.permute.xlu0 %2098 }
 0x788   : > { %v2095_v49 = vpop.permute.xlu1 %2094  ;;  %v5737_v58 = vsel %vm2104_vm3, %v2093_v46, %v2099_v63  ;;  %v5741_v60 = vsel %vm2104_vm3, %v2099_v63, %v2093_v46 }
 0x78b   : > { %v2097_v35 = vpop.permute.xlu0 %2096 }
 0x78c   : > { %v2101_v61 = vpop.permute.xlu1 %2100 }
 0x78d   : > { %v5753_v7 = vsel %vm2104_vm3, %v2095_v49, %v2101_v61  ;;  %v5757_v47 = vsel %vm2104_vm3, %v2101_v61, %v2095_v49 }
 0x78e   : > { %v5778_v40 = vpack.c.bf16 %v5757_v47, %v5741_v60  ;;  %v5787_v14 = vpack.c.bf16 %v5753_v7, %v5737_v58 }
 0x78f   : > { %v2158_v59 = vpop.permute.xlu0 %2157 }
 0x790   : > { %v2103_v10 = vpop.permute.xlu1 %2102  ;;  %4153 = vmatprep.subr.msk.bf16.mxu1 %vm4151_vm2, %v5778_v40  ;;  %vm5803_vm2 = vcmp.eq.s32.totalorder %v2180_v48, 1 }
 0x791   : > { %v2107_v56 = vsel %vm2104_vm3, %v2097_v35, %v2103_v10  ;;  %v5771_v38 = vsel %vm2104_vm3, %v2103_v10, %v2097_v35  ;;  %4156 = vmatpush1.bf16.msk.msra.mxu1 %vm4154_vm4, %v5787_v14  ;;  %vm2169_vm3 = vcmp.lt.s32.totalorder %v4469_v12, 120  ;;  %vm4160_vm4 = vmpackc.low %vm5747_vm11, %vm5727_vm5  ;;  %vm5831_vm5 = vcmp.eq.s32.totalorder %v2203_v9, 1 }
 0x792   : > { %v5799_v4 = vpack.c.bf16 %v5665_v29, %v5771_v38  ;;  %v5812_v25 = vpack.c.bf16 %v5670_v1, %v2107_v56  ;;  %v2236_v35 = vrot.slane %v2228_v39, %v4437_v3  ;;  %v4185_v45 = vpack.c.bf16 %v5771_v38, %v5757_v47 }
 0x793   : > { %v2164_v0 = vpop.permute.xlu0 %2163 }
 0x794   : > { %v2160_v62 = vpop.permute.xlu1 %2159  ;;  %4159 = vmatprep.subr.msk.bf16.mxu1 %vm4157_vm10, %v5799_v4  ;;  %v2170_v52 = vsel %vm2169_vm3, %v2158_v59, %v2164_v0  ;;  %v2173_v41 = vsel %vm2169_vm3, %v2164_v0, %v2158_v59  ;;  %vm4163_vm10 = vmpackc.low %vm5759_vm15, %vm5759_vm15  ;;  %v4182_v59 = vpack.c.bf16 %v2107_v56, %v5753_v7 }
 0x795   : > { %4162 = vmatpush1.bf16.msk.msra.mxu1 %vm4160_vm4, %v5812_v25  ;;  %vm4166_vm15 = vmpackc.low %vm5747_vm11, %vm5747_vm11  ;;  %vm5847_vm4 = vcmp.eq.s32.totalorder %v2207_v22, 1  ;;  %v4188_v47 = vpack.c.bf16 %v2173_v41, %v5686_v53  ;;  %v4191_v29 = vpack.c.bf16 %v2170_v52, %v5678_v30 }
 0x796   : > { %4165 = vmatprep.subr.msk.bf16.mxu1 %vm4163_vm10, %v5828_v34  ;;  %vm4169_vm11 = vmpackc.low %vm5815_vm12, %vm5815_vm12 }
 0x797   : > { %v2162_v63 = vpop.permute.xlu0 %2161  ;;  %vm4172_vm10 = vmpackc.low %vm5803_vm2, %vm5803_vm2 }
 0x798   : > { %v2166_v44 = vpop.permute.xlu1 %2165 }
 0x799   : > { %v2171_v46 = vsel %vm2169_vm3, %v2160_v62, %v2166_v44  ;;  %v2174_v57 = vsel %vm2169_vm3, %v2166_v44, %v2160_v62  ;;  %4168 = vmatpush1.bf16.msk.msra.mxu1 %vm4166_vm15, %v5844_v36  ;;  %vm376_vm15 = vcmp.lt.s32.totalorder %v5310_v11, 8  ;;  %v3835_v62 = vld [vmem:[%s6674_s3 + $0x40] sm:$0xff] }
 0x79a   : > { %v5865_v54 = vpack.c.bf16 %v2171_v46, %v2170_v52  ;;  %v5871_v32 = vpack.c.bf16 %v2174_v57, %v2173_v41  ;;  %v2274_v10 = vsel %vm376_vm15, 1, %v4331_v8  ;;  %v3839_v22 = vcombine.high %v3835_v62, %v3835_v62 }
 0x79b   : > { %v2278_v53 = vrot.slane %v2274_v10, %v4430_v2  ;;  %v3838_v24 = vcombine.low %v3835_v62, %v3835_v62 }
 0x79c   : > { %v2168_v49 = vpop.permute.xlu1 %2167  ;;  %4171 = vmatprep.subr.msk.bf16.mxu1 %vm4169_vm11, %v5865_v54  ;;  %vm4178_vm11 = vmpackc.low %vm5831_vm5, %vm5803_vm2  ;;  %vm5902_vm2 = vcmp.eq.s32.totalorder %v2232_v43, 1  ;;  %v3848_v43 = vld [vmem:[%s6676_s5 + $0x58] sm:$0xff] }
 0x79d   : > { %v5856_v19 = vsel %vm2169_vm3, %v2162_v63, %v2168_v49  ;;  %v5860_v51 = vsel %vm2169_vm3, %v2168_v49, %v2162_v63  ;;  %4174 = vmatpush1.bf16.msk.msra.mxu1 %vm4172_vm10, %v5871_v32  ;;  %vm4175_vm3 = vmpackc.low %vm5847_vm4, %vm5815_vm12  ;;  %vm5893_vm10 = vcmp.eq.s32.totalorder %v2236_v35, 1 }
 0x79e   : > { %v4176_v61 = vpack.c.bf16 %v5737_v58, %v5856_v19  ;;  %v4179_v21 = vpack.c.bf16 %v5741_v60, %v5860_v51  ;;  %vm377_vm12 = vmand %vm376_vm15, %vm372_vm8  ;;  %v4194_v23 = vpack.c.bf16 %v5860_v51, %v2174_v57  ;;  %v4197_v15 = vpack.c.bf16 %v5856_v19, %v2171_v46  ;;  %v3864_v58 = vld [vmem:[%s6676_s5 + $0x60] sm:$0xff]  ;;  %v3862_v60 = vld [vmem:[%s6675_s4 + $0x68] sm:$0xff] }
 0x79f   : > { %v2251_v37 = vsel %vm377_vm12, 1, %v4331_v8  ;;  %vm4184_vm8 = vmpackc.low %vm5831_vm5, %vm5831_vm5 }
 0x7a0   : > { %4177 = vmatprep.subr.msk.bf16.mxu1 %vm4175_vm3, %v4176_v61  ;;  %vm4181_vm3 = vmpackc.low %vm5847_vm4, %vm5847_vm4  ;;  %v2259_v7 = vrot.slane %v2251_v37, %v4437_v3  ;;  %v2255_v1 = vrot.slane %v2251_v37, %v4430_v2  ;;  %v3865_v37 = vld [vmem:[%s6676_s5 + $0x68] sm:$0xff] }
 0x7a1   : > { %4180 = vmatpush1.bf16.msk.msra.mxu1 %vm4178_vm11, %v4179_v21  ;;  %vm4187_vm5 = vmpackc.low %vm5893_vm10, %vm6777_vm1  ;;  %v3861_v21 = vld [vmem:[%s6675_s4 + $0x60] sm:$0xff] }
 0x7a2   : > { %4183 = vmatprep.subr.msk.bf16.mxu1 %vm4181_vm3, %v4182_v59  ;;  %vm5926_vm4 = vcmp.eq.s32.totalorder %v2259_v7, 1  ;;  %vm4190_vm11 = vmpackc.low %vm5902_vm2, %vm6777_vm1  ;;  %v3845_v59 = vld [vmem:[%s6675_s4 + $0x58] sm:$0xff]  ;;  %v3961_v7 = vld [vmem:[%s6674_s3 + $0x4c] ss:$8 sps:$4 sm:$0xff]  }
 0x7a3   : > { %vm378_vm12 = vmand %vm376_vm15, %vm374_vm7 }
 0x7a4   : > { %vm4193_vm3 = vmpackc.low %vm5893_vm10, %vm5893_vm10  ;;  %v2297_v11 = vsel %vm378_vm12, 1, %v4331_v8  ;;  %vm5961_vm10 = vcmp.eq.s32.totalorder %v2278_v53, 1 }
 0x7a5   : > { %4186 = vmatpush1.bf16.msk.msra.mxu1 %vm4184_vm8, %v4185_v45  ;;  %vm5943_vm8 = vcmp.eq.s32.totalorder %v2255_v1, 1  ;;  %vm4196_vm7 = vmpackc.low %vm5902_vm2, %vm5902_vm2  ;;  %v2305_v38 = vrot.slane %v2297_v11, %v4437_v3  ;;  %v4350_v45 = vmov 0.0|0.0  }
 0x7a6   : > { %2445 = vmatprep.subr.bf16.mxu1 %v2387_v28  ;;  %v2282_v28 = vrot.slane %v2274_v10, %v4437_v3  ;;  %vm4199_vm15 = vmpackc.low %vm5926_vm4, %vm5926_vm4  ;;  %2792 = vmatprep.subr.bf16.mxu0 %v4350_v45 }
 0x7a7   : > { %vm2307_vm12 = vcmp.eq.s32.totalorder %v2305_v38, 1  ;;  %2793 = vmatpush1.bf16.msra.mxu0 %v4350_v45 }
 0x7a8   : > { %2794 = vmatprep.subr.bf16.mxu0 %v4350_v45  ;;  %v2553_v1 = vpop.permute.xlu0 %2552 }
 0x7a9   : > { %2446 = vmatpush1.bf16.msra.mxu1 %v2386_v13 }
 0x7aa   : > { %4189 = vmatprep.subr.msk.bf16.mxu1 %vm4187_vm5, %v4188_v47  ;;  %vm5948_vm5 = vcmp.eq.s32.totalorder %v2282_v28, 1 }
 0x7ab   : > { %vm4205_vm2 = vmpackc.low %vm5948_vm5, %vm5926_vm4  ;;  %2795 = vmatpush1.bf16.msra.mxu0 %v4350_v45 }
 0x7ac   : > { %vm4214_vm4 = vmpackc.low %vm5961_vm10, %vm5961_vm10  ;;  %2796 = vmatprep.subr.bf16.mxu0 %v4350_v45 }
 0x7ad   : > { %4192 = vmatpush1.bf16.msk.msra.mxu1 %vm4190_vm11, %v4191_v29  ;;  %vm4202_vm11 = vmpackc.low %vm5943_vm8, %vm5943_vm8  ;;  %v2548_v10 = vpop.permute.xlu1 %2547 }
 0x7ae   : > { %4195 = vmatprep.subr.msk.bf16.mxu1 %vm4193_vm3, %v4194_v23  ;;  %vm4208_vm3 = vmpackc.low %vm5961_vm10, %vm5943_vm8  ;;  %vm6819_vm10 = vcmask 719872  }
 0x7af   : > { %vm4217_vm8 = vmpackc.low %vm2307_vm12, %vm2307_vm12  ;;  %2797 = vmatpush1.bf16.msra.mxu0 %v4350_v45 }
 0x7b0   : > { %2798 = vmatprep.subr.bf16.mxu0 %v4350_v45 }
 0x7b1   : > { %4198 = vmatpush1.bf16.msk.msra.mxu1 %vm4196_vm7, %v4197_v15  ;;  %vm4211_vm7 = vmpackc.low %vm5948_vm5, %vm5948_vm5  ;;  %vm6817_vm5 = vcmask 1043456   ;;  %v2573_v47 = vpop.permute.xlu1 %2572 }
 0x7b2   : > { %4201 = vmatprep.subr.msk.bf16.mxu1 %vm4199_vm15, %v5778_v40  ;;  %v2301_v40 = vrot.slane %v2297_v11, %v4430_v2 }
 0x7b3   : > { %2799 = vmatpush1.bf16.msra.mxu0 %v4350_v45 }
 0x7b4   : > { %vm2306_vm15 = vcmp.eq.s32.totalorder %v2301_v40, 1  ;;  %2800 = vmatprep.subr.bf16.mxu0 %v4350_v45 }
 0x7b5   : > { %4204 = vmatpush1.bf16.msk.msra.mxu1 %vm4202_vm11, %v5787_v14  ;;  %v2312_v48 = vsel %vm2306_vm15, %v5860_v51, 0.0  ;;  %v2313_v14 = vsel %vm2307_vm12, %v5856_v19, 0.0  ;;  %vm4220_vm11 = vmpackc.low %vm2306_vm15, %vm2306_vm15  ;;  %v2578_v27 = vpop.permute.xlu1 %2577 }
 0x7b6   : > { %4207 = vmatprep.subr.msk.bf16.mxu1 %vm4205_vm2, %v5799_v4  ;;  %v2401_v20 = vpack.c.bf16 %v2313_v14, %v2313_v14  ;;  %v2400_v0 = vpack.c.bf16 %v2312_v48, %v2312_v48  ;;  %vm6818_vm2 = vmmov %vm6817_vm5  ;;  %v3954_v4 = vld [vmem:[%s6674_s3 + $0x30] ss:$8 sps:$4 sm:$0xff]  }
 0x7b7   : > { %2801 = vmatpush1.bf16.msra.mxu0 %v4350_v45  ;;  %vm6820_vm12 = vmmov %vm6819_vm10 }
 0x7b8   : > { %v2428_v9 = vsel %vm6818_vm2, %v2400_v0, 0  ;;  %2802 = vmatprep.subr.bf16.mxu0 %v4350_v45  ;;  %3859 = vmatprep.mubr.msk.bf16.mxu0 %vm6820_vm12, %v3961_v7  ;;  %vm6835_vm12 = vcmp.lt.s32.totalorder %v4469_v12, 16 }
 0x7b9   : > { %4210 = vmatpush1.bf16.msk.msra.mxu1 %vm4208_vm3, %v5812_v25  ;;  %vm6821_vm3 = vmmov %vm6818_vm2 }
 0x7ba   : > { %4213 = vmatprep.subr.msk.bf16.mxu1 %vm4211_vm7, %v5828_v34  ;;  %vm6822_vm7 = vmmov %vm6819_vm10 }
 0x7bb   : > { %2803 = vmatpush1.bf16.msra.mxu0 %v4350_v45  ;;  %vm6823_vm15 = vmmov %vm6822_vm7 }
 0x7bd   : > { %4216 = vmatpush1.bf16.msk.msra.mxu1 %vm4214_vm4, %v5844_v36  ;;  %vm6824_vm4 = vcmp.ge.s32.totalorder %v4474_v16, 1 }
 0x7be   : > { %4219 = vmatprep.subr.msk.bf16.mxu1 %vm4217_vm8, %v5865_v54 }
 0x7c1   : > { %4222 = vmatpush1.bf16.msk.msra.mxu1 %vm4220_vm11, %v5871_v32 }
 0x7c2   : > { %3840 = vmatprep.subr.msk.bf16.mxu1 %vm6817_vm5, %v2401_v20 }
 0x7c5   : > { %2460 = vmatpush1.bf16.msra.mxu1 %v2428_v9 }
 0x7c8   : > { %2466 = vmatmul.mubr.bf16.vlgmr.msra.gmra.mrb[8].mxu1 %v3954_v4 }
 0x7c9   : > { %3842 = vmatprep.mubr.msk.bf16.mxu1 %vm6819_vm10, %v3839_v22 }
 0x7d0   : > { %2476 = vmatmul.mubr.bf16.gmra.mrb[12].mxu1 %v3838_v24 }
 0x89b   : > { %v6002_v25 = vpop.f32.mrb[8].mxu1 }
 0x89c   : > { %v2496_v33 = vmul.f32 %v6002_v25, %v6002_v25  ;;  %v6006_v52 = vpop.f32.mrb[9].mxu1 }
 0x89d   : > { %v2497_v41 = vmul.f32 %v6006_v52, %v6006_v52  ;;  %v6010_v34 = vpop.f32.mrb[10].mxu1  ;;  %v2484_v44 = vadd.f32 %v6006_v52, %v6002_v25 }
 0x89e   : > { %v2498_v50 = vmul.f32 %v6010_v34, %v6010_v34  ;;  %v6016_v46 = vpop.f32.mrb[11].mxu1 }
 0x89f   : > { %v2499_v57 = vmul.f32 %v6016_v46, %v6016_v46  ;;  %2485 = vadd.xlane.f32.xlu0 %v2484_v44  ;;  %v2487_v36 = vadd.f32 %v6016_v46, %v6010_v34  ;;  %v2502_v55 = vadd.f32 %v2497_v41, %v2496_v33 }
 0x8a1   : > { %2488 = vadd.xlane.f32.xlu1 %v2487_v36  ;;  %v2505_v39 = vadd.f32 %v2499_v57, %v2498_v50 }
 0x8a3   : > { %2503 = vadd.xlane.f32.xlu0 %v2502_v55  ;;  %v6022_v63 = vpop.f32.mrb[12].mxu1 }
 0x8a4   : > { %v2500_v49 = vmul.f32 %v6022_v63, %v6022_v63  ;;  %v6026_v19 = vpop.f32.mrb[13].mxu1 }
 0x8a5   : > { %v2501_v51 = vmul.f32 %v6026_v19, %v6026_v19  ;;  %v2481_v54 = vpop.f32.mrb[14].mxu1  ;;  %v2490_v32 = vadd.f32 %v6026_v19, %v6022_v63 }
 0x8a6   : > { %v2482_v35 = vpop.f32.mrb[15].mxu1 }
 0x8a7   : > { %2506 = vadd.xlane.f32.xlu0 %v2505_v39  ;;  %2491 = vadd.xlane.f32.xlu1 %v2490_v32  ;;  %v2508_v61 = vadd.f32 %v2501_v51, %v2500_v49 }
 0x8ab   : > { %2509 = vadd.xlane.f32.xlu0 %v2508_v61 }
 0x8b8   : > { %2582 = vperm.xlu1 %3940, %v3848_v43   ;;  %v2592_v43 = vstv %s3849_s21  ;;  %s3868_s21 = sld [smem:[#allocation4 + $0x201]] }
 0x8bc   : > { %2906 = vperm.xlu1 %3940, %v3861_v21   ;;  %v2600_v21 = vstv %s3850_s30 }
 0x8c0   : > { %2931 = vperm.xlu1 %3940, %v3864_v58  }
 0x8c1   : > { %2557 = vperm.xlu0 %3941, %v3845_v59  }
 0x8c4   : > { %2936 = vperm.xlu1 %3940, %v3865_v37  }
 0x8c5   : > { %2911 = vperm.xlu0 %3941, %v3862_v60  }
 0x92c   : > { %v2486_v28 = vpop.xlane.xlu0 %2485 }
 0x92d   : > { %v2493_v29 = vmul.f32 0.00390625, %v2486_v28 }
 0x92e   : > { %v2489_v23 = vpop.xlane.xlu1 %2488 }
 0x92f   : > { %v2494_v53 = vmul.f32 0.00390625, %v2489_v23  ;;  %v2514_v30 = vmul.f32 %v2493_v29, %v2493_v29  ;;  %v2527_v57 = vsub.f32 %v6002_v25, %v2493_v29  ;;  %v2528_v36 = vsub.f32 %v6006_v52, %v2493_v29 }
 0x930   : > { %v2504_v13 = vpop.xlane.xlu0 %2503 }
 0x931   : > { %v2511_v11 = vmul.f32 0.00390625, %v2504_v13  ;;  %v2515_v14 = vmul.f32 %v2494_v53, %v2494_v53  ;;  %v2529_v51 = vsub.f32 %v6010_v34, %v2494_v53  ;;  %v2530_v54 = vsub.f32 %v6016_v46, %v2494_v53 }
 0x932   : > { %v2593_v53 = vmul.f32 %v2592_v43, %v6002_v25 }
 0x933   : > { %v2517_v15 = vsub.f32 %v2511_v11, %v2514_v30 }
 0x934   : > { %v2507_v56 = vpop.xlane.xlu0 %2506  ;;  %v2492_v38 = vpop.xlane.xlu1 %2491 }
 0x935   : > { %v2520_v40 = vmax.f32 %v2517_v15, 0.0  ;;  %v2512_v48 = vmul.f32 0.00390625, %v2507_v56  ;;  %v2495_v20 = vmul.f32 0.00390625, %v2492_v38 }
 0x937   : > { %v2533_v0 = vadd.f32 1e-05, %v2520_v40  ;;  %v2518_v62 = vsub.f32 %v2512_v48, %v2515_v14  ;;  %v2516_v4 = vmul.f32 %v2495_v20, %v2495_v20  ;;  %v2531_v7 = vsub.f32 %v6022_v63, %v2495_v20 }
 0x938   : > { %v2510_v9 = vpop.xlane.xlu0 %2509  ;;  %v2532_v28 = vsub.f32 %v6026_v19, %v2495_v20  ;;  %v2596_v48 = vmul.f32 %v2592_v43, %v6016_v46 }
 0x939   : > { %3987 = vrsqrt.f32 %v2533_v0  ;;  %v2521_v22 = vmax.f32 %v2518_v62, 0.0  ;;  %v2513_v24 = vmul.f32 0.00390625, %v2510_v9 }
 0x93b   : > { %v2534_v33 = vadd.f32 1e-05, %v2521_v22  ;;  %v2519_v41 = vsub.f32 %v2513_v24, %v2516_v4  ;;  %v2583_v22 = vpop.permute.xlu1 %2582 }
 0x93d   : > { %3989 = vrsqrt.f32 %v2534_v33  ;;  %v2522_v44 = vmax.f32 %v2519_v41, 0.0 }
 0x93f   : > { %v2535_v50 = vadd.f32 1e-05, %v2522_v44  ;;  %v2597_v44 = vmul.f32 %v2592_v43, %v6022_v63  ;;  %v4351_v63 = vmov 0.0  }
 0x940   : > { %v2558_v14 = vpop.permute.xlu0 %2557 }
 0x941   : > { %3991 = vrsqrt.f32 %v2535_v50 }
 0x943   : > { %v3988_v55 = vpop.eup %3987 }
 0x944   : > { %v2539_v39 = vmul.f32 %v3988_v55, %v2527_v57  ;;  %v2540_v49 = vmul.f32 %v3988_v55, %v2528_v36 }
 0x946   : > { %v2560_v32 = vmul.f32 %v2548_v10, %v2539_v39  ;;  %v2561_v35 = vmul.f32 %v2548_v10, %v2540_v49  ;;  %v2594_v10 = vmul.f32 %v2592_v43, %v6006_v52 }
 0x947   : > { %v3990_v61 = vpop.eup %3989 }
 0x948   : > { %v2585_v58 = vadd.f32 %v2573_v47, %v2560_v32  ;;  %v2586_v59 = vadd.f32 %v2573_v47, %v2561_v35  ;;  %v2541_v37 = vmul.f32 %v3990_v61, %v2529_v51  ;;  %v2542_v60 = vmul.f32 %v3990_v61, %v2530_v54 }
 0x949   : > { %v2595_v47 = vmul.f32 %v2592_v43, %v6010_v34  ;;  %v2598_v34 = vmul.f32 %v2592_v43, %v6026_v19 }
 0x94a   : > { %v2562_v29 = vmul.f32 %v2553_v1, %v2541_v37  ;;  %v2563_v23 = vmul.f32 %v2553_v1, %v2542_v60  ;;  %v2601_v13 = vmul.f32 %v2600_v21, %v2585_v58  ;;  %v2602_v30 = vmul.f32 %v2600_v21, %v2586_v59 }
 0x94b   : > { %v3992_v11 = vpop.eup %3991 }
 0x94c   : > { %v2587_v15 = vadd.f32 %v2578_v27, %v2562_v29  ;;  %v2588_v56 = vadd.f32 %v2578_v27, %v2563_v23  ;;  %v2543_v38 = vmul.f32 %v3992_v11, %v2531_v7  ;;  %v2544_v40 = vmul.f32 %v3992_v11, %v2532_v28  ;;  %v3959_v7 = vld [vmem:[%s6674_s3 + $0x48] ss:$8 sps:$4 sm:$0xff]  }
 0x94d   : > { %v2607_v0 = vadd.f32 %v2601_v13, %v2593_v53  ;;  %v2608_v20 = vadd.f32 %v2602_v30, %v2594_v10 }
 0x94e   : > { %v2564_v62 = vmul.f32 %v2558_v14, %v2543_v38  ;;  %v2565_v1 = vmul.f32 %v2558_v14, %v2544_v40  ;;  %v2603_v9 = vmul.f32 %v2600_v21, %v2587_v15  ;;  %v2604_v4 = vmul.f32 %v2600_v21, %v2588_v56 }
 0x94f   : > { %v2613_v24 = vmul.f32 0.2, %v2607_v0  ;;  %v2614_v25 = vmul.f32 0.2, %v2608_v20 }
 0x950   : > { %v2589_v33 = vadd.f32 %v2583_v22, %v2564_v62  ;;  %v2590_v52 = vadd.f32 %v2583_v22, %v2565_v1  ;;  %v2609_v41 = vadd.f32 %v2603_v9, %v2595_v47  ;;  %v2610_v27 = vadd.f32 %v2604_v4, %v2596_v48  ;;  %v3866_v22 = vld [vmem:[%s6676_s5 + $0x70] sm:$0xff] }
 0x951   : > { %v2619_v55 = vmax.f32 %v2607_v0, %v2613_v24  ;;  %v2620_v39 = vmax.f32 %v2608_v20, %v2614_v25  ;;  %v3863_v24 = vld [vmem:[%s6675_s4 + $0x70] sm:$0xff]  ;;  %v2907_v25 = vpop.permute.xlu1 %2906 }
 0x952   : > { %v2605_v50 = vmul.f32 %v2600_v21, %v2589_v33  ;;  %v2606_v46 = vmul.f32 %v2600_v21, %v2590_v52  ;;  %v2615_v57 = vmul.f32 0.2, %v2609_v41  ;;  %v2616_v36 = vmul.f32 0.2, %v2610_v27  ;;  %v3853_v21 = vld [vmem:[%s6674_s3 + $0x58] sm:$0xff]  ;;  %v2912_v52 = vpop.permute.xlu0 %2911 }
 0x953   : > { %v3857_v28 = vcombine.high %v3853_v21, %v3853_v21  ;;  %v3856_v29 = vcombine.low %v3853_v21, %v3853_v21 }
 0x954   : > { %v2611_v49 = vadd.f32 %v2605_v50, %v2597_v44  ;;  %v2612_v51 = vadd.f32 %v2606_v46, %v2598_v34  ;;  %v2621_v54 = vmax.f32 %v2609_v41, %v2615_v57  ;;  %v2622_v32 = vmax.f32 %v2610_v27, %v2616_v36 }
 0x955   : > { %v2932_v33 = vpop.permute.xlu1 %2931 }
 0x956   : > { %v2617_v35 = vmul.f32 0.2, %v2611_v49  ;;  %v2618_v61 = vmul.f32 0.2, %v2612_v51  ;;  %v2746_v58 = vpack.c.bf16 %v2622_v32, %v2620_v39  ;;  %v2745_v59 = vpack.c.bf16 %v2621_v54, %v2619_v55 }
 0x958   : > { %v2623_v37 = vmax.f32 %v2611_v49, %v2617_v35  ;;  %v2624_v60 = vmax.f32 %v2612_v51, %v2618_v61  ;;  %2804 = vmatprep.subr.bf16.mxu0 %v2746_v58 }
 0x959   : > { %2805 = vmatpush1.bf16.msra.mxu0 %v2745_v59  ;;  %v2937_v41 = vpop.permute.xlu1 %2936 }
 0x95a   : > { %v2748_v19 = vpack.c.bf16 %v4351_v63, %v2624_v60  ;;  %v2747_v43 = vpack.c.bf16 %v4351_v63, %v2623_v37 }
 0x95c   : > { %2806 = vmatprep.subr.bf16.mxu0 %v2748_v19 }
 0x95d   : > { %2807 = vmatpush1.bf16.msra.mxu0 %v2747_v43 }
 0x95e   : > { %2808 = vmatprep.subr.bf16.mxu0 %v4350_v45 }
 0x961   : > { %2809 = vmatpush1.bf16.msra.mxu0 %v4350_v45 }
 0x962   : > { %2810 = vmatprep.subr.bf16.mxu0 %v4350_v45 }
 0x965   : > { %2811 = vmatpush1.bf16.msra.mxu0 %v4350_v45 }
 0x966   : > { %2812 = vmatprep.subr.bf16.mxu0 %v4350_v45 }
 0x969   : > { %2813 = vmatpush1.bf16.msra.mxu0 %v4350_v45 }
 0x96a   : > { %2814 = vmatprep.subr.bf16.mxu0 %v4350_v45 }
 0x96d   : > { %2815 = vmatpush1.bf16.msra.mxu0 %v4350_v45 }
 0x96e   : > { %2816 = vmatprep.subr.bf16.mxu0 %v4350_v45 }
 0x971   : > { %2817 = vmatpush1.bf16.msra.mxu0 %v4350_v45 }
 0x972   : > { %3858 = vmatprep.subr.msk.bf16.mxu0 %vm6821_vm3, %v4350_v45  ;;  %vm6836_vm3 = vmmov %vm6835_vm12 }
 0x975   : > { %2819 = vmatpush1.bf16.msra.mxu0 %v4350_v45 }
 0x978   : > { %2825 = vmatmul.mubr.bf16.vlgmr.msra.gmra.mrb[16].mxu0 %v3959_v7 }
 0x979   : > { %3860 = vmatprep.mubr.msk.bf16.mxu0 %vm6822_vm7, %v3857_v28  ;;  %vm6837_vm7 = vcmp.ge.s32.totalorder %v4481_v17, 1 }
 0x980   : > { %2835 = vmatmul.mubr.bf16.gmra.mrb[20].mxu0 %v3856_v29 }
 0x981   : > { %3694 = vmatprep.mubr.f32.mxu0 %v4351_v63 }
 0xa4b   : > { %v6098_v23 = vpop.f32.mrb[16].mxu0 }
 0xa4c   : > { %v2855_v13 = vmul.f32 %v6098_v23, %v6098_v23  ;;  %v6102_v30 = vpop.f32.mrb[17].mxu0 }
 0xa4d   : > { %v2856_v11 = vmul.f32 %v6102_v30, %v6102_v30  ;;  %v6106_v53 = vpop.f32.mrb[18].mxu0  ;;  %v2843_v45 = vadd.f32 %v6102_v30, %v6098_v23 }
 0xa4e   : > { %v2857_v10 = vmul.f32 %v6106_v53, %v6106_v53  ;;  %v6112_v15 = vpop.f32.mrb[19].mxu0 }
 0xa4f   : > { %v2858_v56 = vmul.f32 %v6112_v15, %v6112_v15  ;;  %2844 = vadd.xlane.f32.xlu0 %v2843_v45  ;;  %v2846_v38 = vadd.f32 %v6112_v15, %v6106_v53  ;;  %v2861_v40 = vadd.f32 %v2856_v11, %v2855_v13 }
 0xa51   : > { %2847 = vadd.xlane.f32.xlu1 %v2846_v38  ;;  %v2864_v47 = vadd.f32 %v2858_v56, %v2857_v10  ;;  %v2951_v10 = vstv %s3867_s20 }
 0xa53   : > { %2862 = vadd.xlane.f32.xlu0 %v2861_v40  ;;  %v6118_v48 = vpop.f32.mrb[20].mxu0 }
 0xa54   : > { %v2859_v14 = vmul.f32 %v6118_v48, %v6118_v48  ;;  %v6122_v0 = vpop.f32.mrb[21].mxu0 }
 0xa55   : > { %v2860_v20 = vmul.f32 %v6122_v0, %v6122_v0  ;;  %v2849_v62 = vadd.f32 %v6122_v0, %v6118_v48  ;;  %v2840_v1 = vpop.f32.mrb[22].mxu0 }
 0xa56   : > { %v2841_v9 = vpop.f32.mrb[23].mxu0 }
 0xa57   : > { %2865 = vadd.xlane.f32.xlu0 %v2864_v47  ;;  %2850 = vadd.xlane.f32.xlu1 %v2849_v62  ;;  %v2867_v4 = vadd.f32 %v2860_v20, %v2859_v14  ;;  %v2959_v20 = vstv %s3868_s21  ;;  %s3885_s21 = sld [smem:[#allocation4 + $0x280]] }
 0xa5b   : > { %2868 = vadd.xlane.f32.xlu0 %v2867_v4 }
 0xa68   : > { %2941 = vperm.xlu1 %3940, %v3866_v22   ;;  %v2952_v22 = vmul.f32 %v2951_v10, %v6098_v23 }
 0xa71   : > { %2916 = vperm.xlu0 %3941, %v3863_v24   ;;  %v2953_v24 = vmul.f32 %v2951_v10, %v6102_v30 }
 0xadc   : > { %v2845_v27 = vpop.xlane.xlu0 %2844 }
 0xadd   : > { %v2852_v44 = vmul.f32 0.00390625, %v2845_v27 }
 0xade   : > { %v2848_v34 = vpop.xlane.xlu1 %2847 }
 0xadf   : > { %v2853_v46 = vmul.f32 0.00390625, %v2848_v34  ;;  %v2873_v57 = vmul.f32 %v2852_v44, %v2852_v44  ;;  %v2886_v28 = vsub.f32 %v6098_v23, %v2852_v44  ;;  %v2887_v29 = vsub.f32 %v6102_v30, %v2852_v44 }
 0xae0   : > { %v2863_v50 = vpop.xlane.xlu0 %2862 }
 0xae1   : > { %v2870_v36 = vmul.f32 0.00390625, %v2863_v50  ;;  %v2874_v32 = vmul.f32 %v2853_v46, %v2853_v46  ;;  %v2888_v56 = vsub.f32 %v6106_v53, %v2853_v46  ;;  %v2889_v38 = vsub.f32 %v6112_v15, %v2853_v46 }
 0xae3   : > { %v2876_v55 = vsub.f32 %v2870_v36, %v2873_v57 }
 0xae4   : > { %v2866_v39 = vpop.xlane.xlu0 %2865  ;;  %v2851_v49 = vpop.xlane.xlu1 %2850 }
 0xae5   : > { %v2879_v51 = vmax.f32 %v2876_v55, 0.0  ;;  %v2871_v54 = vmul.f32 0.00390625, %v2866_v39  ;;  %v2854_v35 = vmul.f32 0.00390625, %v2851_v49 }
 0xae7   : > { %v2892_v61 = vadd.f32 1e-05, %v2879_v51  ;;  %v2877_v58 = vsub.f32 %v2871_v54, %v2874_v32  ;;  %v2875_v37 = vmul.f32 %v2854_v35, %v2854_v35  ;;  %v2890_v36 = vsub.f32 %v6118_v48, %v2854_v35 }
 0xae8   : > { %v2869_v59 = vpop.xlane.xlu0 %2868  ;;  %v2891_v46 = vsub.f32 %v6122_v0, %v2854_v35  ;;  %v2955_v51 = vmul.f32 %v2951_v10, %v6112_v15 }
 0xae9   : > { %3993 = vrsqrt.f32 %v2892_v61  ;;  %v2880_v60 = vmax.f32 %v2877_v58, 0.0  ;;  %v2872_v63 = vmul.f32 0.00390625, %v2869_v59 }
 0xaeb   : > { %v2893_v19 = vadd.f32 1e-05, %v2880_v60  ;;  %v2878_v43 = vsub.f32 %v2872_v63, %v2875_v37  ;;  %v2942_v60 = vpop.permute.xlu1 %2941 }
 0xaed   : > { %3995 = vrsqrt.f32 %v2893_v19  ;;  %v2881_v21 = vmax.f32 %v2878_v43, 0.0 }
 0xaef   : > { %v2894_v7 = vadd.f32 1e-05, %v2881_v21 }
 0xaf0   : > { %v2917_v58 = vpop.permute.xlu0 %2916 }
 0xaf1   : > { %3997 = vrsqrt.f32 %v2894_v7  ;;  %v2956_v7 = vmul.f32 %v2951_v10, %v6118_v48 }
 0xaf3   : > { %v3994_v13 = vpop.eup %3993 }
 0xaf4   : > { %v2898_v11 = vmul.f32 %v3994_v13, %v2886_v28  ;;  %v2899_v45 = vmul.f32 %v3994_v13, %v2887_v29  ;;  %v2957_v28 = vmul.f32 %v2951_v10, %v6122_v0  ;;  %v3966_v0 = vld [vmem:[%s6674_s3 + $0x64] ss:$8 sps:$4 sm:$0xff]  }
 0xaf5   : > { %3877 = vmatprep.mubr.msk.bf16.mxu1 %vm6823_vm15, %v3966_v0 }
 0xaf6   : > { %v2919_v40 = vmul.f32 %v2907_v25, %v2898_v11  ;;  %v2920_v47 = vmul.f32 %v2907_v25, %v2899_v45 }
 0xaf7   : > { %v3996_v14 = vpop.eup %3995 }
 0xaf8   : > { %v2944_v62 = vadd.f32 %v2932_v33, %v2919_v40  ;;  %v2945_v1 = vadd.f32 %v2932_v33, %v2920_v47  ;;  %v2900_v9 = vmul.f32 %v3996_v14, %v2888_v56  ;;  %v2901_v4 = vmul.f32 %v3996_v14, %v2889_v38 }
 0xaf9   : > { %v2954_v33 = vmul.f32 %v2951_v10, %v6106_v53  ;;  %v3879_v10 = vld [vmem:[%s6675_s4 + $0x78] sm:$0xff] }
 0xafa   : > { %v2921_v27 = vmul.f32 %v2912_v52, %v2900_v9  ;;  %v2922_v44 = vmul.f32 %v2912_v52, %v2901_v4  ;;  %v2960_v34 = vmul.f32 %v2959_v20, %v2944_v62  ;;  %v2961_v50 = vmul.f32 %v2959_v20, %v2945_v1  ;;  %v3882_v62 = vld [vmem:[%s6676_s5 + $0x78] sm:$0xff]  ;;  %v3883_v1 = vld [vmem:[%s6676_s5 + $0x80] sm:$0xff] }
 0xafb   : > { %v3998_v57 = vpop.eup %3997  ;;  %v3002_v9 = vsel %vm4502_vm6, 1, %v4331_v8  ;;  %vm6829_vm6 = vcmp.lt.s32.totalorder %v4469_v12, 17 }
 0xafc   : > { %v2946_v25 = vadd.f32 %v2937_v41, %v2921_v27  ;;  %v2947_v55 = vadd.f32 %v2937_v41, %v2922_v44  ;;  %v2966_v39 = vadd.f32 %v2960_v34, %v2952_v22  ;;  %v2967_v49 = vadd.f32 %v2961_v50, %v2953_v24  ;;  %vm6830_vm5 = vmmov %vm6829_vm6 }
 0xafd   : > { %v2902_v23 = vmul.f32 %v3998_v57, %v2890_v36  ;;  %v2903_v54 = vmul.f32 %v3998_v57, %v2891_v46  ;;  %v3006_v4 = vrot.slane %v3002_v9, %v4430_v2  ;;  %v3010_v22 = vrot.slane %v3002_v9, %v4437_v3 }
 0xafe   : > { %v2962_v30 = vmul.f32 %v2959_v20, %v2946_v25  ;;  %v2963_v32 = vmul.f32 %v2959_v20, %v2947_v55  ;;  %v2972_v52 = vmul.f32 0.2, %v2966_v39  ;;  %v2973_v61 = vmul.f32 0.2, %v2967_v49 }
 0xaff   : > { %v2923_v59 = vmul.f32 %v2917_v58, %v2902_v23  ;;  %v2924_v37 = vmul.f32 %v2917_v58, %v2903_v54  ;;  %v3043_v44 = vsel %vm6824_vm4, 1, %v4331_v8  ;;  %vm6278_vm8 = vcmp.eq.s32.totalorder %v3006_v4, 1 }
 0xb00   : > { %v2968_v63 = vadd.f32 %v2962_v30, %v2954_v33  ;;  %v2969_v35 = vadd.f32 %v2963_v32, %v2955_v51  ;;  %v6144_v19 = vmax.f32 %v2966_v39, %v2972_v52  ;;  %v6146_v41 = vmax.f32 %v2967_v49, %v2973_v61 }
 0xb01   : > { %v2948_v43 = vadd.f32 %v2942_v60, %v2923_v59  ;;  %v2949_v53 = vadd.f32 %v2942_v60, %v2924_v37  ;;  %vm6282_vm11 = vcmp.eq.s32.totalorder %v3010_v22, 1  ;;  %v3047_v31 = vrot.slane %v3043_v44, %v4430_v2 }
 0xb02   : > { %v2974_v21 = vmul.f32 0.2, %v2968_v63  ;;  %v2975_v15 = vmul.f32 0.2, %v2969_v35  ;;  %2984 = vrot.lane.b32.xlu0 %v6144_v19, %s4324_s23  ;;  %3031 = vrot.lane.b32.xlu1 %v6146_v41, %s4323_s22  ;;  %v3051_v57 = vrot.slane %v3043_v44, %v4437_v3  ;;  %v3084_v30 = vsel %vm4527_vm9, 1, %v4331_v8 }
 0xb03   : > { %v2964_v29 = vmul.f32 %v2959_v20, %v2948_v43  ;;  %v2965_v13 = vmul.f32 %v2959_v20, %v2949_v53  ;;  %v3880_v20 = vld [vmem:[%s6675_s4 + $0x80] sm:$0xff]  ;;  %vm6296_vm2 = vcmp.eq.s32.totalorder %v3047_v31, 1  ;;  %v3125_v61 = vsel %vm6837_vm7, 1, %v4331_v8 }
 0xb04   : > { %v6154_v11 = vmax.f32 %v2968_v63, %v2974_v21  ;;  %v6156_v45 = vmax.f32 %v2969_v35, %v2975_v15  ;;  %vm6300_vm10 = vcmp.eq.s32.totalorder %v3051_v57, 1  ;;  %v3088_v58 = vrot.slane %v3084_v30, %v4430_v2 }
 0xb05   : > { %v2970_v56 = vadd.f32 %v2964_v29, %v2956_v7  ;;  %v2971_v38 = vadd.f32 %v2965_v13, %v2957_v28  ;;  %v3092_v59 = vrot.slane %v3084_v30, %v4437_v3  ;;  %v3129_v42 = vrot.slane %v3125_v61, %v4430_v2 }
 0xb06   : > { %2990 = vrot.lane.b32.xlu0 %v6146_v41, %s4324_s23  ;;  %3113 = vrot.lane.b32.xlu1 %v6146_v41, %s4326_s25  ;;  %v3133_v63 = vrot.slane %v3125_v61, %v4437_v3  ;;  %vm6322_vm9 = vcmp.eq.s32.totalorder %v3088_v58, 1  ;;  %vm6849_vm7 = vcmp.lt.s32.totalorder %v4469_v12, 17  ;;  %v6853_v22 = vmov 0 }
 0xb07   : > { %v2976_v40 = vmul.f32 0.2, %v2970_v56  ;;  %v2977_v47 = vmul.f32 0.2, %v2971_v38  ;;  %vm6326_vm15 = vcmp.eq.s32.totalorder %v3092_v59, 1  ;;  %vm6330_vm4 = vcmp.eq.s32.totalorder %v3129_v42, 1  ;;  %vm6850_vm0 = vmmov %vm6849_vm7 }
 0xb09   : > { %v6162_v14 = vmax.f32 %v2970_v56, %v2976_v40  ;;  %v6164_v48 = vmax.f32 %v2971_v38, %v2977_v47 }
 0xb0a   : > { %3025 = vrot.lane.b32.xlu0 %v6144_v19, %s4323_s22  ;;  %3160 = vrot.lane.b32.xlu1 %v6146_v41, %s4327_s26 }
 0xb0e   : > { %3066 = vrot.lane.b32.xlu0 %v6144_v19, %s4325_s24  ;;  %2986 = vrot.lane.b32.xlu1 %v6154_v11, %s4324_s23 }
 0xb12   : > { %3072 = vrot.lane.b32.xlu0 %v6146_v41, %s4325_s24  ;;  %2992 = vrot.lane.b32.xlu1 %v6156_v45, %s4324_s23 }
 0xb16   : > { %3107 = vrot.lane.b32.xlu0 %v6144_v19, %s4326_s25  ;;  %3068 = vrot.lane.b32.xlu1 %v6154_v11, %s4325_s24 }
 0xb1a   : > { %3154 = vrot.lane.b32.xlu0 %v6144_v19, %s4327_s26  ;;  %3074 = vrot.lane.b32.xlu1 %v6156_v45, %s4325_s24 }
 0xb1e   : > { %3027 = vrot.lane.b32.xlu0 %v6154_v11, %s4323_s22  ;;  %2994 = vrot.lane.b32.xlu1 %v6164_v48, %s4324_s23 }
 0xb22   : > { %3033 = vrot.lane.b32.xlu0 %v6156_v45, %s4323_s22  ;;  %3029 = vrot.lane.b32.xlu1 %v6162_v14, %s4323_s22 }
 0xb26   : > { %3109 = vrot.lane.b32.xlu0 %v6154_v11, %s4326_s25  ;;  %3035 = vrot.lane.b32.xlu1 %v6164_v48, %s4323_s22  ;;  %s3886_s22 = sld [smem:[#allocation4 + $0x281]] }
 0xb2a   : > { %3115 = vrot.lane.b32.xlu0 %v6156_v45, %s4326_s25  ;;  %3197 = vrot.lane.b32.xlu1 %v6154_v11, %s4328_s27 }
 0xb2e   : > { %3203 = vrot.lane.b32.xlu1 %v6156_v45, %s4328_s27  ;;  %2988 = vrot.lane.b32.xlu0 %v6162_v14, %s4324_s23 }
 0xb32   : > { %3242 = vrot.lane.b32.xlu1 %v6146_v41, %s4329_s28  ;;  %3156 = vrot.lane.b32.xlu0 %v6154_v11, %s4327_s26 }
 0xb36   : > { %3076 = vrot.lane.b32.xlu1 %v6164_v48, %s4325_s24  ;;  %3162 = vrot.lane.b32.xlu0 %v6156_v45, %s4327_s26 }
 0xb3a   : > { %3111 = vrot.lane.b32.xlu1 %v6162_v14, %s4326_s25  ;;  %3070 = vrot.lane.b32.xlu0 %v6162_v14, %s4325_s24 }
 0xb3e   : > { %3117 = vrot.lane.b32.xlu1 %v6164_v48, %s4326_s25  ;;  %3195 = vrot.lane.b32.xlu0 %v6144_v19, %s4328_s27  ;;  %s3624_s25 = sld [smem:[#allocation3]] }
 0xb42   : > { %3158 = vrot.lane.b32.xlu1 %v6162_v14, %s4327_s26  ;;  %3201 = vrot.lane.b32.xlu0 %v6146_v41, %s4328_s27 }
 0xb46   : > { %3164 = vrot.lane.b32.xlu1 %v6164_v48, %s4327_s26  ;;  %3236 = vrot.lane.b32.xlu0 %v6144_v19, %s4329_s28 }
 0xb4a   : > { %3279 = vrot.lane.b32.xlu1 %v6154_v11, %s4330_s29  ;;  %3238 = vrot.lane.b32.xlu0 %v6154_v11, %s4329_s28 }
 0xb4e   : > { %3205 = vrot.lane.b32.xlu1 %v6164_v48, %s4328_s27  ;;  %3244 = vrot.lane.b32.xlu0 %v6156_v45, %s4329_s28 }
 0xb52   : > { %3240 = vrot.lane.b32.xlu1 %v6162_v14, %s4329_s28  ;;  %3199 = vrot.lane.b32.xlu0 %v6162_v14, %s4328_s27 }
 0xb56   : > { %3246 = vrot.lane.b32.xlu1 %v6164_v48, %s4329_s28  ;;  %3277 = vrot.lane.b32.xlu0 %v6144_v19, %s4330_s29  ;;  %s342_s28 = scalar_lea.vmem %s6680_s9, %s3792_s18 }
 0xb5a   : > { %3285 = vrot.lane.b32.xlu1 %v6156_v45, %s4330_s29  ;;  %3283 = vrot.lane.b32.xlu0 %v6146_v41, %s4330_s29 }
 0xb5e   : > { %3287 = vrot.lane.b32.xlu1 %v6164_v48, %s4330_s29  ;;  %3281 = vrot.lane.b32.xlu0 %v6162_v14, %s4330_s29 }
 0xb62   : > { %3545 = vperm.xlu1 %3940, %v3879_v10   ;;  %3550 = vperm.xlu0 %3941, %v3880_v20  }
 0xb66   : > { %3570 = vperm.xlu1 %3940, %v3882_v62  }
 0xb6a   : > { %3575 = vperm.xlu1 %3940, %v3883_v1  }
 0xb74   : > { %v2985_v24 = vpop.permute.xlu0 %2984  ;;  %v3032_v27 = vpop.permute.xlu1 %3031 }
 0xb78   : > { %v2991_v36 = vpop.permute.xlu0 %2990  ;;  %v3114_v46 = vpop.permute.xlu1 %3113 }
 0xb79   : > { %v2996_v25 = vsel %vm6829_vm6, %v2985_v24, %v2991_v36  ;;  %v2999_v55 = vsel %vm6830_vm5, %v2991_v36, %v2985_v24  ;;  %vm6334_vm6 = vcmp.eq.s32.totalorder %v3133_v63, 1  ;;  %vm6846_vm5 = vcmp.lt.s32.totalorder %v4481_v17, 15 }
 0xb7a   : > { %v3013_v39 = vsel %vm6278_vm8, %v2999_v55, 0.0  ;;  %v3014_v49 = vsel %vm6282_vm11, %v2996_v25, 0.0  ;;  %v3172_v28 = vsel %vm6846_vm5, 1, %v4331_v8  ;;  %vm6851_vm5 = vcmp.lt.s32.totalorder %v4469_v12, 1 }
 0xb7b   : > { %3019 = vst [vmem:[#allocation2] sm:$0xff] %v3013_v39  ;;  %3020 = vst [vmem:[#allocation2 + $0x8] sm:$0xff] %v3014_v49  ;;  %v3176_v47 = vrot.slane %v3172_v28, %v4430_v2  ;;  %v3180_v0 = vrot.slane %v3172_v28, %v4437_v3 }
 0xb7c   : > { %v3026_v23 = vpop.permute.xlu0 %3025  ;;  %v3161_v54 = vpop.permute.xlu1 %3160 }
 0xb7d   : > { %v6309_v32 = vsel %vm6835_vm12, %v3026_v23, %v3032_v27  ;;  %v6313_v52 = vsel %vm6836_vm3, %v3032_v27, %v3026_v23  ;;  %vm6847_vm12 = vcmp.lt.s32.totalorder %v4469_v12, 15 }
 0xb7e   : > { %vm6848_vm3 = vmmov %vm6847_vm12 }
 0xb80   : > { %v3067_v37 = vpop.permute.xlu0 %3066  ;;  %v2987_v60 = vpop.permute.xlu1 %2986 }
 0xb84   : > { %v3073_v53 = vpop.permute.xlu0 %3072  ;;  %v2993_v21 = vpop.permute.xlu1 %2992 }
 0xb85   : > { %v6343_v29 = vsel %vm6847_vm12, %v3067_v37, %v3073_v53  ;;  %v6347_v13 = vsel %vm6848_vm3, %v3073_v53, %v3067_v37  ;;  %v2997_v56 = vsel %vm6849_vm7, %v2987_v60, %v2993_v21  ;;  %v3000_v38 = vsel %vm6850_vm0, %v2993_v21, %v2987_v60  ;;  %vm6852_vm0 = vmmov %vm6851_vm5 }
 0xb86   : > { %v3015_v40 = vsel %vm6278_vm8, %v3000_v38, 0.0  ;;  %v3016_v17 = vsel %vm6282_vm11, %v2997_v56, 0.0  ;;  %vm4223_vm12 = vmpackc.low %vm6282_vm11, %vm6282_vm11  ;;  %v4224_v9 = vpack.c.bf16 %v2997_v56, %v2996_v25  ;;  %v4227_v4 = vpack.c.bf16 %v3000_v38, %v2999_v55 }
 0xb87   : > { %3021 = vst [vmem:[#allocation2 + $0x10] sm:$0xff] %v3015_v40  ;;  %3022 = vst [vmem:[#allocation2 + $0x18] sm:$0xff] %v3016_v17  ;;  %vm6373_vm7 = vcmp.eq.s32.totalorder %v3176_v47, 1 }
 0xb88   : > { %v3108_v10 = vpop.permute.xlu0 %3107  ;;  %v3069_v20 = vpop.permute.xlu1 %3068  ;;  %4225 = vmatprep.subr.msk.bf16.mxu1 %vm4223_vm12, %v4224_v9  ;;  %vm4226_vm3 = vmpackc.low %vm6278_vm8, %vm6278_vm8  ;;  %v6854_v22 = vsel %vm6373_vm7, 4294967295, %v6853_v22  ;;  %vm6861_vm7 = vcmp.lt.s32.totalorder %v4469_v12, 16 }
 0xb89   : > { %v6361_v62 = vsel %vm6851_vm5, %v3108_v10, %v3114_v46  ;;  %v6365_v1 = vsel %vm6852_vm0, %v3114_v46, %v3108_v10  ;;  %4228 = vmatpush1.bf16.msk.msra.mxu1 %vm4226_vm3, %v4227_v4  ;;  %vm6377_vm5 = vcmp.eq.s32.totalorder %v3180_v0, 1  ;;  %vm6857_vm0 = vcmp.lt.s32.totalorder %v4469_v12, 127 }
 0xb8a   : > { %vm6858_vm12 = vmmov %vm6857_vm0  ;;  %vm6859_vm3 = vcmp.lt.s32.totalorder %v4469_v12, 15 }
 0xb8b   : > { %vm6860_vm13 = vmmov %vm6859_vm3 }
 0xb8c   : > { %v3155_v27 = vpop.permute.xlu0 %3154  ;;  %v3075_v44 = vpop.permute.xlu1 %3074 }
 0xb8d   : > { %v6383_v31 = vsel %vm6857_vm0, %v3155_v27, %v3161_v54  ;;  %v6387_v57 = vsel %vm6858_vm12, %v3161_v54, %v3155_v27  ;;  %v3079_v36 = vsel %vm6859_vm3, %v3069_v20, %v3075_v44  ;;  %v3082_v46 = vsel %vm6860_vm13, %v3075_v44, %v3069_v20  ;;  %vm6862_vm0 = vmmov %vm6861_vm7 }
 0xb8e   : > { %v3213_v54 = vsel %vm4569_vm14, 1, %v4331_v8  ;;  %vm6863_vm12 = vmmov %vm6862_vm0  ;;  %v4242_v51 = vpack.c.bf16 %v3079_v36, %v6343_v29  ;;  %v4245_v33 = vpack.c.bf16 %v3082_v46, %v6347_v13 }
 0xb8f   : > { %vm6864_vm13 = vmmov %vm6862_vm0  ;;  %v3217_v60 = vrot.slane %v3213_v54, %v4430_v2  ;;  %v3221_v42 = vrot.slane %v3213_v54, %v4437_v3 }
 0xb90   : > { %v3028_v25 = vpop.permute.xlu0 %3027  ;;  %v2995_v55 = vpop.permute.xlu1 %2994 }
 0xb91   : > { %vm6414_vm14 = vcmp.eq.s32.totalorder %v3221_v42, 1 }
 0xb94   : > { %v3034_v39 = vpop.permute.xlu0 %3033  ;;  %v3030_v49 = vpop.permute.xlu1 %3029 }
 0xb95   : > { %v3038_v23 = vsel %vm6861_vm7, %v3028_v25, %v3034_v39  ;;  %v3041_v30 = vsel %vm6862_vm0, %v3034_v39, %v3028_v25  ;;  %vm6865_vm7 = vcmp.lt.s32.totalorder %v4469_v12, 1  ;;  %vm6410_vm0 = vcmp.eq.s32.totalorder %v3217_v60, 1 }
 0xb96   : > { %vm6866_vm3 = vmmov %vm6865_vm7  ;;  %v6868_v6 = vsel %vm6410_vm0, 4294967295, %v6867_v6 }
 0xb97   : > { %vm4229_vm0 = vmpackc.low %vm6300_vm10, %vm6282_vm11  ;;  %vm6875_vm11 = vcmp.lt.s32.totalorder %v4469_v12, 127 }
 0xb98   : > { %v3110_v61 = vpop.permute.xlu0 %3109  ;;  %v3036_v58 = vpop.permute.xlu1 %3035 }
 0xb99   : > { %v3039_v59 = vsel %vm6863_vm12, %v3030_v49, %v3036_v58  ;;  %v3042_v37 = vsel %vm6864_vm13, %v3036_v58, %v3030_v49  ;;  %vm6871_vm12 = vcmp.lt.s32.totalorder %v4469_v12, 17 }
 0xb9a   : > { %vm6872_vm13 = vmmov %vm6871_vm12  ;;  %v4236_v44 = vpack.c.bf16 %v3039_v59, %v3038_v23 }
 0xb9c   : > { %v3116_v63 = vpop.permute.xlu0 %3115  ;;  %v3198_v53 = vpop.permute.xlu1 %3197 }
 0xb9d   : > { %v3120_v21 = vsel %vm6865_vm7, %v3110_v61, %v3116_v63  ;;  %v3123_v28 = vsel %vm6866_vm3, %v3116_v63, %v3110_v61  ;;  %vm6873_vm7 = vcmp.lt.s32.totalorder %v4469_v12, 113 }
 0xb9e   : > { %vm6874_vm3 = vmmov %vm6873_vm7 }
 0xba0   : > { %v2989_v38 = vpop.permute.xlu0 %2988  ;;  %v3204_v40 = vpop.permute.xlu1 %3203 }
 0xba1   : > { %v2998_v17 = vsel %vm6871_vm12, %v2989_v38, %v2995_v55  ;;  %v3001_v47 = vsel %vm6872_vm13, %v2995_v55, %v2989_v38  ;;  %v6424_v0 = vsel %vm6873_vm7, %v3198_v53, %v3204_v40  ;;  %v6428_v10 = vsel %vm6874_vm3, %v3204_v40, %v3198_v53  ;;  %vm4232_vm12 = vmpackc.low %vm6296_vm2, %vm6278_vm8 }
 0xba2   : > { %v4230_v4 = vpack.c.bf16 %v6309_v32, %v2998_v17  ;;  %v4233_v27 = vpack.c.bf16 %v6313_v52, %v3001_v47  ;;  %vm4235_vm13 = vmpackc.low %vm6300_vm10, %vm6300_vm10  ;;  %v4239_v52 = vpack.c.bf16 %v3042_v37, %v3041_v30  ;;  %vm6877_vm7 = vcmp.lt.s32.totalorder %v4469_v12, 15 }
 0xba3   : > { %vm4238_vm8 = vmpackc.low %vm6296_vm2, %vm6296_vm2  ;;  %v4263_v40 = vpack.c.bf16 %v6383_v31, %v6162_v14 }
 0xba4   : > { %v3157_v20 = vpop.permute.xlu0 %3156  ;;  %v3243_v9 = vpop.permute.xlu1 %3242  ;;  %4231 = vmatprep.subr.msk.bf16.mxu1 %vm4229_vm0, %v4230_v4  ;;  %vm6876_vm0 = vmmov %vm6875_vm11 }
 0xba5   : > { %4234 = vmatpush1.bf16.msk.msra.mxu1 %vm4232_vm12, %v4233_v27  ;;  %vm4241_vm10 = vmpackc.low %vm6326_vm15, %vm6326_vm15  ;;  %vm6879_vm12 = vcmp.lt.s32.totalorder %v4474_v16, 15 }
 0xba6   : > { %4237 = vmatprep.subr.msk.bf16.mxu1 %vm4235_vm13, %v4236_v44  ;;  %vm6878_vm3 = vmmov %vm6877_vm7  ;;  %v3254_v29 = vsel %vm6879_vm12, 1, %v4331_v8  ;;  %vm6880_vm13 = vcmp.lt.s32.totalorder %v4469_v12, 1  ;;  %vm6890_vm12 = vcmp.lt.s32.totalorder %v4469_v12, 127 }
 0xba7   : > { %vm4244_vm2 = vmpackc.low %vm6322_vm9, %vm6322_vm9  ;;  %v3258_v46 = vrot.slane %v3254_v29, %v4430_v2  ;;  %v3262_v54 = vrot.slane %v3254_v29, %v4437_v3 }
 0xba8   : > { %v3163_v50 = vpop.permute.xlu0 %3162  ;;  %v3077_v25 = vpop.permute.xlu1 %3076 }
 0xba9   : > { %v6445_v32 = vsel %vm6875_vm11, %v3157_v20, %v3163_v50  ;;  %v3170_v34 = vsel %vm6876_vm0, %v3163_v50, %v3157_v20  ;;  %4240 = vmatpush1.bf16.msk.msra.mxu1 %vm4238_vm8, %v4239_v52  ;;  %vm6881_vm11 = vmmov %vm6880_vm13 }
 0xbaa   : > { %4243 = vmatprep.subr.msk.bf16.mxu1 %vm4241_vm10, %v4242_v51  ;;  %vm4247_vm0 = vmpackc.low %vm6334_vm6, %vm6326_vm15  ;;  %vm6882_vm10 = vcmp.lt.s32.totalorder %v4469_v12, 113 }
 0xbab   : > { %vm4250_vm8 = vmpackc.low %vm6330_vm4, %vm6322_vm9 }
 0xbac   : > { %v3071_v55 = vpop.permute.xlu0 %3070  ;;  %v3112_v39 = vpop.permute.xlu1 %3111  ;;  %vm6883_vm15 = vmmov %vm6882_vm10 }
 0xbad   : > { %v3080_v49 = vsel %vm6877_vm7, %v3071_v55, %v3077_v25  ;;  %v3083_v23 = vsel %vm6878_vm3, %v3077_v25, %v3071_v55  ;;  %4246 = vmatpush1.bf16.msk.msra.mxu1 %vm4244_vm2, %v4245_v33  ;;  %vm4253_vm7 = vmpackc.low %vm6334_vm6, %vm6334_vm6  ;;  %vm6495_vm3 = vcmp.eq.s32.totalorder %v3258_v46, 1  ;;  %vm6499_vm2 = vcmp.eq.s32.totalorder %v3262_v54, 1  ;;  %v3871_v54 = vld [vmem:[%s6674_s3 + $0x70] sm:$0xff] }
 0xbae   : > { %v4248_v13 = vpack.c.bf16 %v6361_v62, %v3080_v49  ;;  %v4251_v16 = vpack.c.bf16 %v6365_v1, %v3083_v23  ;;  %v3385_v1 = vpack.c.bf16 %v6156_v45, %v6146_v41  ;;  %vm4256_vm9 = vmpackc.low %vm6330_vm4, %vm6330_vm4  ;;  %v3384_v41 = vpack.c.bf16 %v6154_v11, %v6144_v19 }
 0xbaf   : > { %vm6888_vm6 = vcmp.lt.s32.totalorder %v4469_v12, 112  ;;  %v4260_v19 = vpack.c.bf16 %v6387_v57, %v6164_v48 }
 0xbb0   : > { %v3196_v30 = vpop.permute.xlu0 %3195  ;;  %v3118_v61 = vpop.permute.xlu1 %3117  ;;  %4249 = vmatprep.subr.msk.bf16.mxu1 %vm4247_vm0, %v4248_v13  ;;  %vm6889_vm4 = vmmov %vm6888_vm6  ;;  %vm6892_vm0 = vnez %v6854_v22 }
 0xbb1   : > { %v3121_v36 = vsel %vm6880_vm13, %v3112_v39, %v3118_v61  ;;  %v3124_v58 = vsel %vm6881_vm11, %v3118_v61, %v3112_v39  ;;  %4252 = vmatpush1.bf16.msk.msra.mxu1 %vm4250_vm8, %v4251_v16  ;;  %vm6891_vm13 = vmmov %vm6890_vm12 }
 0xbb2   : > { %v4254_v35 = vpack.c.bf16 %v3121_v36, %v3120_v21  ;;  %v4257_v60 = vpack.c.bf16 %v3124_v58, %v3123_v28  ;;  %vm4259_vm11 = vmpackc.low %vm6377_vm5, %vm6777_vm1 }
 0xbb3   : > { %vm4262_vm8 = vmpackc.low %vm6892_vm0, %vm6777_vm1 }
 0xbb4   : > { %v3202_v59 = vpop.permute.xlu0 %3201  ;;  %v3159_v43 = vpop.permute.xlu1 %3158  ;;  %4255 = vmatprep.subr.msk.bf16.mxu1 %vm4253_vm7, %v4254_v35  ;;  %vm6894_vm7 = vmmov %vm6889_vm4 }
 0xbb5   : > { %v3207_v37 = vsel %vm6882_vm10, %v3196_v30, %v3202_v59  ;;  %v3210_v62 = vsel %vm6883_vm15, %v3202_v59, %v3196_v30  ;;  %4258 = vmatpush1.bf16.msk.msra.mxu1 %vm4256_vm9, %v4257_v60  ;;  %vm4265_vm10 = vmpackc.low %vm6377_vm5, %vm6377_vm5  ;;  %vm6895_vm9 = vnez %v6713_v26 }
 0xbb6   : > { %3443 = vmatprep.subr.bf16.mxu1 %v3385_v1  ;;  %vm6893_vm15 = vmmov %vm6889_vm4  ;;  %v4272_v24 = vpack.c.bf16 %v6428_v10, %v3210_v62  ;;  %v3295_v4 = vsel %vm6895_vm9, 1, %v4331_v8  ;;  %v4275_v44 = vpack.c.bf16 %v6424_v0, %v3207_v37  ;;  %v3875_v37 = vcombine.high %v3871_v54, %v3871_v54 }
 0xbb7   : > { %vm4268_vm1 = vmpackc.low %vm6892_vm0, %vm6892_vm0  ;;  %v3299_v10 = vrot.slane %v3295_v4, %v4430_v2  ;;  %v3303_v50 = vrot.slane %v3295_v4, %v4437_v3  ;;  %v3874_v62 = vcombine.low %v3871_v54, %v3871_v54 }
 0xbb8   : > { %v3237_v7 = vpop.permute.xlu0 %3236  ;;  %v3165_v53 = vpop.permute.xlu1 %3164  ;;  %vm4271_vm5 = vmpackc.low %vm6414_vm14, %vm6414_vm14 }
 0xbb9   : > { %v3248_v45 = vsel %vm6888_vm6, %v3237_v7, %v3243_v9  ;;  %v3251_v15 = vsel %vm6889_vm4, %v3243_v9, %v3237_v7  ;;  %v3168_v21 = vsel %vm6890_vm12, %v3159_v43, %v3165_v53  ;;  %v3171_v28 = vsel %vm6891_vm13, %v3165_v53, %v3159_v43  ;;  %3444 = vmatpush1.bf16.msra.mxu1 %v3384_v41  ;;  %vm6900_vm0 = vmmov %vm6894_vm7  ;;  %v3964_v43 = vld [vmem:[%s6674_s3 + $0x60] ss:$8 sps:$4 sm:$0xff]  }
 0xbba   : > { %4261 = vmatprep.subr.msk.bf16.mxu1 %vm4259_vm11, %v4260_v19  ;;  %v4266_v17 = vpack.c.bf16 %v3171_v28, %v3170_v34  ;;  %v4269_v14 = vpack.c.bf16 %v3168_v21, %v6445_v32  ;;  %vm6896_vm6 = vcmp.lt.s32.totalorder %v4469_v12, 113  ;;  %vm6898_vm12 = vnez %v6868_v6  ;;  %vm6899_vm11 = vmmov %vm6894_vm7 }
 0xbbb   : > { %vm6897_vm4 = vmmov %vm6896_vm6 }
 0xbbc   : > { %v3239_v11 = vpop.permute.xlu0 %3238  ;;  %v3280_v38 = vpop.permute.xlu1 %3279  ;;  %vm4274_vm13 = vmpackc.low %vm6898_vm12, %vm6898_vm12 }
 0xbbd   : > { %4264 = vmatpush1.bf16.msk.msra.mxu1 %vm4262_vm8, %v4263_v40  ;;  %vm4277_vm8 = vmpackc.low %vm6499_vm2, %vm6414_vm14  ;;  %vm6905_vm14 = vcmp.lt.s32.totalorder %v4469_v12, 111 }
 0xbbe   : > { %4267 = vmatprep.subr.msk.bf16.mxu1 %vm4265_vm10, %v4266_v17  ;;  %vm4280_vm10 = vmpackc.low %vm6495_vm3, %vm6898_vm12 }
 0xbc0   : > { %v3245_v47 = vpop.permute.xlu0 %3244  ;;  %v3206_v20 = vpop.permute.xlu1 %3205 }
 0xbc1   : > { %v3249_v48 = vsel %vm6893_vm15, %v3239_v11, %v3245_v47  ;;  %v3252_v57 = vsel %vm6894_vm7, %v3245_v47, %v3239_v11  ;;  %4270 = vmatpush1.bf16.msk.msra.mxu1 %vm4268_vm1, %v4269_v14  ;;  %vm6563_vm15 = vcmp.eq.s32.totalorder %v3299_v10, 1  ;;  %vm6567_vm7 = vcmp.eq.s32.totalorder %v3303_v50, 1  ;;  %vm6906_vm1 = vmmov %vm6905_vm14  ;;  %v3881_v14 = vld [vmem:[%s6675_s4 + $0x88] sm:$0xff] }
 0xbc2   : > { %4273 = vmatprep.subr.msk.bf16.mxu1 %vm4271_vm5, %v4272_v24  ;;  %vm6907_vm5 = vmmov %vm6906_vm1 }
 0xbc3   : > { %vm6908_vm9 = vmmov %vm6906_vm1 }
 0xbc4   : > { %v3200_v31 = vpop.permute.xlu0 %3199  ;;  %v3241_v9 = vpop.permute.xlu1 %3240  ;;  %vm6909_vm12 = vmmov %vm6906_vm1 }
 0xbc5   : > { %v3209_v22 = vsel %vm6896_vm6, %v3200_v31, %v3206_v20  ;;  %v3212_v27 = vsel %vm6897_vm4, %v3206_v20, %v3200_v31  ;;  %4276 = vmatpush1.bf16.msk.msra.mxu1 %vm4274_vm13, %v4275_v44  ;;  %vm4283_vm6 = vmpackc.low %vm6499_vm2, %vm6499_vm2 }
 0xbc6   : > { %v4278_v34 = vpack.c.bf16 %v3251_v15, %v3212_v27  ;;  %v4281_v2 = vpack.c.bf16 %v3248_v45, %v3209_v22  ;;  %vm4286_vm4 = vmpackc.low %vm6495_vm3, %vm6495_vm3 }
 0xbc7   : > { %vm6910_vm13 = vmmov %vm6906_vm1 }
 0xbc8   : > { %v3278_v25 = vpop.permute.xlu0 %3277  ;;  %v3247_v26 = vpop.permute.xlu1 %3246  ;;  %4279 = vmatprep.subr.msk.bf16.mxu1 %vm4277_vm8, %v4278_v34  ;;  %vm4289_vm2 = vmpackc.low %vm6567_vm7, %vm6567_vm7  ;;  %vm6913_vm8 = vcmask 719872  }
 0xbc9   : > { %v3250_v8 = vsel %vm6899_vm11, %v3241_v9, %v3247_v26  ;;  %v3253_v32 = vsel %vm6900_vm0, %v3247_v26, %v3241_v9  ;;  %4282 = vmatpush1.bf16.msk.msra.mxu1 %vm4280_vm10, %v4281_v2  ;;  %vm4292_vm3 = vmpackc.low %vm6563_vm15, %vm6563_vm15  ;;  %vm6911_vm11 = vcmask 1043456   ;;  %vm3626_vm10 = vcmask 195584  }
 0xbca   : > { %v4284_v49 = vpack.c.bf16 %v3253_v32, %v3252_v57  ;;  %v4287_v23 = vpack.c.bf16 %v3250_v8, %v3249_v48  ;;  %vm6912_vm0 = vmmov %vm6911_vm11  ;;  %v3884_v57 = vld [vmem:[%s6676_s5 + $0x88] sm:$0xff] }
 0xbcc   : > { %v3284_v56 = vpop.permute.xlu0 %3283  ;;  %v3286_v52 = vpop.permute.xlu1 %3285  ;;  %4285 = vmatprep.subr.msk.bf16.mxu1 %vm4283_vm6, %v4284_v49 }
 0xbcd   : > { %v3289_v51 = vsel %vm6905_vm14, %v3278_v25, %v3284_v56  ;;  %v3292_v6 = vsel %vm6906_vm1, %v3284_v56, %v3278_v25  ;;  %v3290_v55 = vsel %vm6907_vm5, %v3280_v38, %v3286_v52  ;;  %v3293_v39 = vsel %vm6908_vm9, %v3286_v52, %v3280_v38  ;;  %4288 = vmatpush1.bf16.msk.msra.mxu1 %vm4286_vm4, %v4287_v23 }
 0xbce   : > { %v4290_v36 = vpack.c.bf16 %v3293_v39, %v3292_v6  ;;  %v4293_v16 = vpack.c.bf16 %v3290_v55, %v3289_v51 }
 0xbd0   : > { %v3282_v33 = vpop.permute.xlu0 %3281  ;;  %v3288_v30 = vpop.permute.xlu1 %3287  ;;  %4291 = vmatprep.subr.msk.bf16.mxu1 %vm4289_vm2, %v4290_v36 }
 0xbd1   : > { %v3291_v61 = vsel %vm6909_vm12, %v3282_v33, %v3288_v30  ;;  %v3294_v29 = vsel %vm6910_vm13, %v3288_v30, %v3282_v33  ;;  %4294 = vmatpush1.bf16.msk.msra.mxu1 %vm4292_vm3, %v4293_v16 }
 0xbd2   : > { %v3310_v58 = vsel %vm6563_vm15, %v3291_v61, 0.0  ;;  %v3311_v13 = vsel %vm6567_vm7, %v3294_v29, 0.0  ;;  %vm6914_vm15 = vnez %v6705_v5 }
 0xbd3   : > { %v3399_v12 = vpack.c.bf16 %v3311_v13, %v3311_v13  ;;  %v3398_v46 = vpack.c.bf16 %v3310_v58, %v3310_v58 }
 0xbd5   : > { %3876 = vmatprep.subr.msk.bf16.mxu1 %vm6911_vm11, %v3399_v12  ;;  %v3426_v59 = vsel %vm6912_vm0, %v3398_v46, 0  ;;  %v3590_v12 = vstv %s3885_s21 }
 0xbd6   : > { %3458 = vmatpush1.bf16.msra.mxu1 %v3426_v59 }
 0xbd9   : > { %3464 = vmatmul.mubr.bf16.vlgmr.msra.gmra.mrb[16].mxu1 %v3964_v43 }
 0xbda   : > { %3878 = vmatprep.mubr.msk.bf16.mxu1 %vm6913_vm8, %v3875_v37 }
 0xbe1   : > { %3474 = vmatmul.mubr.bf16.gmra.mrb[20].mxu1 %v3874_v62  ;;  %v3546_v24 = vpop.permute.xlu1 %3545  ;;  %v3551_v9 = vpop.permute.xlu0 %3550  ;;  %v3598_v62 = vstv %s3886_s22 }
 0xbe5   : > { %v3571_v31 = vpop.permute.xlu1 %3570 }
 0xbe9   : > { %v3576_v4 = vpop.permute.xlu1 %3575 }
 0xcac   : > { %v6608_v35 = vpop.f32.mrb[16].mxu1 }
 0xcad   : > { %v3494_v1 = vmul.f32 %v6608_v35, %v6608_v35  ;;  %v6612_v60 = vpop.f32.mrb[17].mxu1 }
 0xcae   : > { %v3495_v42 = vmul.f32 %v6612_v60, %v6612_v60  ;;  %v6616_v63 = vpop.f32.mrb[18].mxu1  ;;  %v3482_v7 = vadd.f32 %v6612_v60, %v6608_v35 }
 0xcaf   : > { %v3496_v53 = vmul.f32 %v6616_v63, %v6616_v63  ;;  %v6622_v41 = vpop.f32.mrb[19].mxu1 }
 0xcb0   : > { %v3497_v45 = vmul.f32 %v6622_v41, %v6622_v41  ;;  %3483 = vadd.xlane.f32.xlu0 %v3482_v7  ;;  %v3485_v15 = vadd.f32 %v6622_v41, %v6616_v63  ;;  %v3500_v21 = vadd.f32 %v3495_v42, %v3494_v1 }
 0xcb2   : > { %3486 = vadd.xlane.f32.xlu1 %v3485_v15  ;;  %v3503_v28 = vadd.f32 %v3497_v45, %v3496_v53  ;;  %v3592_v45 = vmul.f32 %v3590_v12, %v6612_v60 }
 0xcb4   : > { %3501 = vadd.xlane.f32.xlu0 %v3500_v21  ;;  %v6628_v19 = vpop.f32.mrb[20].mxu1 }
 0xcb5   : > { %v3498_v11 = vmul.f32 %v6628_v19, %v6628_v19  ;;  %v6632_v38 = vpop.f32.mrb[21].mxu1 }
 0xcb6   : > { %v3499_v40 = vmul.f32 %v6632_v38, %v6632_v38  ;;  %v3488_v17 = vadd.f32 %v6632_v38, %v6628_v19  ;;  %v3479_v47 = vpop.f32.mrb[22].mxu1 }
 0xcb7   : > { %v3480_v20 = vpop.f32.mrb[23].mxu1 }
 0xcb8   : > { %3504 = vadd.xlane.f32.xlu0 %v3503_v28  ;;  %3489 = vadd.xlane.f32.xlu1 %v3488_v17  ;;  %v3506_v48 = vadd.f32 %v3499_v40, %v3498_v11  ;;  %v3591_v20 = vmul.f32 %v3590_v12, %v6608_v35 }
 0xcbc   : > { %3507 = vadd.xlane.f32.xlu0 %v3506_v48 }
 0xcc9   : > { %3580 = vperm.xlu1 %3940, %v3884_v57  }
 0xcd2   : > { %3555 = vperm.xlu0 %3941, %v3881_v14  }
 0xd3d   : > { %v3484_v22 = vpop.xlane.xlu0 %3483 }
 0xd3e   : > { %v3491_v27 = vmul.f32 0.00390625, %v3484_v22 }
 0xd3f   : > { %v3487_v44 = vpop.xlane.xlu1 %3486 }
 0xd40   : > { %v3492_v50 = vmul.f32 0.00390625, %v3487_v44  ;;  %v3512_v25 = vmul.f32 %v3491_v27, %v3491_v27  ;;  %v3525_v29 = vsub.f32 %v6608_v35, %v3491_v27  ;;  %v3526_v36 = vsub.f32 %v6612_v60, %v3491_v27 }
 0xd41   : > { %v3502_v10 = vpop.xlane.xlu0 %3501  ;;  %v3594_v60 = vmul.f32 %v3590_v12, %v6622_v41 }
 0xd42   : > { %v3509_v26 = vmul.f32 0.00390625, %v3502_v10  ;;  %v3513_v0 = vmul.f32 %v3492_v50, %v3492_v50  ;;  %v3527_v46 = vsub.f32 %v6616_v63, %v3492_v50  ;;  %v3528_v54 = vsub.f32 %v6622_v41, %v3492_v50 }
 0xd44   : > { %v3515_v8 = vsub.f32 %v3509_v26, %v3512_v25  ;;  %v3593_v25 = vmul.f32 %v3590_v12, %v6616_v63 }
 0xd45   : > { %v3505_v32 = vpop.xlane.xlu0 %3504  ;;  %v3490_v34 = vpop.xlane.xlu1 %3489 }
 0xd46   : > { %v3518_v2 = vmax.f32 %v3515_v8, 0.0  ;;  %v3510_v3 = vmul.f32 0.00390625, %v3505_v32  ;;  %v3493_v56 = vmul.f32 0.00390625, %v3490_v34 }
 0xd48   : > { %v3531_v52 = vadd.f32 1e-05, %v3518_v2  ;;  %v3516_v51 = vsub.f32 %v3510_v3, %v3513_v0  ;;  %v3514_v6 = vmul.f32 %v3493_v56, %v3493_v56  ;;  %v3529_v15 = vsub.f32 %v6628_v19, %v3493_v56 }
 0xd49   : > { %v3508_v55 = vpop.xlane.xlu0 %3507  ;;  %v3530_v21 = vsub.f32 %v6632_v38, %v3493_v56  ;;  %v3595_v2 = vmul.f32 %v3590_v12, %v6628_v19 }
 0xd4a   : > { %3999 = vrsqrt.f32 %v3531_v52  ;;  %v3519_v39 = vmax.f32 %v3516_v51, 0.0  ;;  %v3511_v49 = vmul.f32 0.00390625, %v3508_v55 }
 0xd4c   : > { %v3532_v23 = vadd.f32 1e-05, %v3519_v39  ;;  %v3517_v33 = vsub.f32 %v3511_v49, %v3514_v6 }
 0xd4e   : > { %4001 = vrsqrt.f32 %v3532_v23  ;;  %v3520_v30 = vmax.f32 %v3517_v33, 0.0 }
 0xd50   : > { %v3533_v61 = vadd.f32 1e-05, %v3520_v30 }
 0xd51   : > { %v3556_v22 = vpop.permute.xlu0 %3555 }
 0xd52   : > { %4003 = vrsqrt.f32 %v3533_v61 }
 0xd54   : > { %v4000_v58 = vpop.eup %3999 }
 0xd55   : > { %v3537_v13 = vmul.f32 %v4000_v58, %v3525_v29  ;;  %v3538_v16 = vmul.f32 %v4000_v58, %v3526_v36  ;;  %v3623_v36 = vld [vmem:[%s6678_s7] sm:$0x1]  ;;  %v3625_v58 = vstv %s3624_s25 }
 0xd57   : > { %v3558_v59 = vmul.f32 %v3546_v24, %v3537_v13  ;;  %v3559_v43 = vmul.f32 %v3546_v24, %v3538_v16 }
 0xd58   : > { %v4002_v37 = vpop.eup %4001 }
 0xd59   : > { %v3539_v1 = vmul.f32 %v4002_v37, %v3527_v46  ;;  %v3540_v42 = vmul.f32 %v4002_v37, %v3528_v54  ;;  %v3584_v7 = vadd.f32 %v3571_v31, %v3559_v43  ;;  %v3583_v53 = vadd.f32 %v3571_v31, %v3558_v59 }
 0xd5b   : > { %v3560_v28 = vmul.f32 %v3551_v9, %v3539_v1  ;;  %v3561_v11 = vmul.f32 %v3551_v9, %v3540_v42  ;;  %v3600_v40 = vmul.f32 %v3598_v62, %v3584_v7  ;;  %v3599_v17 = vmul.f32 %v3598_v62, %v3583_v53  ;;  %v3581_v9 = vpop.permute.xlu1 %3580 }
 0xd5c   : > { %v4004_v47 = vpop.eup %4003 }
 0xd5d   : > { %v3541_v48 = vmul.f32 %v4004_v47, %v3529_v15  ;;  %v3542_v57 = vmul.f32 %v4004_v47, %v3530_v21  ;;  %v3586_v14 = vadd.f32 %v3576_v4, %v3561_v11  ;;  %v3606_v24 = vadd.f32 %v3600_v40, %v3592_v45 }
 0xd5e   : > { %v3585_v27 = vadd.f32 %v3576_v4, %v3560_v28  ;;  %v3605_v31 = vadd.f32 %v3599_v17, %v3591_v20  ;;  %v3596_v4 = vmul.f32 %v3590_v12, %v6632_v38 }
 0xd5f   : > { %v3562_v44 = vmul.f32 %v3556_v22, %v3541_v48  ;;  %v3563_v10 = vmul.f32 %v3556_v22, %v3542_v57  ;;  %v3602_v50 = vmul.f32 %v3598_v62, %v3586_v14  ;;  %v3612_v35 = vmul.f32 0.2, %v3606_v24 }
 0xd60   : > { %v3601_v26 = vmul.f32 %v3598_v62, %v3585_v27  ;;  %v3611_v0 = vmul.f32 0.2, %v3605_v31 }
 0xd61   : > { %v3587_v8 = vadd.f32 %v3581_v9, %v3562_v44  ;;  %v3588_v32 = vadd.f32 %v3581_v9, %v3563_v10  ;;  %v3608_v34 = vadd.f32 %v3602_v50, %v3594_v60  ;;  %v3618_v55 = vmax.f32 %v3606_v24, %v3612_v35 }
 0xd62   : > { %v3607_v3 = vadd.f32 %v3601_v26, %v3593_v25  ;;  %v3617_v49 = vmax.f32 %v3605_v31, %v3611_v0 }
 0xd63   : > { %v3603_v56 = vmul.f32 %v3598_v62, %v3587_v8  ;;  %v3604_v52 = vmul.f32 %v3598_v62, %v3588_v32  ;;  %v3614_v41 = vmul.f32 0.2, %v3608_v34 }
 0xd64   : > { %v3613_v51 = vmul.f32 0.2, %v3607_v3 }
 0xd65   : > { %v3609_v6 = vadd.f32 %v3603_v56, %v3595_v2  ;;  %v3620_v39 = vmax.f32 %v3608_v34, %v3614_v41  ;;  %v3610_v63 = vadd.f32 %v3604_v52, %v3596_v4 }
 0xd66   : > { %v3619_v23 = vmax.f32 %v3607_v3, %v3613_v51 }
 0xd67   : > { %v3890_v33 = vpack.c.bf16 %v3620_v39, %v3618_v55  ;;  %v3616_v30 = vmul.f32 0.2, %v3610_v63  ;;  %v3615_v61 = vmul.f32 0.2, %v3609_v6 }
 0xd68   : > { %v3892_v29 = vpack.c.bf16 %v3619_v23, %v3617_v49 }
 0xd69   : > { %3891 = vmatprep.subr.bf16.mxu0 %v3890_v33  ;;  %v3622_v19 = vmax.f32 %v3610_v63, %v3616_v30  ;;  %v3621_v38 = vmax.f32 %v3609_v6, %v3615_v61 }
 0xd6a   : > { %3893 = vmatpush1.bf16.msra.mxu0 %v3892_v29 }
 0xd6b   : > { %3634 = vmatprep.subr.mxu0 %v3622_v19 }
 0xd6e   : > { %3635 = vmatpush1.msra.mxu0 %v3621_v38 }
 0xd6f   : > { %3887 = vmatmul.mubr.msk.f32.vlgmr.msra.gmra.mrb[24].mxu0 %vm3626_vm10, %v3623_v36 }
 0xe42   : > { %v3696_v13 = vpop.f32.mrb[24].mxu0 }
 0xe43   : > { %v3697_v16 = vadd.f32 %v3696_v13, %v3625_v58  ;;  %v3698_v12 = vpop.f32.mrb[25].mxu0 }
 0xe44   : > { %v3699_v46 = vadd.f32 %v3698_v12, %v3625_v58 }
 0xe46   : > { %v3703_v54 = vcombine.low %v3697_v16, %v3699_v46 }
 0xe48   : > { %v3710_v59 = vrot.slane %v3703_v54, %v4484_v18 }
 0xe4a   : > { %v3717_v43 = vrot.slane %v3710_v59, %v4484_v18 }
 0xe4c   : > { %3719 = vst.msk [vmem:[%s342_s28] sm:$0x3] %vm6914_vm15, %v3717_v43 }
 0xe4d PF: > { %s21_s11 = sadd.s32 1, %s4320_s11  }
 0xe4e   : > { %p18_p1 = scmp.ge.s32.totalorder %s21_s11, 5  }
 0xe50   :  { %20 = sbr.rel (!%p18_p1) target bundleno = 3 (0x3), region = 114 }
 0xe57   :  { %3739 = vsyncpa [#allocation5], 1 }
 0xe58   :  { %3741 = vsyncpa [#allocation5 + $0x1], 1 }

</bundles_post_ra>
